<compile_context>
chip_gen: v7x
topology: tpu7x:2x2x1
jax: 0.10.0
libtpu: 0.0.40
codegen_flags: <defaults>
</compile_context>

<pallas_src>
import jax
import jax.numpy as jnp
from jax.experimental import pallas as pl
from jax.experimental.pallas import tpu as pltpu


_LH = 8    # interior columns start at a sublane-aligned offset inside the halo buffers
_ROWS = 8  # row-chunk height: keeps f32 depthwise acc + per-kw slab inside the 64-vreg file


def _xception_block_kernel(
    x_ref,
    dw1_ref, pw1_ref, b1_ref,
    dw2_ref, pw2_ref, b2_ref,
    dw3_ref, pw3_ref, b3_ref,
    out_ref,
    pad_a, pad_b,   # VMEM scratch: two (H+2, _LH+W+1, C) zero-halo ping-pong buffers
):
    H, W, C = x_ref.shape
    PADW = pad_a.shape[1]
    act_dtype = pad_a.dtype

    # Static row-chunk schedule: full 8-row chunks + one explicit tail chunk (handles H not
    # divisible by 8 without degenerating to a whole-image accumulator).
    chunks = []
    r = 0
    while r < H:
        rows = min(_ROWS, H - r)
        chunks.append((r, rows))
        r += rows

    # ---- zero only the 1-wide halo (interior is fully overwritten before every read).
    # Columns [0, _LH-1) are never read so they stay untouched.
    zrow = jnp.zeros((1, PADW, C), act_dtype)
    zcol = jnp.zeros((H + 2, 1, C), act_dtype)
    for p in (pad_a, pad_b):
        p[0:1, :, :] = zrow
        p[H + 1:H + 2, :, :] = zrow
        p[:, _LH - 1:_LH, :] = zcol
        p[:, _LH + W:_LH + W + 1, :] = zcol

    # ---- relu1: write relu(x) into pad_a's interior, chunk by chunk ----
    for (r0, rows) in chunks:
        pad_a[r0 + 1:r0 + 1 + rows, _LH:_LH + W, :] = jnp.maximum(
            x_ref[r0:r0 + rows, :, :], 0.0).astype(act_dtype)

    def load_dw(dw_ref):
        # Hoisted once per conv: 9 sublane broadcasts of the depthwise weights to (W, C).
        return [jnp.broadcast_to(dw_ref[t:t + 1, :], (W, C)) for t in range(9)]

    def dw_pw_chunk(src_pad, r0, rows, wdw, pw_ref, bias):
        # Depthwise 3x3 (VPU): one column-shifted slab load per kw; the 3 kh taps are free
        # leading-dim slices of that slab.
        acc = None
        for kw in range(3):
            slab = src_pad[r0:r0 + rows + 2, _LH - 1 + kw:_LH - 1 + kw + W, :]
            slab = slab.astype(jnp.float32)
            for kh in range(3):
                term = slab[kh:kh + rows] * wdw[kh * 3 + kw]
                acc = term if acc is None else acc + term
        # Pointwise 1x1 on the MXU in bf16; BN scale is pre-folded into the bf16 weights,
        # only the f32 bias add remains.
        y = jnp.dot(acc.reshape(rows * W, C).astype(jnp.bfloat16), pw_ref[...],
                    preferred_element_type=jnp.float32)
        y = y + bias
        return y.reshape(rows, W, C)

    def conv_relu_into(src_pad, dst_pad, dw_ref, pw_ref, b_ref):
        wdw = load_dw(dw_ref)
        bias = b_ref[...]
        for (r0, rows) in chunks:
            y = dw_pw_chunk(src_pad, r0, rows, wdw, pw_ref, bias)
            dst_pad[r0 + 1:r0 + 1 + rows, _LH:_LH + W, :] = jnp.maximum(
                y, 0.0).astype(act_dtype)

    # conv1 + relu2, conv2 + relu3 (ping-pong between the two halo buffers)
    conv_relu_into(pad_a, pad_b, dw1_ref, pw1_ref, b1_ref)
    conv_relu_into(pad_b, pad_a, dw2_ref, pw2_ref, b2_ref)

    # conv3 + identity residual (re-read x from VMEM per chunk; no relu on the last conv)
    wdw3 = load_dw(dw3_ref)
    bias3 = b3_ref[...]
    for (r0, rows) in chunks:
        y = dw_pw_chunk(pad_a, r0, rows, wdw3, pw3_ref, bias3)
        out_ref[r0:r0 + rows, :, :] = (y + x_ref[r0:r0 + rows, :, :]).astype(out_ref.dtype)


def _round_up(x, m):
    return (x + m - 1) // m * m


def xception_block(x_nchw, kernel_params, act_dtype=jnp.float32):
    """x_nchw: (N, C, H, W) f32.
    kernel_params: 3 tuples (dw (9,C), pw_scaled (C,C), bias (1,C)); pw is cast to bf16 here."""
    x = jnp.transpose(x_nchw, (0, 2, 3, 1)).astype(jnp.float32)  # NCHW -> NHWC
    N, H, W, C0 = x.shape

    # Pad the channel dim to a multiple of 128 so the lane dim is dense. Zero-padded
    # channels stay exactly zero through relu / depthwise / pointwise / bias / residual.
    C = _round_up(C0, 128)
    if C != C0:
        x = jnp.pad(x, ((0, 0), (0, 0), (0, 0), (0, C - C0)))

    args = [x]
    for (dw, pw, bias) in kernel_params:
        if C != C0:
            dw = jnp.pad(dw, ((0, 0), (0, C - C0)))
            pw = jnp.pad(pw, ((0, C - C0), (0, C - C0)))
            bias = jnp.pad(bias, ((0, 0), (0, C - C0)))
        args += [dw.astype(jnp.float32),
                 pw.astype(jnp.bfloat16),      # bf16 MXU operand (BN scale already folded in)
                 bias.astype(jnp.float32)]

    padw = _LH + W + 1

    block_io = pl.BlockSpec((None, H, W, C), lambda n: (n, 0, 0, 0))
    in_specs = [block_io]
    for _ in range(3):
        in_specs += [
            pl.BlockSpec((9, C), lambda n: (0, 0)),
            pl.BlockSpec((C, C), lambda n: (0, 0)),
            pl.BlockSpec((1, C), lambda n: (0, 0)),
        ]

    # VMEM budget from the actual per-step footprint: double-buffered x/out blocks, the two
    # halo scratch buffers, and (conservatively double-buffered) weights, plus headroom.
    act_bytes = jnp.dtype(act_dtype).itemsize
    io_bytes = H * W * C * 4
    scratch_bytes = 2 * (H + 2) * _round_up(padw, 8) * C * act_bytes
    weight_bytes = 3 * (9 * C * 4 + C * C * 2 + C * 4)
    vmem_limit = int(1.25 * (4 * io_bytes + scratch_bytes + 2 * weight_bytes)) + (4 << 20)
    vmem_limit = min(max(vmem_limit, 16 << 20), 96 << 20)

    out = pl.pallas_call(
        _xception_block_kernel,
        out_shape=jax.ShapeDtypeStruct((N, H, W, C), jnp.float32),
        grid=(N,),
        in_specs=in_specs,
        out_specs=block_io,
        scratch_shapes=[
            pltpu.VMEM((H + 2, padw, C), act_dtype),
            pltpu.VMEM((H + 2, padw, C), act_dtype),
        ],
        compiler_params=pltpu.CompilerParams(
            dimension_semantics=("parallel",),   # TODO(synk): add a 2nd parallel axis for N==1 on v7x
            vmem_limit_bytes=vmem_limit,
        ),
    )(*args)

    if C != C0:
        out = out[..., :C0]
    return jnp.transpose(out, (0, 3, 1, 2))  # NHWC -> NCHW


# ---------------- deterministic parameter construction (PyTorch layouts) ----------------

def make_torch_params(key, c_in, c_out):
    """Three SeparableConv2d blocks: conv1 (c_in->c_out), conv2 (c_out->c_out), conv3 (c_out->c_out)."""
    params = []
    dims = [(c_in, c_out), (c_out, c_out), (c_out, c_out)]
    for i, (ci, co) in enumerate(dims):
        k = jax.random.fold_in(key, i)
        k1, k2, k3, k4, k5, k6 = jax.random.split(k, 6)
        dw = jax.random.normal(k1, (ci, 1, 3, 3), jnp.float32) * 0.2            # depthwise (C,1,3,3)
        pw = jax.random.normal(k2, (co, ci, 1, 1), jnp.float32) / jnp.sqrt(ci)  # pointwise (Cout,Cin,1,1)
        gamma = 1.0 + 0.1 * jax.random.normal(k3, (co,), jnp.float32)
        beta = 0.1 * jax.random.normal(k4, (co,), jnp.float32)
        mean = 0.1 * jax.random.normal(k5, (co,), jnp.float32)
        var = 1.0 + 0.1 * jnp.abs(jax.random.normal(k6, (co,), jnp.float32))
        params.append((dw, pw, gamma, beta, mean, var))
    return params


def to_kernel_params(dw, pw, gamma, beta, mean, var, eps=1e-5):
    """PyTorch layouts -> kernel layouts, with the BN scale folded into the pointwise weights."""
    c_in = dw.shape[0]
    dw_k = jnp.transpose(dw[:, 0], (1, 2, 0)).reshape(9, c_in)    # (Cin,1,3,3) -> (9, Cin), row = kh*3+kw
    pw_k = jnp.transpose(pw[:, :, 0, 0], (1, 0))                  # (Cout,Cin)  -> (Cin, Cout)
    scale = gamma / jnp.sqrt(var + eps)                           # BN eval-mode scale
    bias = beta - mean * scale
    pw_scaled = pw_k * scale[None, :]                             # fold BN scale into pw columns
    return dw_k, pw_scaled, bias.reshape(1, -1)


# ---------------- pure-JAX reference (NCHW, mirrors the PyTorch math) ----------------

def _ref_separable(x, dw, pw, gamma, beta, mean, var, eps=1e-5):
    N, C, H, W = x.shape
    xp = jnp.pad(x, ((0, 0), (0, 0), (1, 1), (1, 1)))
    y = jnp.zeros_like(x)
    for kh in range(3):
        for kw in range(3):
            y = y + xp[:, :, kh:kh + H, kw:kw + W] * dw[:, 0, kh, kw][None, :, None, None]
    z = jnp.einsum('nchw,oc->nohw', y, pw[:, :, 0, 0])
    scale = (gamma / jnp.sqrt(var + eps))[None, :, None, None]
    return (z - mean[None, :, None, None]) * scale + beta[None, :, None, None]


def ref_forward(x, params_t):
    v = jnp.maximum(x, 0.0)
    v = _ref_separable(v, *params_t[0])
    v = jnp.maximum(v, 0.0)
    v = _ref_separable(v, *params_t[1])
    v = jnp.maximum(v, 0.0)
    v = _ref_separable(v, *params_t[2])
    return v + x


if __name__ == "__main__":
    key = jax.random.PRNGKey(0)

    def run_case(case_idx, N, C, H, W, tol=3e-2):
        kx, kp = jax.random.split(jax.random.fold_in(key, case_idx))
        x = jax.random.normal(kx, (N, C, H, W), jnp.float32)
        params_t = make_torch_params(kp, C, C)           # inp == oup (Identity residual)
        params_k = [to_kernel_params(*p) for p in params_t]

        out = jax.block_until_ready(xception_block(x, params_k))
        ref = ref_forward(x, params_t)
        assert out.shape == ref.shape == (N, C, H, W)
        max_err = float(jnp.max(jnp.abs(out - ref)))
        if not jnp.isfinite(max_err) or max_err > tol:
            raise SystemExit(f"case {case_idx}: mismatch vs reference, max abs err = {max_err}")

    # lane-dense channels, H a multiple of the 8-row chunk
    run_case(0, N=2, C=128, H=16, W=16)
    # channel-padding path (96 -> 128 lanes) + tail row-chunk path (H=20 -> chunks 8,8,4)
    run_case(1, N=2, C=96, H=20, W=16)

    print("KERNEL_OK")
</pallas_src>

<mosaic_0001>
module attributes {stable_mosaic.version = 11 : i64} {
  func.func @_xception_block_kernel(%arg0: i32, %arg1: memref<1x16x16x128xf32, #tpu.memory_space<vmem>>, %arg2: memref<9x128xf32, #tpu.memory_space<vmem>>, %arg3: memref<128x128xbf16, #tpu.memory_space<vmem>>, %arg4: memref<1x128xf32, #tpu.memory_space<vmem>>, %arg5: memref<9x128xf32, #tpu.memory_space<vmem>>, %arg6: memref<128x128xbf16, #tpu.memory_space<vmem>>, %arg7: memref<1x128xf32, #tpu.memory_space<vmem>>, %arg8: memref<9x128xf32, #tpu.memory_space<vmem>>, %arg9: memref<128x128xbf16, #tpu.memory_space<vmem>>, %arg10: memref<1x128xf32, #tpu.memory_space<vmem>>, %arg11: memref<1x16x16x128xf32, #tpu.memory_space<vmem>>, %arg12: memref<18x25x128xf32, #tpu.memory_space<vmem>>, %arg13: memref<18x25x128xf32, #tpu.memory_space<vmem>>) attributes {dimension_semantics = [#tpu.dimension_semantics<parallel>], iteration_bounds = array<i64: 2>, scalar_prefetch = 0 : i64, scratch_operands = 2 : i64, tpu.core_type = #tpu.core_type<tc>, window_params = [{transform_indices = @transform_0, window_bounds = array<i64: 1, 16, 16, 128>}, {pipeline_mode = #tpu.pipeline_mode<synchronous>, transform_indices = @transform_1, window_bounds = array<i64: 9, 128>}, {pipeline_mode = #tpu.pipeline_mode<synchronous>, transform_indices = @transform_2, window_bounds = array<i64: 128, 128>}, {pipeline_mode = #tpu.pipeline_mode<synchronous>, transform_indices = @transform_3, window_bounds = array<i64: 1, 128>}, {pipeline_mode = #tpu.pipeline_mode<synchronous>, transform_indices = @transform_4, window_bounds = array<i64: 9, 128>}, {pipeline_mode = #tpu.pipeline_mode<synchronous>, transform_indices = @transform_5, window_bounds = array<i64: 128, 128>}, {pipeline_mode = #tpu.pipeline_mode<synchronous>, transform_indices = @transform_6, window_bounds = array<i64: 1, 128>}, {pipeline_mode = #tpu.pipeline_mode<synchronous>, transform_indices = @transform_7, window_bounds = array<i64: 9, 128>}, {pipeline_mode = #tpu.pipeline_mode<synchronous>, transform_indices = @transform_8, window_bounds = array<i64: 128, 128>}, {pipeline_mode = #tpu.pipeline_mode<synchronous>, transform_indices = @transform_9, window_bounds = array<i64: 1, 128>}, {transform_indices = @transform_10, window_bounds = array<i64: 1, 16, 16, 128>}]} {
    %cst = arith.constant 0.000000e+00 : f32
    %0 = vector.broadcast %cst : f32 to vector<1x25x128xf32>
    %cst_0 = arith.constant 0.000000e+00 : f32
    %1 = vector.broadcast %cst_0 : f32 to vector<18x1x128xf32>
    %c0 = arith.constant 0 : index
    %c0_1 = arith.constant 0 : index
    %c0_2 = arith.constant 0 : index
    %2 = vector.load %arg12[%c0, %c0_1, %c0_2] : memref<18x25x128xf32, #tpu.memory_space<vmem>>, vector<1x25x128xf32>
    tpu.vector_store %arg12[%c0, %c0_1, %c0_2], %0 {strides = array<i32>} : memref<18x25x128xf32, #tpu.memory_space<vmem>>, vector<1x25x128xf32>,
    %c17 = arith.constant 17 : index
    %c0_3 = arith.constant 0 : index
    %c0_4 = arith.constant 0 : index
    %3 = vector.load %arg12[%c17, %c0_3, %c0_4] : memref<18x25x128xf32, #tpu.memory_space<vmem>>, vector<1x25x128xf32>
    tpu.vector_store %arg12[%c17, %c0_3, %c0_4], %0 {strides = array<i32>} : memref<18x25x128xf32, #tpu.memory_space<vmem>>, vector<1x25x128xf32>,
    %c0_5 = arith.constant 0 : index
    %c7 = arith.constant 7 : index
    %c0_6 = arith.constant 0 : index
    %4 = vector.load %arg12[%c0_5, %c7, %c0_6] : memref<18x25x128xf32, #tpu.memory_space<vmem>>, vector<18x1x128xf32>
    tpu.vector_store %arg12[%c0_5, %c7, %c0_6], %1 {strides = array<i32>} : memref<18x25x128xf32, #tpu.memory_space<vmem>>, vector<18x1x128xf32>,
    %c0_7 = arith.constant 0 : index
    %c24 = arith.constant 24 : index
    %c0_8 = arith.constant 0 : index
    %5 = vector.load %arg12[%c0_7, %c24, %c0_8] : memref<18x25x128xf32, #tpu.memory_space<vmem>>, vector<18x1x128xf32>
    tpu.vector_store %arg12[%c0_7, %c24, %c0_8], %1 {strides = array<i32>} : memref<18x25x128xf32, #tpu.memory_space<vmem>>, vector<18x1x128xf32>,
    %c0_9 = arith.constant 0 : index
    %c0_10 = arith.constant 0 : index
    %c0_11 = arith.constant 0 : index
    %6 = vector.load %arg13[%c0_9, %c0_10, %c0_11] : memref<18x25x128xf32, #tpu.memory_space<vmem>>, vector<1x25x128xf32>
    tpu.vector_store %arg13[%c0_9, %c0_10, %c0_11], %0 {strides = array<i32>} : memref<18x25x128xf32, #tpu.memory_space<vmem>>, vector<1x25x128xf32>,
    %c17_12 = arith.constant 17 : index
    %c0_13 = arith.constant 0 : index
    %c0_14 = arith.constant 0 : index
    %7 = vector.load %arg13[%c17_12, %c0_13, %c0_14] : memref<18x25x128xf32, #tpu.memory_space<vmem>>, vector<1x25x128xf32>
    tpu.vector_store %arg13[%c17_12, %c0_13, %c0_14], %0 {strides = array<i32>} : memref<18x25x128xf32, #tpu.memory_space<vmem>>, vector<1x25x128xf32>,
    %c0_15 = arith.constant 0 : index
    %c7_16 = arith.constant 7 : index
    %c0_17 = arith.constant 0 : index
    %8 = vector.load %arg13[%c0_15, %c7_16, %c0_17] : memref<18x25x128xf32, #tpu.memory_space<vmem>>, vector<18x1x128xf32>
    tpu.vector_store %arg13[%c0_15, %c7_16, %c0_17], %1 {strides = array<i32>} : memref<18x25x128xf32, #tpu.memory_space<vmem>>, vector<18x1x128xf32>,
    %c0_18 = arith.constant 0 : index
    %c24_19 = arith.constant 24 : index
    %c0_20 = arith.constant 0 : index
    %9 = vector.load %arg13[%c0_18, %c24_19, %c0_20] : memref<18x25x128xf32, #tpu.memory_space<vmem>>, vector<18x1x128xf32>
    tpu.vector_store %arg13[%c0_18, %c24_19, %c0_20], %1 {strides = array<i32>} : memref<18x25x128xf32, #tpu.memory_space<vmem>>, vector<18x1x128xf32>,
    %c0_21 = arith.constant 0 : index
    %c0_22 = arith.constant 0 : index
    %c0_23 = arith.constant 0 : index
    %c0_24 = arith.constant 0 : index
    %10 = vector.load %arg1[%c0_21, %c0_22, %c0_23, %c0_24] : memref<1x16x16x128xf32, #tpu.memory_space<vmem>>, vector<1x8x16x128xf32>
    %11 = vector.shape_cast %10 : vector<1x8x16x128xf32> to vector<8x16x128xf32>
    %cst_25 = arith.constant 0.000000e+00 : f32
    %12 = vector.broadcast %cst_25 : f32 to vector<8x16x128xf32>
    %13 = arith.maximumf %11, %12 : vector<8x16x128xf32>
    %c1 = arith.constant 1 : index
    %c8 = arith.constant 8 : index
    %c0_26 = arith.constant 0 : index
    %14 = vector.load %arg12[%c1, %c8, %c0_26] : memref<18x25x128xf32, #tpu.memory_space<vmem>>, vector<8x16x128xf32>
    tpu.vector_store %arg12[%c1, %c8, %c0_26], %13 {strides = array<i32>} : memref<18x25x128xf32, #tpu.memory_space<vmem>>, vector<8x16x128xf32>,
    %c0_27 = arith.constant 0 : index
    %c8_28 = arith.constant 8 : index
    %c0_29 = arith.constant 0 : index
    %c0_30 = arith.constant 0 : index
    %15 = vector.load %arg1[%c0_27, %c8_28, %c0_29, %c0_30] : memref<1x16x16x128xf32, #tpu.memory_space<vmem>>, vector<1x8x16x128xf32>
    %16 = vector.shape_cast %15 : vector<1x8x16x128xf32> to vector<8x16x128xf32>
    %cst_31 = arith.constant 0.000000e+00 : f32
    %17 = vector.broadcast %cst_31 : f32 to vector<8x16x128xf32>
    %18 = arith.maximumf %16, %17 : vector<8x16x128xf32>
    %c9 = arith.constant 9 : index
    %c8_32 = arith.constant 8 : index
    %c0_33 = arith.constant 0 : index
    %19 = vector.load %arg12[%c9, %c8_32, %c0_33] : memref<18x25x128xf32, #tpu.memory_space<vmem>>, vector<8x16x128xf32>
    tpu.vector_store %arg12[%c9, %c8_32, %c0_33], %18 {strides = array<i32>} : memref<18x25x128xf32, #tpu.memory_space<vmem>>, vector<8x16x128xf32>,
    %c0_34 = arith.constant 0 : index
    %c0_35 = arith.constant 0 : index
    %20 = vector.load %arg2[%c0_34, %c0_35] : memref<9x128xf32, #tpu.memory_space<vmem>>, vector<1x128xf32>
    %21 = vector.shape_cast %20 : vector<1x128xf32> to vector<1x128xf32>
    %22 = vector.broadcast %21 : vector<1x128xf32> to vector<16x128xf32>
    %c1_36 = arith.constant 1 : index
    %c0_37 = arith.constant 0 : index
    %23 = vector.load %arg2[%c1_36, %c0_37] : memref<9x128xf32, #tpu.memory_space<vmem>>, vector<1x128xf32>
    %24 = vector.shape_cast %23 : vector<1x128xf32> to vector<1x128xf32>
    %25 = vector.broadcast %24 : vector<1x128xf32> to vector<16x128xf32>
    %c2 = arith.constant 2 : index
    %c0_38 = arith.constant 0 : index
    %26 = vector.load %arg2[%c2, %c0_38] : memref<9x128xf32, #tpu.memory_space<vmem>>, vector<1x128xf32>
    %27 = vector.shape_cast %26 : vector<1x128xf32> to vector<1x128xf32>
    %28 = vector.broadcast %27 : vector<1x128xf32> to vector<16x128xf32>
    %c3 = arith.constant 3 : index
    %c0_39 = arith.constant 0 : index
    %29 = vector.load %arg2[%c3, %c0_39] : memref<9x128xf32, #tpu.memory_space<vmem>>, vector<1x128xf32>
    %30 = vector.shape_cast %29 : vector<1x128xf32> to vector<1x128xf32>
    %31 = vector.broadcast %30 : vector<1x128xf32> to vector<16x128xf32>
    %c4 = arith.constant 4 : index
    %c0_40 = arith.constant 0 : index
    %32 = vector.load %arg2[%c4, %c0_40] : memref<9x128xf32, #tpu.memory_space<vmem>>, vector<1x128xf32>
    %33 = vector.shape_cast %32 : vector<1x128xf32> to vector<1x128xf32>
    %34 = vector.broadcast %33 : vector<1x128xf32> to vector<16x128xf32>
    %c5 = arith.constant 5 : index
    %c0_41 = arith.constant 0 : index
    %35 = vector.load %arg2[%c5, %c0_41] : memref<9x128xf32, #tpu.memory_space<vmem>>, vector<1x128xf32>
    %36 = vector.shape_cast %35 : vector<1x128xf32> to vector<1x128xf32>
    %37 = vector.broadcast %36 : vector<1x128xf32> to vector<16x128xf32>
    %c6 = arith.constant 6 : index
    %c0_42 = arith.constant 0 : index
    %38 = vector.load %arg2[%c6, %c0_42] : memref<9x128xf32, #tpu.memory_space<vmem>>, vector<1x128xf32>
    %39 = vector.shape_cast %38 : vector<1x128xf32> to vector<1x128xf32>
    %40 = vector.broadcast %39 : vector<1x128xf32> to vector<16x128xf32>
    %c7_43 = arith.constant 7 : index
    %c0_44 = arith.constant 0 : index
    %41 = vector.load %arg2[%c7_43, %c0_44] : memref<9x128xf32, #tpu.memory_space<vmem>>, vector<1x128xf32>
    %42 = vector.shape_cast %41 : vector<1x128xf32> to vector<1x128xf32>
    %43 = vector.broadcast %42 : vector<1x128xf32> to vector<16x128xf32>
    %c8_45 = arith.constant 8 : index
    %c0_46 = arith.constant 0 : index
    %44 = vector.load %arg2[%c8_45, %c0_46] : memref<9x128xf32, #tpu.memory_space<vmem>>, vector<1x128xf32>
    %45 = vector.shape_cast %44 : vector<1x128xf32> to vector<1x128xf32>
    %46 = vector.broadcast %45 : vector<1x128xf32> to vector<16x128xf32>
    %c0_47 = arith.constant 0 : index
    %c0_48 = arith.constant 0 : index
    %47 = vector.load %arg4[%c0_47, %c0_48] : memref<1x128xf32, #tpu.memory_space<vmem>>, vector<1x128xf32>
    %c0_49 = arith.constant 0 : index
    %c7_50 = arith.constant 7 : index
    %c0_51 = arith.constant 0 : index
    %48 = vector.load %arg12[%c0_49, %c7_50, %c0_51] : memref<18x25x128xf32, #tpu.memory_space<vmem>>, vector<10x16x128xf32>
    %49 = vector.extract_strided_slice %48 {offsets = [0, 0, 0], sizes = [8, 16, 128], strides = [1, 1, 1]} : vector<10x16x128xf32> to vector<8x16x128xf32>
    %50 = vector.shape_cast %22 : vector<16x128xf32> to vector<1x16x128xf32>
    %51 = vector.broadcast %50 : vector<1x16x128xf32> to vector<8x16x128xf32>
    %52 = arith.mulf %49, %51 : vector<8x16x128xf32>
    %53 = vector.extract_strided_slice %48 {offsets = [1, 0, 0], sizes = [8, 16, 128], strides = [1, 1, 1]} : vector<10x16x128xf32> to vector<8x16x128xf32>
    %54 = vector.shape_cast %31 : vector<16x128xf32> to vector<1x16x128xf32>
    %55 = vector.broadcast %54 : vector<1x16x128xf32> to vector<8x16x128xf32>
    %56 = arith.mulf %53, %55 : vector<8x16x128xf32>
    %57 = arith.addf %52, %56 : vector<8x16x128xf32>
    %58 = vector.extract_strided_slice %48 {offsets = [2, 0, 0], sizes = [8, 16, 128], strides = [1, 1, 1]} : vector<10x16x128xf32> to vector<8x16x128xf32>
    %59 = vector.shape_cast %40 : vector<16x128xf32> to vector<1x16x128xf32>
    %60 = vector.broadcast %59 : vector<1x16x128xf32> to vector<8x16x128xf32>
    %61 = arith.mulf %58, %60 : vector<8x16x128xf32>
    %62 = arith.addf %57, %61 : vector<8x16x128xf32>
    %c0_52 = arith.constant 0 : index
    %c8_53 = arith.constant 8 : index
    %c0_54 = arith.constant 0 : index
    %63 = vector.load %arg12[%c0_52, %c8_53, %c0_54] : memref<18x25x128xf32, #tpu.memory_space<vmem>>, vector<10x16x128xf32>
    %64 = vector.extract_strided_slice %63 {offsets = [0, 0, 0], sizes = [8, 16, 128], strides = [1, 1, 1]} : vector<10x16x128xf32> to vector<8x16x128xf32>
    %65 = vector.shape_cast %25 : vector<16x128xf32> to vector<1x16x128xf32>
    %66 = vector.broadcast %65 : vector<1x16x128xf32> to vector<8x16x128xf32>
    %67 = arith.mulf %64, %66 : vector<8x16x128xf32>
    %68 = arith.addf %62, %67 : vector<8x16x128xf32>
    %69 = vector.extract_strided_slice %63 {offsets = [1, 0, 0], sizes = [8, 16, 128], strides = [1, 1, 1]} : vector<10x16x128xf32> to vector<8x16x128xf32>
    %70 = vector.shape_cast %34 : vector<16x128xf32> to vector<1x16x128xf32>
    %71 = vector.broadcast %70 : vector<1x16x128xf32> to vector<8x16x128xf32>
    %72 = arith.mulf %69, %71 : vector<8x16x128xf32>
    %73 = arith.addf %68, %72 : vector<8x16x128xf32>
    %74 = vector.extract_strided_slice %63 {offsets = [2, 0, 0], sizes = [8, 16, 128], strides = [1, 1, 1]} : vector<10x16x128xf32> to vector<8x16x128xf32>
    %75 = vector.shape_cast %43 : vector<16x128xf32> to vector<1x16x128xf32>
    %76 = vector.broadcast %75 : vector<1x16x128xf32> to vector<8x16x128xf32>
    %77 = arith.mulf %74, %76 : vector<8x16x128xf32>
    %78 = arith.addf %73, %77 : vector<8x16x128xf32>
    %c0_55 = arith.constant 0 : index
    %c9_56 = arith.constant 9 : index
    %c0_57 = arith.constant 0 : index
    %79 = vector.load %arg12[%c0_55, %c9_56, %c0_57] : memref<18x25x128xf32, #tpu.memory_space<vmem>>, vector<10x16x128xf32>
    %80 = vector.extract_strided_slice %79 {offsets = [0, 0, 0], sizes = [8, 16, 128], strides = [1, 1, 1]} : vector<10x16x128xf32> to vector<8x16x128xf32>
    %81 = vector.shape_cast %28 : vector<16x128xf32> to vector<1x16x128xf32>
    %82 = vector.broadcast %81 : vector<1x16x128xf32> to vector<8x16x128xf32>
    %83 = arith.mulf %80, %82 : vector<8x16x128xf32>
    %84 = arith.addf %78, %83 : vector<8x16x128xf32>
    %85 = vector.extract_strided_slice %79 {offsets = [1, 0, 0], sizes = [8, 16, 128], strides = [1, 1, 1]} : vector<10x16x128xf32> to vector<8x16x128xf32>
    %86 = vector.shape_cast %37 : vector<16x128xf32> to vector<1x16x128xf32>
    %87 = vector.broadcast %86 : vector<1x16x128xf32> to vector<8x16x128xf32>
    %88 = arith.mulf %85, %87 : vector<8x16x128xf32>
    %89 = arith.addf %84, %88 : vector<8x16x128xf32>
    %90 = vector.extract_strided_slice %79 {offsets = [2, 0, 0], sizes = [8, 16, 128], strides = [1, 1, 1]} : vector<10x16x128xf32> to vector<8x16x128xf32>
    %91 = vector.shape_cast %46 : vector<16x128xf32> to vector<1x16x128xf32>
    %92 = vector.broadcast %91 : vector<1x16x128xf32> to vector<8x16x128xf32>
    %93 = arith.mulf %90, %92 : vector<8x16x128xf32>
    %94 = arith.addf %89, %93 : vector<8x16x128xf32>
    %95 = vector.shape_cast %94 : vector<8x16x128xf32> to vector<128x128xf32>
    %96 = arith.truncf %95 : vector<128x128xf32> to vector<128x128xbf16>
    %c0_58 = arith.constant 0 : index
    %c0_59 = arith.constant 0 : index
    %97 = vector.load %arg3[%c0_58, %c0_59] : memref<128x128xbf16, #tpu.memory_space<vmem>>, vector<128x128xbf16>
    %cst_60 = arith.constant dense<0.000000e+00> : vector<128x128xf32>
    %98 = tpu.matmul %96, %97, %cst_60 {dimension_numbers = #tpu.dot_dimension_numbers<[1], [0], [0], [1], [0, 0, 1, 1], [], []>} : vector<128x128xbf16>, vector<128x128xbf16>, vector<128x128xf32> -> vector<128x128xf32>
    %99 = vector.broadcast %47 : vector<1x128xf32> to vector<128x128xf32>
    %100 = arith.addf %98, %99 : vector<128x128xf32>
    %101 = vector.shape_cast %100 : vector<128x128xf32> to vector<8x16x128xf32>
    %cst_61 = arith.constant 0.000000e+00 : f32
    %102 = vector.broadcast %cst_61 : f32 to vector<8x16x128xf32>
    %103 = arith.maximumf %101, %102 : vector<8x16x128xf32>
    %c1_62 = arith.constant 1 : index
    %c8_63 = arith.constant 8 : index
    %c0_64 = arith.constant 0 : index
    %104 = vector.load %arg13[%c1_62, %c8_63, %c0_64] : memref<18x25x128xf32, #tpu.memory_space<vmem>>, vector<8x16x128xf32>
    tpu.vector_store %arg13[%c1_62, %c8_63, %c0_64], %103 {strides = array<i32>} : memref<18x25x128xf32, #tpu.memory_space<vmem>>, vector<8x16x128xf32>,
    %c8_65 = arith.constant 8 : index
    %c7_66 = arith.constant 7 : index
    %c0_67 = arith.constant 0 : index
    %105 = vector.load %arg12[%c8_65, %c7_66, %c0_67] : memref<18x25x128xf32, #tpu.memory_space<vmem>>, vector<10x16x128xf32>
    %106 = vector.extract_strided_slice %105 {offsets = [0, 0, 0], sizes = [8, 16, 128], strides = [1, 1, 1]} : vector<10x16x128xf32> to vector<8x16x128xf32>
    %107 = vector.shape_cast %22 : vector<16x128xf32> to vector<1x16x128xf32>
    %108 = vector.broadcast %107 : vector<1x16x128xf32> to vector<8x16x128xf32>
    %109 = arith.mulf %106, %108 : vector<8x16x128xf32>
    %110 = vector.extract_strided_slice %105 {offsets = [1, 0, 0], sizes = [8, 16, 128], strides = [1, 1, 1]} : vector<10x16x128xf32> to vector<8x16x128xf32>
    %111 = vector.shape_cast %31 : vector<16x128xf32> to vector<1x16x128xf32>
    %112 = vector.broadcast %111 : vector<1x16x128xf32> to vector<8x16x128xf32>
    %113 = arith.mulf %110, %112 : vector<8x16x128xf32>
    %114 = arith.addf %109, %113 : vector<8x16x128xf32>
    %115 = vector.extract_strided_slice %105 {offsets = [2, 0, 0], sizes = [8, 16, 128], strides = [1, 1, 1]} : vector<10x16x128xf32> to vector<8x16x128xf32>
    %116 = vector.shape_cast %40 : vector<16x128xf32> to vector<1x16x128xf32>
    %117 = vector.broadcast %116 : vector<1x16x128xf32> to vector<8x16x128xf32>
    %118 = arith.mulf %115, %117 : vector<8x16x128xf32>
    %119 = arith.addf %114, %118 : vector<8x16x128xf32>
    %c8_68 = arith.constant 8 : index
    %c8_69 = arith.constant 8 : index
    %c0_70 = arith.constant 0 : index
    %120 = vector.load %arg12[%c8_68, %c8_69, %c0_70] : memref<18x25x128xf32, #tpu.memory_space<vmem>>, vector<10x16x128xf32>
    %121 = vector.extract_strided_slice %120 {offsets = [0, 0, 0], sizes = [8, 16, 128], strides = [1, 1, 1]} : vector<10x16x128xf32> to vector<8x16x128xf32>
    %122 = vector.shape_cast %25 : vector<16x128xf32> to vector<1x16x128xf32>
    %123 = vector.broadcast %122 : vector<1x16x128xf32> to vector<8x16x128xf32>
    %124 = arith.mulf %121, %123 : vector<8x16x128xf32>
    %125 = arith.addf %119, %124 : vector<8x16x128xf32>
    %126 = vector.extract_strided_slice %120 {offsets = [1, 0, 0], sizes = [8, 16, 128], strides = [1, 1, 1]} : vector<10x16x128xf32> to vector<8x16x128xf32>
    %127 = vector.shape_cast %34 : vector<16x128xf32> to vector<1x16x128xf32>
    %128 = vector.broadcast %127 : vector<1x16x128xf32> to vector<8x16x128xf32>
    %129 = arith.mulf %126, %128 : vector<8x16x128xf32>
    %130 = arith.addf %125, %129 : vector<8x16x128xf32>
    %131 = vector.extract_strided_slice %120 {offsets = [2, 0, 0], sizes = [8, 16, 128], strides = [1, 1, 1]} : vector<10x16x128xf32> to vector<8x16x128xf32>
    %132 = vector.shape_cast %43 : vector<16x128xf32> to vector<1x16x128xf32>
    %133 = vector.broadcast %132 : vector<1x16x128xf32> to vector<8x16x128xf32>
    %134 = arith.mulf %131, %133 : vector<8x16x128xf32>
    %135 = arith.addf %130, %134 : vector<8x16x128xf32>
    %c8_71 = arith.constant 8 : index
    %c9_72 = arith.constant 9 : index
    %c0_73 = arith.constant 0 : index
    %136 = vector.load %arg12[%c8_71, %c9_72, %c0_73] : memref<18x25x128xf32, #tpu.memory_space<vmem>>, vector<10x16x128xf32>
    %137 = vector.extract_strided_slice %136 {offsets = [0, 0, 0], sizes = [8, 16, 128], strides = [1, 1, 1]} : vector<10x16x128xf32> to vector<8x16x128xf32>
    %138 = vector.shape_cast %28 : vector<16x128xf32> to vector<1x16x128xf32>
    %139 = vector.broadcast %138 : vector<1x16x128xf32> to vector<8x16x128xf32>
    %140 = arith.mulf %137, %139 : vector<8x16x128xf32>
    %141 = arith.addf %135, %140 : vector<8x16x128xf32>
    %142 = vector.extract_strided_slice %136 {offsets = [1, 0, 0], sizes = [8, 16, 128], strides = [1, 1, 1]} : vector<10x16x128xf32> to vector<8x16x128xf32>
    %143 = vector.shape_cast %37 : vector<16x128xf32> to vector<1x16x128xf32>
    %144 = vector.broadcast %143 : vector<1x16x128xf32> to vector<8x16x128xf32>
    %145 = arith.mulf %142, %144 : vector<8x16x128xf32>
    %146 = arith.addf %141, %145 : vector<8x16x128xf32>
    %147 = vector.extract_strided_slice %136 {offsets = [2, 0, 0], sizes = [8, 16, 128], strides = [1, 1, 1]} : vector<10x16x128xf32> to vector<8x16x128xf32>
    %148 = vector.shape_cast %46 : vector<16x128xf32> to vector<1x16x128xf32>
    %149 = vector.broadcast %148 : vector<1x16x128xf32> to vector<8x16x128xf32>
    %150 = arith.mulf %147, %149 : vector<8x16x128xf32>
    %151 = arith.addf %146, %150 : vector<8x16x128xf32>
    %152 = vector.shape_cast %151 : vector<8x16x128xf32> to vector<128x128xf32>
    %153 = arith.truncf %152 : vector<128x128xf32> to vector<128x128xbf16>
    %c0_74 = arith.constant 0 : index
    %c0_75 = arith.constant 0 : index
    %154 = vector.load %arg3[%c0_74, %c0_75] : memref<128x128xbf16, #tpu.memory_space<vmem>>, vector<128x128xbf16>
    %cst_76 = arith.constant dense<0.000000e+00> : vector<128x128xf32>
    %155 = tpu.matmul %153, %154, %cst_76 {dimension_numbers = #tpu.dot_dimension_numbers<[1], [0], [0], [1], [0, 0, 1, 1], [], []>} : vector<128x128xbf16>, vector<128x128xbf16>, vector<128x128xf32> -> vector<128x128xf32>
    %156 = vector.broadcast %47 : vector<1x128xf32> to vector<128x128xf32>
    %157 = arith.addf %155, %156 : vector<128x128xf32>
    %158 = vector.shape_cast %157 : vector<128x128xf32> to vector<8x16x128xf32>
    %cst_77 = arith.constant 0.000000e+00 : f32
    %159 = vector.broadcast %cst_77 : f32 to vector<8x16x128xf32>
    %160 = arith.maximumf %158, %159 : vector<8x16x128xf32>
    %c9_78 = arith.constant 9 : index
    %c8_79 = arith.constant 8 : index
    %c0_80 = arith.constant 0 : index
    %161 = vector.load %arg13[%c9_78, %c8_79, %c0_80] : memref<18x25x128xf32, #tpu.memory_space<vmem>>, vector<8x16x128xf32>
    tpu.vector_store %arg13[%c9_78, %c8_79, %c0_80], %160 {strides = array<i32>} : memref<18x25x128xf32, #tpu.memory_space<vmem>>, vector<8x16x128xf32>,
    %c0_81 = arith.constant 0 : index
    %c0_82 = arith.constant 0 : index
    %162 = vector.load %arg5[%c0_81, %c0_82] : memref<9x128xf32, #tpu.memory_space<vmem>>, vector<1x128xf32>
    %163 = vector.shape_cast %162 : vector<1x128xf32> to vector<1x128xf32>
    %164 = vector.broadcast %163 : vector<1x128xf32> to vector<16x128xf32>
    %c1_83 = arith.constant 1 : index
    %c0_84 = arith.constant 0 : index
    %165 = vector.load %arg5[%c1_83, %c0_84] : memref<9x128xf32, #tpu.memory_space<vmem>>, vector<1x128xf32>
    %166 = vector.shape_cast %165 : vector<1x128xf32> to vector<1x128xf32>
    %167 = vector.broadcast %166 : vector<1x128xf32> to vector<16x128xf32>
    %c2_85 = arith.constant 2 : index
    %c0_86 = arith.constant 0 : index
    %168 = vector.load %arg5[%c2_85, %c0_86] : memref<9x128xf32, #tpu.memory_space<vmem>>, vector<1x128xf32>
    %169 = vector.shape_cast %168 : vector<1x128xf32> to vector<1x128xf32>
    %170 = vector.broadcast %169 : vector<1x128xf32> to vector<16x128xf32>
    %c3_87 = arith.constant 3 : index
    %c0_88 = arith.constant 0 : index
    %171 = vector.load %arg5[%c3_87, %c0_88] : memref<9x128xf32, #tpu.memory_space<vmem>>, vector<1x128xf32>
    %172 = vector.shape_cast %171 : vector<1x128xf32> to vector<1x128xf32>
    %173 = vector.broadcast %172 : vector<1x128xf32> to vector<16x128xf32>
    %c4_89 = arith.constant 4 : index
    %c0_90 = arith.constant 0 : index
    %174 = vector.load %arg5[%c4_89, %c0_90] : memref<9x128xf32, #tpu.memory_space<vmem>>, vector<1x128xf32>
    %175 = vector.shape_cast %174 : vector<1x128xf32> to vector<1x128xf32>
    %176 = vector.broadcast %175 : vector<1x128xf32> to vector<16x128xf32>
    %c5_91 = arith.constant 5 : index
    %c0_92 = arith.constant 0 : index
    %177 = vector.load %arg5[%c5_91, %c0_92] : memref<9x128xf32, #tpu.memory_space<vmem>>, vector<1x128xf32>
    %178 = vector.shape_cast %177 : vector<1x128xf32> to vector<1x128xf32>
    %179 = vector.broadcast %178 : vector<1x128xf32> to vector<16x128xf32>
    %c6_93 = arith.constant 6 : index
    %c0_94 = arith.constant 0 : index
    %180 = vector.load %arg5[%c6_93, %c0_94] : memref<9x128xf32, #tpu.memory_space<vmem>>, vector<1x128xf32>
    %181 = vector.shape_cast %180 : vector<1x128xf32> to vector<1x128xf32>
    %182 = vector.broadcast %181 : vector<1x128xf32> to vector<16x128xf32>
    %c7_95 = arith.constant 7 : index
    %c0_96 = arith.constant 0 : index
    %183 = vector.load %arg5[%c7_95, %c0_96] : memref<9x128xf32, #tpu.memory_space<vmem>>, vector<1x128xf32>
    %184 = vector.shape_cast %183 : vector<1x128xf32> to vector<1x128xf32>
    %185 = vector.broadcast %184 : vector<1x128xf32> to vector<16x128xf32>
    %c8_97 = arith.constant 8 : index
    %c0_98 = arith.constant 0 : index
    %186 = vector.load %arg5[%c8_97, %c0_98] : memref<9x128xf32, #tpu.memory_space<vmem>>, vector<1x128xf32>
    %187 = vector.shape_cast %186 : vector<1x128xf32> to vector<1x128xf32>
    %188 = vector.broadcast %187 : vector<1x128xf32> to vector<16x128xf32>
    %c0_99 = arith.constant 0 : index
    %c0_100 = arith.constant 0 : index
    %189 = vector.load %arg7[%c0_99, %c0_100] : memref<1x128xf32, #tpu.memory_space<vmem>>, vector<1x128xf32>
    %c0_101 = arith.constant 0 : index
    %c7_102 = arith.constant 7 : index
    %c0_103 = arith.constant 0 : index
    %190 = vector.load %arg13[%c0_101, %c7_102, %c0_103] : memref<18x25x128xf32, #tpu.memory_space<vmem>>, vector<10x16x128xf32>
    %191 = vector.extract_strided_slice %190 {offsets = [0, 0, 0], sizes = [8, 16, 128], strides = [1, 1, 1]} : vector<10x16x128xf32> to vector<8x16x128xf32>
    %192 = vector.shape_cast %164 : vector<16x128xf32> to vector<1x16x128xf32>
    %193 = vector.broadcast %192 : vector<1x16x128xf32> to vector<8x16x128xf32>
    %194 = arith.mulf %191, %193 : vector<8x16x128xf32>
    %195 = vector.extract_strided_slice %190 {offsets = [1, 0, 0], sizes = [8, 16, 128], strides = [1, 1, 1]} : vector<10x16x128xf32> to vector<8x16x128xf32>
    %196 = vector.shape_cast %173 : vector<16x128xf32> to vector<1x16x128xf32>
    %197 = vector.broadcast %196 : vector<1x16x128xf32> to vector<8x16x128xf32>
    %198 = arith.mulf %195, %197 : vector<8x16x128xf32>
    %199 = arith.addf %194, %198 : vector<8x16x128xf32>
    %200 = vector.extract_strided_slice %190 {offsets = [2, 0, 0], sizes = [8, 16, 128], strides = [1, 1, 1]} : vector<10x16x128xf32> to vector<8x16x128xf32>
    %201 = vector.shape_cast %182 : vector<16x128xf32> to vector<1x16x128xf32>
    %202 = vector.broadcast %201 : vector<1x16x128xf32> to vector<8x16x128xf32>
    %203 = arith.mulf %200, %202 : vector<8x16x128xf32>
    %204 = arith.addf %199, %203 : vector<8x16x128xf32>
    %c0_104 = arith.constant 0 : index
    %c8_105 = arith.constant 8 : index
    %c0_106 = arith.constant 0 : index
    %205 = vector.load %arg13[%c0_104, %c8_105, %c0_106] : memref<18x25x128xf32, #tpu.memory_space<vmem>>, vector<10x16x128xf32>
    %206 = vector.extract_strided_slice %205 {offsets = [0, 0, 0], sizes = [8, 16, 128], strides = [1, 1, 1]} : vector<10x16x128xf32> to vector<8x16x128xf32>
    %207 = vector.shape_cast %167 : vector<16x128xf32> to vector<1x16x128xf32>
    %208 = vector.broadcast %207 : vector<1x16x128xf32> to vector<8x16x128xf32>
    %209 = arith.mulf %206, %208 : vector<8x16x128xf32>
    %210 = arith.addf %204, %209 : vector<8x16x128xf32>
    %211 = vector.extract_strided_slice %205 {offsets = [1, 0, 0], sizes = [8, 16, 128], strides = [1, 1, 1]} : vector<10x16x128xf32> to vector<8x16x128xf32>
    %212 = vector.shape_cast %176 : vector<16x128xf32> to vector<1x16x128xf32>
    %213 = vector.broadcast %212 : vector<1x16x128xf32> to vector<8x16x128xf32>
    %214 = arith.mulf %211, %213 : vector<8x16x128xf32>
    %215 = arith.addf %210, %214 : vector<8x16x128xf32>
    %216 = vector.extract_strided_slice %205 {offsets = [2, 0, 0], sizes = [8, 16, 128], strides = [1, 1, 1]} : vector<10x16x128xf32> to vector<8x16x128xf32>
    %217 = vector.shape_cast %185 : vector<16x128xf32> to vector<1x16x128xf32>
    %218 = vector.broadcast %217 : vector<1x16x128xf32> to vector<8x16x128xf32>
    %219 = arith.mulf %216, %218 : vector<8x16x128xf32>
    %220 = arith.addf %215, %219 : vector<8x16x128xf32>
    %c0_107 = arith.constant 0 : index
    %c9_108 = arith.constant 9 : index
    %c0_109 = arith.constant 0 : index
    %221 = vector.load %arg13[%c0_107, %c9_108, %c0_109] : memref<18x25x128xf32, #tpu.memory_space<vmem>>, vector<10x16x128xf32>
    %222 = vector.extract_strided_slice %221 {offsets = [0, 0, 0], sizes = [8, 16, 128], strides = [1, 1, 1]} : vector<10x16x128xf32> to vector<8x16x128xf32>
    %223 = vector.shape_cast %170 : vector<16x128xf32> to vector<1x16x128xf32>
    %224 = vector.broadcast %223 : vector<1x16x128xf32> to vector<8x16x128xf32>
    %225 = arith.mulf %222, %224 : vector<8x16x128xf32>
    %226 = arith.addf %220, %225 : vector<8x16x128xf32>
    %227 = vector.extract_strided_slice %221 {offsets = [1, 0, 0], sizes = [8, 16, 128], strides = [1, 1, 1]} : vector<10x16x128xf32> to vector<8x16x128xf32>
    %228 = vector.shape_cast %179 : vector<16x128xf32> to vector<1x16x128xf32>
    %229 = vector.broadcast %228 : vector<1x16x128xf32> to vector<8x16x128xf32>
    %230 = arith.mulf %227, %229 : vector<8x16x128xf32>
    %231 = arith.addf %226, %230 : vector<8x16x128xf32>
    %232 = vector.extract_strided_slice %221 {offsets = [2, 0, 0], sizes = [8, 16, 128], strides = [1, 1, 1]} : vector<10x16x128xf32> to vector<8x16x128xf32>
    %233 = vector.shape_cast %188 : vector<16x128xf32> to vector<1x16x128xf32>
    %234 = vector.broadcast %233 : vector<1x16x128xf32> to vector<8x16x128xf32>
    %235 = arith.mulf %232, %234 : vector<8x16x128xf32>
    %236 = arith.addf %231, %235 : vector<8x16x128xf32>
    %237 = vector.shape_cast %236 : vector<8x16x128xf32> to vector<128x128xf32>
    %238 = arith.truncf %237 : vector<128x128xf32> to vector<128x128xbf16>
    %c0_110 = arith.constant 0 : index
    %c0_111 = arith.constant 0 : index
    %239 = vector.load %arg6[%c0_110, %c0_111] : memref<128x128xbf16, #tpu.memory_space<vmem>>, vector<128x128xbf16>
    %cst_112 = arith.constant dense<0.000000e+00> : vector<128x128xf32>
    %240 = tpu.matmul %238, %239, %cst_112 {dimension_numbers = #tpu.dot_dimension_numbers<[1], [0], [0], [1], [0, 0, 1, 1], [], []>} : vector<128x128xbf16>, vector<128x128xbf16>, vector<128x128xf32> -> vector<128x128xf32>
    %241 = vector.broadcast %189 : vector<1x128xf32> to vector<128x128xf32>
    %242 = arith.addf %240, %241 : vector<128x128xf32>
    %243 = vector.shape_cast %242 : vector<128x128xf32> to vector<8x16x128xf32>
    %cst_113 = arith.constant 0.000000e+00 : f32
    %244 = vector.broadcast %cst_113 : f32 to vector<8x16x128xf32>
    %245 = arith.maximumf %243, %244 : vector<8x16x128xf32>
    %c1_114 = arith.constant 1 : index
    %c8_115 = arith.constant 8 : index
    %c0_116 = arith.constant 0 : index
    %246 = vector.load %arg12[%c1_114, %c8_115, %c0_116] : memref<18x25x128xf32, #tpu.memory_space<vmem>>, vector<8x16x128xf32>
    tpu.vector_store %arg12[%c1_114, %c8_115, %c0_116], %245 {strides = array<i32>} : memref<18x25x128xf32, #tpu.memory_space<vmem>>, vector<8x16x128xf32>,
    %c8_117 = arith.constant 8 : index
    %c7_118 = arith.constant 7 : index
    %c0_119 = arith.constant 0 : index
    %247 = vector.load %arg13[%c8_117, %c7_118, %c0_119] : memref<18x25x128xf32, #tpu.memory_space<vmem>>, vector<10x16x128xf32>
    %248 = vector.extract_strided_slice %247 {offsets = [0, 0, 0], sizes = [8, 16, 128], strides = [1, 1, 1]} : vector<10x16x128xf32> to vector<8x16x128xf32>
    %249 = vector.shape_cast %164 : vector<16x128xf32> to vector<1x16x128xf32>
    %250 = vector.broadcast %249 : vector<1x16x128xf32> to vector<8x16x128xf32>
    %251 = arith.mulf %248, %250 : vector<8x16x128xf32>
    %252 = vector.extract_strided_slice %247 {offsets = [1, 0, 0], sizes = [8, 16, 128], strides = [1, 1, 1]} : vector<10x16x128xf32> to vector<8x16x128xf32>
    %253 = vector.shape_cast %173 : vector<16x128xf32> to vector<1x16x128xf32>
    %254 = vector.broadcast %253 : vector<1x16x128xf32> to vector<8x16x128xf32>
    %255 = arith.mulf %252, %254 : vector<8x16x128xf32>
    %256 = arith.addf %251, %255 : vector<8x16x128xf32>
    %257 = vector.extract_strided_slice %247 {offsets = [2, 0, 0], sizes = [8, 16, 128], strides = [1, 1, 1]} : vector<10x16x128xf32> to vector<8x16x128xf32>
    %258 = vector.shape_cast %182 : vector<16x128xf32> to vector<1x16x128xf32>
    %259 = vector.broadcast %258 : vector<1x16x128xf32> to vector<8x16x128xf32>
    %260 = arith.mulf %257, %259 : vector<8x16x128xf32>
    %261 = arith.addf %256, %260 : vector<8x16x128xf32>
    %c8_120 = arith.constant 8 : index
    %c8_121 = arith.constant 8 : index
    %c0_122 = arith.constant 0 : index
    %262 = vector.load %arg13[%c8_120, %c8_121, %c0_122] : memref<18x25x128xf32, #tpu.memory_space<vmem>>, vector<10x16x128xf32>
    %263 = vector.extract_strided_slice %262 {offsets = [0, 0, 0], sizes = [8, 16, 128], strides = [1, 1, 1]} : vector<10x16x128xf32> to vector<8x16x128xf32>
    %264 = vector.shape_cast %167 : vector<16x128xf32> to vector<1x16x128xf32>
    %265 = vector.broadcast %264 : vector<1x16x128xf32> to vector<8x16x128xf32>
    %266 = arith.mulf %263, %265 : vector<8x16x128xf32>
    %267 = arith.addf %261, %266 : vector<8x16x128xf32>
    %268 = vector.extract_strided_slice %262 {offsets = [1, 0, 0], sizes = [8, 16, 128], strides = [1, 1, 1]} : vector<10x16x128xf32> to vector<8x16x128xf32>
    %269 = vector.shape_cast %176 : vector<16x128xf32> to vector<1x16x128xf32>
    %270 = vector.broadcast %269 : vector<1x16x128xf32> to vector<8x16x128xf32>
    %271 = arith.mulf %268, %270 : vector<8x16x128xf32>
    %272 = arith.addf %267, %271 : vector<8x16x128xf32>
    %273 = vector.extract_strided_slice %262 {offsets = [2, 0, 0], sizes = [8, 16, 128], strides = [1, 1, 1]} : vector<10x16x128xf32> to vector<8x16x128xf32>
    %274 = vector.shape_cast %185 : vector<16x128xf32> to vector<1x16x128xf32>
    %275 = vector.broadcast %274 : vector<1x16x128xf32> to vector<8x16x128xf32>
    %276 = arith.mulf %273, %275 : vector<8x16x128xf32>
    %277 = arith.addf %272, %276 : vector<8x16x128xf32>
    %c8_123 = arith.constant 8 : index
    %c9_124 = arith.constant 9 : index
    %c0_125 = arith.constant 0 : index
    %278 = vector.load %arg13[%c8_123, %c9_124, %c0_125] : memref<18x25x128xf32, #tpu.memory_space<vmem>>, vector<10x16x128xf32>
    %279 = vector.extract_strided_slice %278 {offsets = [0, 0, 0], sizes = [8, 16, 128], strides = [1, 1, 1]} : vector<10x16x128xf32> to vector<8x16x128xf32>
    %280 = vector.shape_cast %170 : vector<16x128xf32> to vector<1x16x128xf32>
    %281 = vector.broadcast %280 : vector<1x16x128xf32> to vector<8x16x128xf32>
    %282 = arith.mulf %279, %281 : vector<8x16x128xf32>
    %283 = arith.addf %277, %282 : vector<8x16x128xf32>
    %284 = vector.extract_strided_slice %278 {offsets = [1, 0, 0], sizes = [8, 16, 128], strides = [1, 1, 1]} : vector<10x16x128xf32> to vector<8x16x128xf32>
    %285 = vector.shape_cast %179 : vector<16x128xf32> to vector<1x16x128xf32>
    %286 = vector.broadcast %285 : vector<1x16x128xf32> to vector<8x16x128xf32>
    %287 = arith.mulf %284, %286 : vector<8x16x128xf32>
    %288 = arith.addf %283, %287 : vector<8x16x128xf32>
    %289 = vector.extract_strided_slice %278 {offsets = [2, 0, 0], sizes = [8, 16, 128], strides = [1, 1, 1]} : vector<10x16x128xf32> to vector<8x16x128xf32>
    %290 = vector.shape_cast %188 : vector<16x128xf32> to vector<1x16x128xf32>
    %291 = vector.broadcast %290 : vector<1x16x128xf32> to vector<8x16x128xf32>
    %292 = arith.mulf %289, %291 : vector<8x16x128xf32>
    %293 = arith.addf %288, %292 : vector<8x16x128xf32>
    %294 = vector.shape_cast %293 : vector<8x16x128xf32> to vector<128x128xf32>
    %295 = arith.truncf %294 : vector<128x128xf32> to vector<128x128xbf16>
    %c0_126 = arith.constant 0 : index
    %c0_127 = arith.constant 0 : index
    %296 = vector.load %arg6[%c0_126, %c0_127] : memref<128x128xbf16, #tpu.memory_space<vmem>>, vector<128x128xbf16>
    %cst_128 = arith.constant dense<0.000000e+00> : vector<128x128xf32>
    %297 = tpu.matmul %295, %296, %cst_128 {dimension_numbers = #tpu.dot_dimension_numbers<[1], [0], [0], [1], [0, 0, 1, 1], [], []>} : vector<128x128xbf16>, vector<128x128xbf16>, vector<128x128xf32> -> vector<128x128xf32>
    %298 = vector.broadcast %189 : vector<1x128xf32> to vector<128x128xf32>
    %299 = arith.addf %297, %298 : vector<128x128xf32>
    %300 = vector.shape_cast %299 : vector<128x128xf32> to vector<8x16x128xf32>
    %cst_129 = arith.constant 0.000000e+00 : f32
    %301 = vector.broadcast %cst_129 : f32 to vector<8x16x128xf32>
    %302 = arith.maximumf %300, %301 : vector<8x16x128xf32>
    %c9_130 = arith.constant 9 : index
    %c8_131 = arith.constant 8 : index
    %c0_132 = arith.constant 0 : index
    %303 = vector.load %arg12[%c9_130, %c8_131, %c0_132] : memref<18x25x128xf32, #tpu.memory_space<vmem>>, vector<8x16x128xf32>
    tpu.vector_store %arg12[%c9_130, %c8_131, %c0_132], %302 {strides = array<i32>} : memref<18x25x128xf32, #tpu.memory_space<vmem>>, vector<8x16x128xf32>,
    %c0_133 = arith.constant 0 : index
    %c0_134 = arith.constant 0 : index
    %304 = vector.load %arg8[%c0_133, %c0_134] : memref<9x128xf32, #tpu.memory_space<vmem>>, vector<1x128xf32>
    %305 = vector.shape_cast %304 : vector<1x128xf32> to vector<1x128xf32>
    %306 = vector.broadcast %305 : vector<1x128xf32> to vector<16x128xf32>
    %c1_135 = arith.constant 1 : index
    %c0_136 = arith.constant 0 : index
    %307 = vector.load %arg8[%c1_135, %c0_136] : memref<9x128xf32, #tpu.memory_space<vmem>>, vector<1x128xf32>
    %308 = vector.shape_cast %307 : vector<1x128xf32> to vector<1x128xf32>
    %309 = vector.broadcast %308 : vector<1x128xf32> to vector<16x128xf32>
    %c2_137 = arith.constant 2 : index
    %c0_138 = arith.constant 0 : index
    %310 = vector.load %arg8[%c2_137, %c0_138] : memref<9x128xf32, #tpu.memory_space<vmem>>, vector<1x128xf32>
    %311 = vector.shape_cast %310 : vector<1x128xf32> to vector<1x128xf32>
    %312 = vector.broadcast %311 : vector<1x128xf32> to vector<16x128xf32>
    %c3_139 = arith.constant 3 : index
    %c0_140 = arith.constant 0 : index
    %313 = vector.load %arg8[%c3_139, %c0_140] : memref<9x128xf32, #tpu.memory_space<vmem>>, vector<1x128xf32>
    %314 = vector.shape_cast %313 : vector<1x128xf32> to vector<1x128xf32>
    %315 = vector.broadcast %314 : vector<1x128xf32> to vector<16x128xf32>
    %c4_141 = arith.constant 4 : index
    %c0_142 = arith.constant 0 : index
    %316 = vector.load %arg8[%c4_141, %c0_142] : memref<9x128xf32, #tpu.memory_space<vmem>>, vector<1x128xf32>
    %317 = vector.shape_cast %316 : vector<1x128xf32> to vector<1x128xf32>
    %318 = vector.broadcast %317 : vector<1x128xf32> to vector<16x128xf32>
    %c5_143 = arith.constant 5 : index
    %c0_144 = arith.constant 0 : index
    %319 = vector.load %arg8[%c5_143, %c0_144] : memref<9x128xf32, #tpu.memory_space<vmem>>, vector<1x128xf32>
    %320 = vector.shape_cast %319 : vector<1x128xf32> to vector<1x128xf32>
    %321 = vector.broadcast %320 : vector<1x128xf32> to vector<16x128xf32>
    %c6_145 = arith.constant 6 : index
    %c0_146 = arith.constant 0 : index
    %322 = vector.load %arg8[%c6_145, %c0_146] : memref<9x128xf32, #tpu.memory_space<vmem>>, vector<1x128xf32>
    %323 = vector.shape_cast %322 : vector<1x128xf32> to vector<1x128xf32>
    %324 = vector.broadcast %323 : vector<1x128xf32> to vector<16x128xf32>
    %c7_147 = arith.constant 7 : index
    %c0_148 = arith.constant 0 : index
    %325 = vector.load %arg8[%c7_147, %c0_148] : memref<9x128xf32, #tpu.memory_space<vmem>>, vector<1x128xf32>
    %326 = vector.shape_cast %325 : vector<1x128xf32> to vector<1x128xf32>
    %327 = vector.broadcast %326 : vector<1x128xf32> to vector<16x128xf32>
    %c8_149 = arith.constant 8 : index
    %c0_150 = arith.constant 0 : index
    %328 = vector.load %arg8[%c8_149, %c0_150] : memref<9x128xf32, #tpu.memory_space<vmem>>, vector<1x128xf32>
    %329 = vector.shape_cast %328 : vector<1x128xf32> to vector<1x128xf32>
    %330 = vector.broadcast %329 : vector<1x128xf32> to vector<16x128xf32>
    %c0_151 = arith.constant 0 : index
    %c0_152 = arith.constant 0 : index
    %331 = vector.load %arg10[%c0_151, %c0_152] : memref<1x128xf32, #tpu.memory_space<vmem>>, vector<1x128xf32>
    %c0_153 = arith.constant 0 : index
    %c7_154 = arith.constant 7 : index
    %c0_155 = arith.constant 0 : index
    %332 = vector.load %arg12[%c0_153, %c7_154, %c0_155] : memref<18x25x128xf32, #tpu.memory_space<vmem>>, vector<10x16x128xf32>
    %333 = vector.extract_strided_slice %332 {offsets = [0, 0, 0], sizes = [8, 16, 128], strides = [1, 1, 1]} : vector<10x16x128xf32> to vector<8x16x128xf32>
    %334 = vector.shape_cast %306 : vector<16x128xf32> to vector<1x16x128xf32>
    %335 = vector.broadcast %334 : vector<1x16x128xf32> to vector<8x16x128xf32>
    %336 = arith.mulf %333, %335 : vector<8x16x128xf32>
    %337 = vector.extract_strided_slice %332 {offsets = [1, 0, 0], sizes = [8, 16, 128], strides = [1, 1, 1]} : vector<10x16x128xf32> to vector<8x16x128xf32>
    %338 = vector.shape_cast %315 : vector<16x128xf32> to vector<1x16x128xf32>
    %339 = vector.broadcast %338 : vector<1x16x128xf32> to vector<8x16x128xf32>
    %340 = arith.mulf %337, %339 : vector<8x16x128xf32>
    %341 = arith.addf %336, %340 : vector<8x16x128xf32>
    %342 = vector.extract_strided_slice %332 {offsets = [2, 0, 0], sizes = [8, 16, 128], strides = [1, 1, 1]} : vector<10x16x128xf32> to vector<8x16x128xf32>
    %343 = vector.shape_cast %324 : vector<16x128xf32> to vector<1x16x128xf32>
    %344 = vector.broadcast %343 : vector<1x16x128xf32> to vector<8x16x128xf32>
    %345 = arith.mulf %342, %344 : vector<8x16x128xf32>
    %346 = arith.addf %341, %345 : vector<8x16x128xf32>
    %c0_156 = arith.constant 0 : index
    %c8_157 = arith.constant 8 : index
    %c0_158 = arith.constant 0 : index
    %347 = vector.load %arg12[%c0_156, %c8_157, %c0_158] : memref<18x25x128xf32, #tpu.memory_space<vmem>>, vector<10x16x128xf32>
    %348 = vector.extract_strided_slice %347 {offsets = [0, 0, 0], sizes = [8, 16, 128], strides = [1, 1, 1]} : vector<10x16x128xf32> to vector<8x16x128xf32>
    %349 = vector.shape_cast %309 : vector<16x128xf32> to vector<1x16x128xf32>
    %350 = vector.broadcast %349 : vector<1x16x128xf32> to vector<8x16x128xf32>
    %351 = arith.mulf %348, %350 : vector<8x16x128xf32>
    %352 = arith.addf %346, %351 : vector<8x16x128xf32>
    %353 = vector.extract_strided_slice %347 {offsets = [1, 0, 0], sizes = [8, 16, 128], strides = [1, 1, 1]} : vector<10x16x128xf32> to vector<8x16x128xf32>
    %354 = vector.shape_cast %318 : vector<16x128xf32> to vector<1x16x128xf32>
    %355 = vector.broadcast %354 : vector<1x16x128xf32> to vector<8x16x128xf32>
    %356 = arith.mulf %353, %355 : vector<8x16x128xf32>
    %357 = arith.addf %352, %356 : vector<8x16x128xf32>
    %358 = vector.extract_strided_slice %347 {offsets = [2, 0, 0], sizes = [8, 16, 128], strides = [1, 1, 1]} : vector<10x16x128xf32> to vector<8x16x128xf32>
    %359 = vector.shape_cast %327 : vector<16x128xf32> to vector<1x16x128xf32>
    %360 = vector.broadcast %359 : vector<1x16x128xf32> to vector<8x16x128xf32>
    %361 = arith.mulf %358, %360 : vector<8x16x128xf32>
    %362 = arith.addf %357, %361 : vector<8x16x128xf32>
    %c0_159 = arith.constant 0 : index
    %c9_160 = arith.constant 9 : index
    %c0_161 = arith.constant 0 : index
    %363 = vector.load %arg12[%c0_159, %c9_160, %c0_161] : memref<18x25x128xf32, #tpu.memory_space<vmem>>, vector<10x16x128xf32>
    %364 = vector.extract_strided_slice %363 {offsets = [0, 0, 0], sizes = [8, 16, 128], strides = [1, 1, 1]} : vector<10x16x128xf32> to vector<8x16x128xf32>
    %365 = vector.shape_cast %312 : vector<16x128xf32> to vector<1x16x128xf32>
    %366 = vector.broadcast %365 : vector<1x16x128xf32> to vector<8x16x128xf32>
    %367 = arith.mulf %364, %366 : vector<8x16x128xf32>
    %368 = arith.addf %362, %367 : vector<8x16x128xf32>
    %369 = vector.extract_strided_slice %363 {offsets = [1, 0, 0], sizes = [8, 16, 128], strides = [1, 1, 1]} : vector<10x16x128xf32> to vector<8x16x128xf32>
    %370 = vector.shape_cast %321 : vector<16x128xf32> to vector<1x16x128xf32>
    %371 = vector.broadcast %370 : vector<1x16x128xf32> to vector<8x16x128xf32>
    %372 = arith.mulf %369, %371 : vector<8x16x128xf32>
    %373 = arith.addf %368, %372 : vector<8x16x128xf32>
    %374 = vector.extract_strided_slice %363 {offsets = [2, 0, 0], sizes = [8, 16, 128], strides = [1, 1, 1]} : vector<10x16x128xf32> to vector<8x16x128xf32>
    %375 = vector.shape_cast %330 : vector<16x128xf32> to vector<1x16x128xf32>
    %376 = vector.broadcast %375 : vector<1x16x128xf32> to vector<8x16x128xf32>
    %377 = arith.mulf %374, %376 : vector<8x16x128xf32>
    %378 = arith.addf %373, %377 : vector<8x16x128xf32>
    %379 = vector.shape_cast %378 : vector<8x16x128xf32> to vector<128x128xf32>
    %380 = arith.truncf %379 : vector<128x128xf32> to vector<128x128xbf16>
    %c0_162 = arith.constant 0 : index
    %c0_163 = arith.constant 0 : index
    %381 = vector.load %arg9[%c0_162, %c0_163] : memref<128x128xbf16, #tpu.memory_space<vmem>>, vector<128x128xbf16>
    %cst_164 = arith.constant dense<0.000000e+00> : vector<128x128xf32>
    %382 = tpu.matmul %380, %381, %cst_164 {dimension_numbers = #tpu.dot_dimension_numbers<[1], [0], [0], [1], [0, 0, 1, 1], [], []>} : vector<128x128xbf16>, vector<128x128xbf16>, vector<128x128xf32> -> vector<128x128xf32>
    %383 = vector.broadcast %331 : vector<1x128xf32> to vector<128x128xf32>
    %384 = arith.addf %382, %383 : vector<128x128xf32>
    %385 = vector.shape_cast %384 : vector<128x128xf32> to vector<8x16x128xf32>
    %c0_165 = arith.constant 0 : index
    %c0_166 = arith.constant 0 : index
    %c0_167 = arith.constant 0 : index
    %c0_168 = arith.constant 0 : index
    %386 = vector.load %arg1[%c0_165, %c0_166, %c0_167, %c0_168] : memref<1x16x16x128xf32, #tpu.memory_space<vmem>>, vector<1x8x16x128xf32>
    %387 = vector.shape_cast %386 : vector<1x8x16x128xf32> to vector<8x16x128xf32>
    %388 = arith.addf %385, %387 : vector<8x16x128xf32>
    %c0_169 = arith.constant 0 : index
    %c0_170 = arith.constant 0 : index
    %c0_171 = arith.constant 0 : index
    %c0_172 = arith.constant 0 : index
    %389 = vector.load %arg11[%c0_169, %c0_170, %c0_171, %c0_172] : memref<1x16x16x128xf32, #tpu.memory_space<vmem>>, vector<1x8x16x128xf32>
    %390 = vector.shape_cast %389 : vector<1x8x16x128xf32> to vector<8x16x128xf32>
    %391 = vector.shape_cast %388 : vector<8x16x128xf32> to vector<1x8x16x128xf32>
    tpu.vector_store %arg11[%c0_169, %c0_170, %c0_171, %c0_172], %391 {strides = array<i32>} : memref<1x16x16x128xf32, #tpu.memory_space<vmem>>, vector<1x8x16x128xf32>,
    %c8_173 = arith.constant 8 : index
    %c7_174 = arith.constant 7 : index
    %c0_175 = arith.constant 0 : index
    %392 = vector.load %arg12[%c8_173, %c7_174, %c0_175] : memref<18x25x128xf32, #tpu.memory_space<vmem>>, vector<10x16x128xf32>
    %393 = vector.extract_strided_slice %392 {offsets = [0, 0, 0], sizes = [8, 16, 128], strides = [1, 1, 1]} : vector<10x16x128xf32> to vector<8x16x128xf32>
    %394 = vector.shape_cast %306 : vector<16x128xf32> to vector<1x16x128xf32>
    %395 = vector.broadcast %394 : vector<1x16x128xf32> to vector<8x16x128xf32>
    %396 = arith.mulf %393, %395 : vector<8x16x128xf32>
    %397 = vector.extract_strided_slice %392 {offsets = [1, 0, 0], sizes = [8, 16, 128], strides = [1, 1, 1]} : vector<10x16x128xf32> to vector<8x16x128xf32>
    %398 = vector.shape_cast %315 : vector<16x128xf32> to vector<1x16x128xf32>
    %399 = vector.broadcast %398 : vector<1x16x128xf32> to vector<8x16x128xf32>
    %400 = arith.mulf %397, %399 : vector<8x16x128xf32>
    %401 = arith.addf %396, %400 : vector<8x16x128xf32>
    %402 = vector.extract_strided_slice %392 {offsets = [2, 0, 0], sizes = [8, 16, 128], strides = [1, 1, 1]} : vector<10x16x128xf32> to vector<8x16x128xf32>
    %403 = vector.shape_cast %324 : vector<16x128xf32> to vector<1x16x128xf32>
    %404 = vector.broadcast %403 : vector<1x16x128xf32> to vector<8x16x128xf32>
    %405 = arith.mulf %402, %404 : vector<8x16x128xf32>
    %406 = arith.addf %401, %405 : vector<8x16x128xf32>
    %c8_176 = arith.constant 8 : index
    %c8_177 = arith.constant 8 : index
    %c0_178 = arith.constant 0 : index
    %407 = vector.load %arg12[%c8_176, %c8_177, %c0_178] : memref<18x25x128xf32, #tpu.memory_space<vmem>>, vector<10x16x128xf32>
    %408 = vector.extract_strided_slice %407 {offsets = [0, 0, 0], sizes = [8, 16, 128], strides = [1, 1, 1]} : vector<10x16x128xf32> to vector<8x16x128xf32>
    %409 = vector.shape_cast %309 : vector<16x128xf32> to vector<1x16x128xf32>
    %410 = vector.broadcast %409 : vector<1x16x128xf32> to vector<8x16x128xf32>
    %411 = arith.mulf %408, %410 : vector<8x16x128xf32>
    %412 = arith.addf %406, %411 : vector<8x16x128xf32>
    %413 = vector.extract_strided_slice %407 {offsets = [1, 0, 0], sizes = [8, 16, 128], strides = [1, 1, 1]} : vector<10x16x128xf32> to vector<8x16x128xf32>
    %414 = vector.shape_cast %318 : vector<16x128xf32> to vector<1x16x128xf32>
    %415 = vector.broadcast %414 : vector<1x16x128xf32> to vector<8x16x128xf32>
    %416 = arith.mulf %413, %415 : vector<8x16x128xf32>
    %417 = arith.addf %412, %416 : vector<8x16x128xf32>
    %418 = vector.extract_strided_slice %407 {offsets = [2, 0, 0], sizes = [8, 16, 128], strides = [1, 1, 1]} : vector<10x16x128xf32> to vector<8x16x128xf32>
    %419 = vector.shape_cast %327 : vector<16x128xf32> to vector<1x16x128xf32>
    %420 = vector.broadcast %419 : vector<1x16x128xf32> to vector<8x16x128xf32>
    %421 = arith.mulf %418, %420 : vector<8x16x128xf32>
    %422 = arith.addf %417, %421 : vector<8x16x128xf32>
    %c8_179 = arith.constant 8 : index
    %c9_180 = arith.constant 9 : index
    %c0_181 = arith.constant 0 : index
    %423 = vector.load %arg12[%c8_179, %c9_180, %c0_181] : memref<18x25x128xf32, #tpu.memory_space<vmem>>, vector<10x16x128xf32>
    %424 = vector.extract_strided_slice %423 {offsets = [0, 0, 0], sizes = [8, 16, 128], strides = [1, 1, 1]} : vector<10x16x128xf32> to vector<8x16x128xf32>
    %425 = vector.shape_cast %312 : vector<16x128xf32> to vector<1x16x128xf32>
    %426 = vector.broadcast %425 : vector<1x16x128xf32> to vector<8x16x128xf32>
    %427 = arith.mulf %424, %426 : vector<8x16x128xf32>
    %428 = arith.addf %422, %427 : vector<8x16x128xf32>
    %429 = vector.extract_strided_slice %423 {offsets = [1, 0, 0], sizes = [8, 16, 128], strides = [1, 1, 1]} : vector<10x16x128xf32> to vector<8x16x128xf32>
    %430 = vector.shape_cast %321 : vector<16x128xf32> to vector<1x16x128xf32>
    %431 = vector.broadcast %430 : vector<1x16x128xf32> to vector<8x16x128xf32>
    %432 = arith.mulf %429, %431 : vector<8x16x128xf32>
    %433 = arith.addf %428, %432 : vector<8x16x128xf32>
    %434 = vector.extract_strided_slice %423 {offsets = [2, 0, 0], sizes = [8, 16, 128], strides = [1, 1, 1]} : vector<10x16x128xf32> to vector<8x16x128xf32>
    %435 = vector.shape_cast %330 : vector<16x128xf32> to vector<1x16x128xf32>
    %436 = vector.broadcast %435 : vector<1x16x128xf32> to vector<8x16x128xf32>
    %437 = arith.mulf %434, %436 : vector<8x16x128xf32>
    %438 = arith.addf %433, %437 : vector<8x16x128xf32>
    %439 = vector.shape_cast %438 : vector<8x16x128xf32> to vector<128x128xf32>
    %440 = arith.truncf %439 : vector<128x128xf32> to vector<128x128xbf16>
    %c0_182 = arith.constant 0 : index
    %c0_183 = arith.constant 0 : index
    %441 = vector.load %arg9[%c0_182, %c0_183] : memref<128x128xbf16, #tpu.memory_space<vmem>>, vector<128x128xbf16>
    %cst_184 = arith.constant dense<0.000000e+00> : vector<128x128xf32>
    %442 = tpu.matmul %440, %441, %cst_184 {dimension_numbers = #tpu.dot_dimension_numbers<[1], [0], [0], [1], [0, 0, 1, 1], [], []>} : vector<128x128xbf16>, vector<128x128xbf16>, vector<128x128xf32> -> vector<128x128xf32>
    %443 = vector.broadcast %331 : vector<1x128xf32> to vector<128x128xf32>
    %444 = arith.addf %442, %443 : vector<128x128xf32>
    %445 = vector.shape_cast %444 : vector<128x128xf32> to vector<8x16x128xf32>
    %c0_185 = arith.constant 0 : index
    %c8_186 = arith.constant 8 : index
    %c0_187 = arith.constant 0 : index
    %c0_188 = arith.constant 0 : index
    %446 = vector.load %arg1[%c0_185, %c8_186, %c0_187, %c0_188] : memref<1x16x16x128xf32, #tpu.memory_space<vmem>>, vector<1x8x16x128xf32>
    %447 = vector.shape_cast %446 : vector<1x8x16x128xf32> to vector<8x16x128xf32>
    %448 = arith.addf %445, %447 : vector<8x16x128xf32>
    %c0_189 = arith.constant 0 : index
    %c8_190 = arith.constant 8 : index
    %c0_191 = arith.constant 0 : index
    %c0_192 = arith.constant 0 : index
    %449 = vector.load %arg11[%c0_189, %c8_190, %c0_191, %c0_192] : memref<1x16x16x128xf32, #tpu.memory_space<vmem>>, vector<1x8x16x128xf32>
    %450 = vector.shape_cast %449 : vector<1x8x16x128xf32> to vector<8x16x128xf32>
    %451 = vector.shape_cast %448 : vector<8x16x128xf32> to vector<1x8x16x128xf32>
    tpu.vector_store %arg11[%c0_189, %c8_190, %c0_191, %c0_192], %451 {strides = array<i32>} : memref<1x16x16x128xf32, #tpu.memory_space<vmem>>, vector<1x8x16x128xf32>,
    return
  }
  func.func @transform_0(%arg0: i32) -> (i32, i32, i32, i32) {
    %c0_i32 = arith.constant 0 : i32
    %c0_i32_0 = arith.constant 0 : i32
    %c0_i32_1 = arith.constant 0 : i32
    %c0_i32_2 = arith.constant 0 : i32
    return %arg0, %c0_i32, %c0_i32_0, %c0_i32_1 : i32, i32, i32, i32
  }
  func.func @transform_1(%arg0: i32) -> (i32, i32) {
    %c0_i32 = arith.constant 0 : i32
    %c0_i32_0 = arith.constant 0 : i32
    %c0_i32_1 = arith.constant 0 : i32
    return %c0_i32, %c0_i32_0 : i32, i32
  }
  func.func @transform_2(%arg0: i32) -> (i32, i32) {
    %c0_i32 = arith.constant 0 : i32
    %c0_i32_0 = arith.constant 0 : i32
    %c0_i32_1 = arith.constant 0 : i32
    return %c0_i32, %c0_i32_0 : i32, i32
  }
  func.func @transform_3(%arg0: i32) -> (i32, i32) {
    %c0_i32 = arith.constant 0 : i32
    %c0_i32_0 = arith.constant 0 : i32
    %c0_i32_1 = arith.constant 0 : i32
    return %c0_i32, %c0_i32_0 : i32, i32
  }
  func.func @transform_4(%arg0: i32) -> (i32, i32) {
    %c0_i32 = arith.constant 0 : i32
    %c0_i32_0 = arith.constant 0 : i32
    %c0_i32_1 = arith.constant 0 : i32
    return %c0_i32, %c0_i32_0 : i32, i32
  }
  func.func @transform_5(%arg0: i32) -> (i32, i32) {
    %c0_i32 = arith.constant 0 : i32
    %c0_i32_0 = arith.constant 0 : i32
    %c0_i32_1 = arith.constant 0 : i32
    return %c0_i32, %c0_i32_0 : i32, i32
  }
  func.func @transform_6(%arg0: i32) -> (i32, i32) {
    %c0_i32 = arith.constant 0 : i32
    %c0_i32_0 = arith.constant 0 : i32
    %c0_i32_1 = arith.constant 0 : i32
    return %c0_i32, %c0_i32_0 : i32, i32
  }
  func.func @transform_7(%arg0: i32) -> (i32, i32) {
    %c0_i32 = arith.constant 0 : i32
    %c0_i32_0 = arith.constant 0 : i32
    %c0_i32_1 = arith.constant 0 : i32
    return %c0_i32, %c0_i32_0 : i32, i32
  }
  func.func @transform_8(%arg0: i32) -> (i32, i32) {
    %c0_i32 = arith.constant 0 : i32
    %c0_i32_0 = arith.constant 0 : i32
    %c0_i32_1 = arith.constant 0 : i32
    return %c0_i32, %c0_i32_0 : i32, i32
  }
  func.func @transform_9(%arg0: i32) -> (i32, i32) {
    %c0_i32 = arith.constant 0 : i32
    %c0_i32_0 = arith.constant 0 : i32
    %c0_i32_1 = arith.constant 0 : i32
    return %c0_i32, %c0_i32_0 : i32, i32
  }
  func.func @transform_10(%arg0: i32) -> (i32, i32, i32, i32) {
    %c0_i32 = arith.constant 0 : i32
    %c0_i32_0 = arith.constant 0 : i32
    %c0_i32_1 = arith.constant 0 : i32
    %c0_i32_2 = arith.constant 0 : i32
    return %arg0, %c0_i32, %c0_i32_0, %c0_i32_1 : i32, i32, i32, i32
  }
}

</mosaic_0001>

<bundles_post_ra>
// kernel: tpu_custom_call.1
= control target key start
LH: loop header
LB: loop body
LE: loop exit
PB: predicated region body
PF: predicated region fallthrough
CT: control target
= control target key end

     0   :  { %s8588_s0 = inlined_call_operand.hbm [shape: f32[2,16,16,128], index: 0, kind: input, shape index: {}]   ;;  %s8589_s1 = inlined_call_operand.hbm [shape: f32[9,128], index: 1, kind: input, shape index: {}]   ;;  %s8590_s2 = inlined_call_operand.hbm [shape: bf16[128,128], index: 2, kind: input, shape index: {}]   ;;  %s8591_s3 = inlined_call_operand.vmem [shape: f32[1,128], index: 3, kind: input, shape index: {}]   ;;  %s8592_s4 = inlined_call_operand.hbm [shape: f32[9,128], index: 4, kind: input, shape index: {}]   ;;  %s8593_s5 = inlined_call_operand.hbm [shape: bf16[128,128], index: 5, kind: input, shape index: {}]   ;;  %s8594_s6 = inlined_call_operand.vmem [shape: f32[1,128], index: 6, kind: input, shape index: {}]   ;;  %s8595_s7 = inlined_call_operand.vmem [shape: f32[9,128], index: 7, kind: input, shape index: {}]   ;;  %s8596_s8 = inlined_call_operand.hbm [shape: bf16[128,128], index: 8, kind: input, shape index: {}]   ;;  %s8597_s9 = inlined_call_operand.vmem [shape: f32[1,128], index: 9, kind: input, shape index: {}]   ;;  %s8598_s10 = inlined_call_operand.hbm [shape: f32[2,16,16,128], index: 10, kind: output, shape index: {}]  }
   0x1   :  { %8678 = sst [smem:[#allocation68_spill]] %s8589_s1 }
   0x2   :  { %8679 = sst [smem:[#allocation69_spill]] %s8592_s4 }
   0x3   :  { %8680 = sst [smem:[#allocation70_spill]] %s8597_s9 }
   0x4   :  { %8681 = sst [smem:[#allocation71_spill]] %s8598_s10 }
   0x5   :  { %15 = vsyncpa [#allocation5], 0 }
   0x6   :  { %17 = vsyncpa [#allocation5 + $0x1], 0 }
   0x7   :  { %18 = vsyncpa [#allocation8], 0 }
   0x8   :  { %19 = vsyncpa [#allocation11], 0 }
   0x9   :  { %20 = vsyncpa [#allocation14], 0 }
   0xa   :  { %21 = vsyncpa [#allocation6], 0 }
   0xb   :  { %23 = vsyncpa [#allocation6 + $0x1], 0  ;;  %s5109_s13 = smov 0   ;;  %s5111_s14 = smov 0  }
   0xc   :  { %s5113_s15 = smov 0   ;;  %s5115_s16 = smov 0  }
   0xd LB: > { %s5040_s17 = smov [#allocation7]   ;;  %s5130_s19 = sadd.s32 4294967295, %s5038_s16   ;;  %s5038_s16 = sphi %s5115_s16, %s8938_s16   ;;  %s5034_s15 = sphi %s5113_s15, %s8937_s15   ;;  %s5030_s14 = sphi %s5111_s14, %s8936_s14   ;;  %s5026_s13 = sphi %s5109_s13, %s8935_s13  }
   0xe   : > { %s287_s18 = sshll.u32 %s5040_s17, 4  ;;  %p4168_p0 = scmp.ge.s32.totalorder %s5038_s16, 1  ;;  %s5135_s18 = int_to_ptr.vmem [resolvable:$true] %s287_s18 }
   0xf   : > { %p8602_p1 = scmp.eq.s32.totalorder %s5130_s19, 0  ;;  %p275_p2 = scmp.lt.s32.totalorder %s5038_s16, 3 }
  0x10   : > { %s5041_s21 = smov [#allocation10]   ;;  %s5042_s24 = smov [#allocation9]  }
  0x11   : > { %p5137_p3 = pnand %p4168_p0, %p275_p2  ;;  %s316_s22 = sshll.u32 %s5041_s21, 4  ;;  %s5150_s22 = int_to_ptr.vmem [resolvable:$true] %s316_s22 }
  0x12   : > { %s300_s25 = sshll.u32 %s5042_s24, 4  ;;  %s8684_s1 = sld [smem:[#allocation68_spill]]  ;;  %s5152_s25 = int_to_ptr.vmem [resolvable:$true] %s300_s25 }
  0x13   : > { %s8682_s20 = scalar_select %p5137_p3, 1, 0 }
  0x14   : > { %p4631_p5 = pneg %p5137_p3 }
  0x16   : > { %p5146_p6 = pnand %p4631_p5, %p8602_p1 }
  0x18   : > { %s4790_s28 = scalar_lea.hbm %s8684_s1, 256  ;;  %p5162_p8 = pneg %p5146_p6 }
  0x19   : > { %p4791_p7 = scmp.ne.s32.totalorder %s8684_s1, %s4790_s28  ;;  %p4797_p11 = scmp.lt.u32.totalorder %s4790_s28, %s8684_s1 }
  0x1b   : > { %p4793_p9 = pnand %p5162_p8, %p4791_p7 }
  0x1d   : > { %p4794_p10 = pneg %p4793_p9 }
  0x1f   : > { %p4799_p12 = pnand %p4797_p11, %p4794_p10 }
  0x21   : > { %4802 = shalt.err (!%p4799_p12)
}
  0x22   : > { %s4803_s21 = scalar_lea.vmem %s5135_s18, 256  ;;  %p4811_p5 = scmp.lt.s32.totalorder %s5135_s18, %s5135_s18 }
  0x23   : > { %p4804_p13 = scmp.ne.s32.totalorder %s5135_s18, %s4803_s21  ;;  %p4812_p4 = scmp.lt.s32.totalorder %s4803_s21, %s4803_s21 }
  0x25   : > { %p4806_p0 = pnand %p4804_p13, %p5162_p8  ;;  %p4813_p7 = por %p4812_p4, %p4811_p5 }
  0x27   : > { %p4807_p2 = pneg %p4806_p0 }
  0x29   : > { %p4814_p9 = pnand %p4813_p7, %p4807_p2 }
  0x2b   : > { %4817 = shalt.err (!%p4814_p9)
}
  0x2c   : > { %s8600_s24 = smov 128   ;;  %s8601_s26 = smov 8  }
  0x2d   : > { %4634 = dma.hbm_to_vmem [thread:$0]  (!%p5146_p6), %s8684_s1, 256, %s5135_s18, [#allocation8], %s8600_s24, %s8600_s24, %s8601_s26  }
  0x2e   : > { %s8686_s4 = sld [smem:[#allocation69_spill]] }
  0x34   : > { %s4818_s12 = scalar_lea.hbm %s8686_s4, 256 }
  0x35   : > { %p4819_p4 = scmp.ne.s32.totalorder %s8686_s4, %s4818_s12  ;;  %p4825_p12 = scmp.lt.u32.totalorder %s4818_s12, %s8686_s4 }
  0x37   : > { %p4821_p10 = pnand %p4819_p4, %p5162_p8 }
  0x39   : > { %p4822_p11 = pneg %p4821_p10 }
  0x3b   : > { %p4827_p13 = pnand %p4825_p12, %p4822_p11 }
  0x3d   : > { %4830 = shalt.err (!%p4827_p13)
}
  0x3e   : > { %s4831_s18 = scalar_lea.vmem %s5150_s22, 256  ;;  %p4839_p7 = scmp.lt.s32.totalorder %s5150_s22, %s5150_s22 }
  0x3f   : > { %p4832_p0 = scmp.ne.s32.totalorder %s5150_s22, %s4831_s18  ;;  %p4840_p9 = scmp.lt.s32.totalorder %s4831_s18, %s4831_s18 }
  0x41   : > { %p4834_p2 = pnand %p4832_p0, %p5162_p8  ;;  %p4841_p4 = por %p4840_p9, %p4839_p7 }
  0x43   : > { %p4835_p5 = pneg %p4834_p2 }
  0x45   : > { %p4842_p10 = pnand %p4841_p4, %p4835_p5 }
  0x47   : > { %4845 = shalt.err (!%p4842_p10)
}
  0x48   : > { %4640 = dma.hbm_to_vmem [thread:$0]  (!%p5146_p6), %s8686_s4, 256, %s5150_s22, [#allocation11], %s8600_s24, %s8600_s24, %s8601_s26  }
  0x49   : > { %s4846_s29 = scalar_lea.hbm %s8590_s2, 1024 }
  0x4a   : > { %p4847_p11 = scmp.ne.s32.totalorder %s8590_s2, %s4846_s29  ;;  %p4853_p0 = scmp.lt.u32.totalorder %s4846_s29, %s8590_s2 }
  0x4c   : > { %p4849_p12 = pnand %p4847_p11, %p5162_p8 }
  0x4e   : > { %p4850_p13 = pneg %p4849_p12 }
  0x50   : > { %p4855_p2 = pnand %p4853_p0, %p4850_p13 }
  0x52   : > { %4858 = shalt.err (!%p4855_p2)
}
  0x53   : > { %s4859_s22 = scalar_lea.vmem %s5152_s25, 1024  ;;  %p4867_p4 = scmp.lt.s32.totalorder %s5152_s25, %s5152_s25 }
  0x54   : > { %p4860_p5 = scmp.ne.s32.totalorder %s5152_s25, %s4859_s22  ;;  %p4868_p10 = scmp.lt.s32.totalorder %s4859_s22, %s4859_s22 }
  0x56   : > { %p4862_p7 = pnand %p4860_p5, %p5162_p8  ;;  %p4869_p11 = por %p4868_p10, %p4867_p4 }
  0x58   : > { %p4863_p9 = pneg %p4862_p7 }
  0x5a   : > { %p4870_p12 = pnand %p4869_p11, %p4863_p9 }
  0x5c   : > { %4873 = shalt.err (!%p4870_p12)
}
  0x5d   : > { %s5045_s18 = smov 64   ;;  %s5046_s9 = smov 4  }
  0x5e   : > { %4637 = dma.hbm_to_vmem [thread:$0]  (!%p5146_p6), %s8590_s2, 1024, %s5152_s25, [#allocation8], %s5045_s18, %s5045_s18, %s5046_s9  }
  0x5f   : > { %s5047_s28 = smov [#allocation12]   ;;  %s5048_s30 = smov [#allocation13]  }
  0x60   : > { %s329_s29 = sshll.u32 %s5047_s28, 4  ;;  %s348_s12 = sshll.u32 %s5048_s30, 4  ;;  %s330_s29 = int_to_ptr.vmem [resolvable:$true] %s329_s29  ;;  %s349_s12 = int_to_ptr.vmem [resolvable:$true] %s348_s12 }
  0x61   : > { %s4874_s22 = scalar_lea.hbm %s8593_s5, 1024 }
  0x62   : > { %p4875_p13 = scmp.ne.s32.totalorder %s8593_s5, %s4874_s22  ;;  %p4881_p5 = scmp.lt.u32.totalorder %s4874_s22, %s8593_s5 }
  0x64   : > { %p4877_p0 = pnand %p4875_p13, %p5162_p8 }
  0x66   : > { %p4878_p2 = pneg %p4877_p0 }
  0x68   : > { %p4883_p7 = pnand %p4881_p5, %p4878_p2 }
  0x6a   : > { %4886 = shalt.err (!%p4883_p7)
}
  0x6b   : > { %s4887_s25 = scalar_lea.vmem %s330_s29, 1024  ;;  %p4895_p11 = scmp.lt.s32.totalorder %s330_s29, %s330_s29 }
  0x6c   : > { %p4888_p9 = scmp.ne.s32.totalorder %s330_s29, %s4887_s25  ;;  %p4896_p12 = scmp.lt.s32.totalorder %s4887_s25, %s4887_s25 }
  0x6e   : > { %p4890_p4 = pnand %p4888_p9, %p5162_p8  ;;  %p4897_p1 = por %p4896_p12, %p4895_p11 }
  0x70   : > { %p4891_p10 = pneg %p4890_p4 }
  0x72   : > { %p4898_p3 = pnand %p4897_p1, %p4891_p10 }
  0x74   : > { %4901 = shalt.err (!%p4898_p3)
}
  0x75   : > { %4643 = dma.hbm_to_vmem [thread:$0]  (!%p5146_p6), %s8593_s5, 1024, %s330_s29, [#allocation11], %s5045_s18, %s5045_s18, %s5046_s9  }
  0x76   : > { %s4902_s10 = scalar_lea.hbm %s8596_s8, 1024 }
  0x77   : > { %p4903_p1 = scmp.ne.s32.totalorder %s8596_s8, %s4902_s10  ;;  %p4909_p0 = scmp.lt.u32.totalorder %s4902_s10, %s8596_s8 }
  0x79   : > { %p4905_p3 = pnand %p4903_p1, %p5162_p8 }
  0x7b   : > { %p4906_p13 = pneg %p4905_p3 }
  0x7d   : > { %p4911_p2 = pnand %p4909_p0, %p4906_p13 }
  0x7f   : > { %4914 = shalt.err (!%p4911_p2)
}
  0x80   : > { %s4915_s21 = scalar_lea.vmem %s349_s12, 1024  ;;  %p4923_p4 = scmp.lt.s32.totalorder %s349_s12, %s349_s12 }
  0x81   : > { %p4916_p5 = scmp.ne.s32.totalorder %s349_s12, %s4915_s21  ;;  %p4924_p10 = scmp.lt.s32.totalorder %s4915_s21, %s4915_s21 }
  0x83   : > { %p4918_p7 = pnand %p4916_p5, %p5162_p8  ;;  %p4925_p11 = por %p4924_p10, %p4923_p4 }
  0x85   : > { %p4919_p9 = pneg %p4918_p7 }
  0x87   : > { %p4926_p12 = pnand %p4925_p11, %p4919_p9 }
  0x89   : > { %4929 = shalt.err (!%p4926_p12)
}
  0x8a   : > { %4646 = dma.hbm_to_vmem [thread:$0]  (!%p5146_p6), %s8596_s8, 1024, %s349_s12, [#allocation14], %s5045_s18, %s5045_s18, %s5046_s9  }
  0x8b   : > { %s4167_s23 = sadd.s32 4294967294, %s5038_s16   ;;  %s5282_s11 = sadd.s32 1, %s5038_s16  }
  0x8c   : > { %s36_s25 = sadd.s32 1, %s5034_s15  ;;  %s33_s1 = ssub.s32 %s5038_s16, %s5282_s11 }
  0x8d   : > { %p43_p8 = scmp.ne.s32.totalorder %s5034_s15, %s5030_s14  ;;  %p34_p1 = scmp.eq.s32.totalorder %s33_s1, 0 }
  0x8e   : > { %p44_p3 = scmp.eq.s32.totalorder %s5038_s16, 0  ;;  %p49_p13 = scmp.ne.s32.totalorder %s5030_s14, %s5026_s13 }
  0x8f   : > { %p262_p0 = scmp.eq.s32.totalorder %s5130_s19, 1  ;;  %p8687_p5 = scmp.eq.s32.totalorder %s5130_s19, 0 }
  0x90   : > { %s5294_s4 = scalar_select %p34_p1, %s5034_s15, %s36_s25  }
  0x91   : > { %p45_p2 = por %p44_p3, %p43_p8  ;;  %p5298_p7 = por %p8687_p5, %p49_p13 }
  0x92   : > { %p5302_p6 = por %p262_p0, %p43_p8  ;;  %p268_p9 = scmp.eq.s32.totalorder %s4167_s23, 1 }
  0x93   : > { %p4660_p4 = scmp.lt.s32.totalorder %s5038_s16, 2  ;;  %s365_s9 = sand.u32 1, %s5034_s15  }
  0x94   : > { %s8689_s18 = scalar_select %p5302_p6, 1, 0 }
  0x95   : > { %p5308_p10 = por %p268_p9, %p49_p13  ;;  %s4175_s26 = sshll.u32 %s365_s9, 8 }
  0x96   : > { %s4317_s10 = sshll.u32 %s5038_s16, 12  ;;  %s369_s17 = scalar_lea.vmem [#allocation4], %s4175_s26 }
  0x97   : > { %s8690_s12 = scalar_select %p5308_p10, 1, 0 }
  0x98   : > { %s5316_s30 = scalar_lea.hbm %s8588_s0, %s4317_s10  ;;  %s376_s21 = sshll.u32 %s369_s17, 4  ;;  %s5322_s21 = int_to_ptr.vmem [resolvable:$true] %s376_s21 }
  0x99   : > { %p5318_p11 = pnand %p4660_p4, %p45_p2  ;;  %s5324_s22 = scalar_lea.sflag [#allocation5], %s365_s9 }
  0x9a   : > { %s4930_s23 = scalar_lea.hbm %s5316_s30, 4096  ;;  %s4935_s26 = scalar_lea.hbm %s8588_s0, 8192 }
  0x9b   : > { %p4931_p12 = scmp.ne.s32.totalorder %s5316_s30, %s4930_s23  ;;  %p4932_p8 = pneg %p5318_p11 }
  0x9c   : > { %p4936_p13 = scmp.lt.u32.totalorder %s5316_s30, %s8588_s0  ;;  %p4937_p0 = scmp.lt.u32.totalorder %s4935_s26, %s4930_s23 }
  0x9d   : > { %p4933_p1 = pnand %p4932_p8, %p4931_p12  ;;  %p4939_p5 = scmp.lt.u32.totalorder %s4930_s23, %s5316_s30 }
  0x9e   : > { %p4938_p2 = por %p4937_p0, %p4936_p13 }
  0x9f   : > { %p4934_p3 = pneg %p4933_p1 }
  0xa0   : > { %p4940_p9 = por %p4939_p5, %p4938_p2 }
  0xa2   : > { %p4941_p4 = pnand %p4940_p9, %p4934_p3 }
  0xa4   : > { %4944 = shalt.err (!%p4941_p4)
}
  0xa5   : > { %s4945_s9 = scalar_lea.vmem %s5322_s21, 4096  ;;  %s5049_s28 = smov [#allocation4]  }
  0xa6   : > { %p4946_p12 = scmp.ne.s32.totalorder %s5322_s21, %s4945_s9  ;;  %s4950_s17 = sshll.u32 %s5049_s28, 4  ;;  %s4951_s17 = int_to_ptr.vmem [resolvable:$false] %s4950_s17 }
  0xa7   : > { %s4952_s25 = scalar_lea.vmem %s4951_s17, 8192  ;;  %p4953_p6 = scmp.lt.s32.totalorder %s5322_s21, %s4951_s17 }
  0xa8   : > { %p4948_p1 = pnand %p4946_p12, %p4932_p8  ;;  %p4954_p13 = scmp.lt.s32.totalorder %s4952_s25, %s4945_s9 }
  0xaa   : > { %p4949_p10 = pneg %p4948_p1  ;;  %p4955_p0 = por %p4954_p13, %p4953_p6 }
  0xac   : > { %p4956_p2 = pnand %p4955_p0, %p4949_p10 }
  0xae   : > { %4959 = shalt.err (!%p4956_p2)
}
  0xaf   : > { %s8692_s23 = smov 8   ;;  %s8693_s1 = smov 128  }
  0xb0   : > { %4650 = dma.hbm_to_vmem [thread:$0]  (!%p5318_p11), %s5316_s30, 4096, %s5322_s21, %s5324_s22, %s8693_s1, %s8693_s1, %s8692_s23  }
  0xb1   : > { %p8694_p8 = scmp.ne.s32.totalorder %s8682_s20, 0 }
  0xb3   : > { %388 = sbr.rel (%p8694_p8) target bundleno = 1222 (0x4c6), region = 60 }
  0xba   : > { %s5358_s26 = sand.u32 1, %s5030_s14  }
  0xbb   : > { %s4179_s10 = sshll.u32 %s5358_s26, 8  ;;  %s391_s27 = scalar_lea.sflag [#allocation5], %s5358_s26 }
  0xbc   : > { %s5364_s29 = scalar_lea.vmem [#allocation4], %s4179_s10 }
  0xbd   : > { %5005 = dma.done.wait (%p5298_p7), %s391_s27, 4096  }
  0xbe   : > { %5007 = vsyncadd (%p5298_p7), %s391_s27, 4294963200  ;;  %p8695_p6 = scmp.eq.s32.totalorder %s5130_s19, 0 }
  0xc0   : > { %5009 = dma.done.wait (%p8695_p6), [#allocation8], 1280   ;;  %p8696_p10 = pmov %p8695_p6 }
  0xc1   : > { %p8697_p11 = pmov %p8695_p6 }
  0xc2   : > { %5011 = vsyncadd (%p8696_p10), [#allocation8], 4294966016 }
  0xc3   : > { %5013 = dma.done.wait (%p8697_p11), [#allocation11], 1280   ;;  %p8698_p3 = pmov %p8695_p6 }
  0xc5   : > { %5015 = vsyncadd (%p8698_p3), [#allocation11], 4294966016  ;;  %p8699_p5 = pmov %p8698_p3 }
  0xc6   : > { %p8700_p9 = pmov %p8698_p3 }
  0xc7   : > { %5017 = dma.done.wait (%p8699_p5), [#allocation14], 1024  }
  0xc8   : > { %5019 = vsyncadd (%p8700_p9), [#allocation14], 4294966272  ;;  %v5050_v0 = vmov 0.0   ;;  %v4711_v1 = vld [vmem:[#allocation9] sm:$0xff]   ;;  %v4713_v3 = vld [vmem:[#allocation9 + $0x8] sm:$0xff]   ;;  %s8930_s25 = sld [smem:[#allocation70_spill]] }
  0xc9   : > { %452 = vst [vmem:[#allocation2] sm:$0xff] %v5050_v0  ;;  %453 = vst [vmem:[#allocation2 + $0x8] sm:$0xff] %v5050_v0  ;;  %v4712_v2 = vld [vmem:[#allocation9] sm:$0xff]   ;;  %4415 = vmatprep.subr.bf16.mxu0 %v4711_v1  ;;  %v4714_v4 = vld [vmem:[#allocation9 + $0x8] sm:$0xff]   ;;  %s8447_s23 = scalar_lea.vmem [#allocation15], %s4179_s10  ;;  %s4318_s10 = sshll.u32 %s5130_s19, 12 }
  0xca   : > { %454 = vst [vmem:[#allocation2 + $0x10] sm:$0xff] %v5050_v0  ;;  %455 = vst [vmem:[#allocation2 + $0x18] sm:$0x1] %v5050_v0  ;;  %4447 = vmatprep.subr.bf16.mxu1 %v4712_v2  ;;  %4416 = vmatpush3.bf16.msra.mxu0 %v4711_v1  ;;  %v4715_v5 = vld [vmem:[#allocation9 + $0x10] sm:$0xff]   ;;  %v4717_v7 = vld [vmem:[#allocation9 + $0x18] sm:$0xff]   ;;  %s4046_s1 = sshll.u32 %s8447_s23, 4  ;;  %s8541_s1 = int_to_ptr.vmem [resolvable:$true] %s4046_s1 }
  0xcb   : > { %462 = vst [vmem:[#allocation2 + $0x27] sm:$0x1] %v5050_v0  ;;  %463 = vst [vmem:[#allocation2 + $0x47] sm:$0x1] %v5050_v0  ;;  %4448 = vmatpush3.bf16.msra.mxu1 %v4712_v2  ;;  %4417 = vmatprep.subr.bf16.mxu0 %v4713_v3  ;;  %v4716_v6 = vld [vmem:[#allocation9 + $0x10] sm:$0xff]   ;;  %v4718_v8 = vld [vmem:[#allocation9 + $0x18] sm:$0xff]  }
  0xcc   : > { %480 = vst [vmem:[#allocation2 + $0x38] sm:$0x1] %v5050_v0  ;;  %481 = vst [vmem:[#allocation2 + $0x58] sm:$0x1] %v5050_v0  ;;  %4449 = vmatprep.subr.bf16.mxu1 %v4714_v4  ;;  %v4719_v9 = vld [vmem:[#allocation9 + $0x20] sm:$0xff]   ;;  %v4721_v11 = vld [vmem:[#allocation9 + $0x28] sm:$0xff]  }
  0xcd   : > { %457 = vst [vmem:[#allocation2 + $0x220] sm:$0xff] %v5050_v0  ;;  %458 = vst [vmem:[#allocation2 + $0x228] sm:$0xff] %v5050_v0  ;;  %v4720_v10 = vld [vmem:[#allocation9 + $0x20] sm:$0xff]   ;;  %v4722_v12 = vld [vmem:[#allocation9 + $0x28] sm:$0xff]   ;;  %s8931_s24 = sld [smem:[#allocation71_spill]]  ;;  %s4033_s19 = scalar_lea.sflag [#allocation6], %s5358_s26 }
  0xce   : > { %459 = vst [vmem:[#allocation2 + $0x230] sm:$0xff] %v5050_v0  ;;  %460 = vst [vmem:[#allocation2 + $0x238] sm:$0x1] %v5050_v0  ;;  %4418 = vmatpush3.bf16.msra.mxu0 %v4713_v3  ;;  %v542_v13 = vld [vmem:[%s5364_s29] sm:$0xff]  ;;  %v543_v14 = vld [vmem:[%s5364_s29 + $0x8] sm:$0xff]  ;;  %p8932_p4 = scmp.ne.s32.totalorder %s8689_s18, 0 }
  0xcf   : > { %464 = vst [vmem:[#allocation2 + $0x67] sm:$0x1] %v5050_v0  ;;  %465 = vst [vmem:[#allocation2 + $0x87] sm:$0x1] %v5050_v0  ;;  %4450 = vmatpush3.bf16.msra.mxu1 %v4714_v4  ;;  %4419 = vmatprep.subr.bf16.mxu0 %v4715_v5  ;;  %v544_v15 = vld [vmem:[%s5364_s29 + $0x10] sm:$0xff]  ;;  %v545_v16 = vld [vmem:[%s5364_s29 + $0x18] sm:$0xff] }
  0xd0   : > { %466 = vst [vmem:[#allocation2 + $0xa7] sm:$0x1] %v5050_v0  ;;  %467 = vst [vmem:[#allocation2 + $0xc7] sm:$0x1] %v5050_v0  ;;  %4451 = vmatprep.subr.bf16.mxu1 %v4716_v6  ;;  %v558_v17 = vmax.f32 %v542_v13, 0.0  ;;  %v559_v18 = vmax.f32 %v543_v14, 0.0 }
  0xd1   : > { %468 = vst [vmem:[#allocation2 + $0xe7] sm:$0x1] %v5050_v0  ;;  %469 = vst [vmem:[#allocation2 + $0x107] sm:$0x1] %v5050_v0  ;;  %v560_v19 = vmax.f32 %v544_v15, 0.0  ;;  %v561_v21 = vmax.f32 %v545_v16, 0.0 }
  0xd2   : > { %470 = vst [vmem:[#allocation2 + $0x127] sm:$0x1] %v5050_v0  ;;  %471 = vst [vmem:[#allocation2 + $0x147] sm:$0x1] %v5050_v0  ;;  %4420 = vmatpush3.bf16.msra.mxu0 %v4715_v5  ;;  %v5474_v20 = vld [vmem:[#allocation7] ss:$0 sm:$0xff] }
  0xd3   : > { %472 = vst [vmem:[#allocation2 + $0x167] sm:$0x1] %v5050_v0  ;;  %473 = vst [vmem:[#allocation2 + $0x187] sm:$0x1] %v5050_v0  ;;  %4452 = vmatpush3.bf16.msra.mxu1 %v4716_v6  ;;  %4421 = vmatprep.subr.bf16.mxu0 %v4717_v7  ;;  %v5476_v22 = vld [vmem:[#allocation7 + $0x1] ss:$0 sm:$0xff]  ;;  %s8539_s30 = scalar_lea.hbm %s8931_s24, %s4318_s10 }
  0xd4   : > { %474 = vst [vmem:[#allocation2 + $0x1a7] sm:$0x1] %v5050_v0  ;;  %475 = vst [vmem:[#allocation2 + $0x1c7] sm:$0x1] %v5050_v0  ;;  %4453 = vmatprep.subr.bf16.mxu1 %v4718_v8  ;;  %v5478_v24 = vld [vmem:[#allocation7 + $0x2] ss:$0 sm:$0xff]  ;;  %v5493_v31 = vmul.f32 %v5476_v22, %v558_v17  ;;  %v5496_v32 = vmul.f32 %v5476_v22, %v559_v18  ;;  %v5530_v49 = vmul.f32 %v5476_v22, %v560_v19 }
  0xd5   : > { %476 = vst [vmem:[#allocation2 + $0x1e7] sm:$0x1] %v5050_v0  ;;  %477 = vst [vmem:[#allocation2 + $0x207] sm:$0x1] %v5050_v0  ;;  %v5480_v25 = vld [vmem:[#allocation7 + $0x4] ss:$0 sm:$0xff]  ;;  %v5548_v63 = vmul.f32 %v5476_v22, %v561_v21 }
  0xd6   : > { %482 = vst [vmem:[#allocation2 + $0x78] sm:$0x1] %v5050_v0  ;;  %483 = vst [vmem:[#allocation2 + $0x98] sm:$0x1] %v5050_v0  ;;  %4422 = vmatpush3.bf16.msra.mxu0 %v4717_v7  ;;  %v5486_v27 = vmul.f32 0.0, %v5476_v22  ;;  %v4723_v28 = vld [vmem:[#allocation9 + $0x30] sm:$0xff]   ;;  %v5499_v33 = vmul.f32 %v5480_v25, %v558_v17  ;;  %v5502_v35 = vmul.f32 %v5480_v25, %v559_v18 }
  0xd7   : > { %484 = vst [vmem:[#allocation2 + $0xb8] sm:$0x1] %v5050_v0  ;;  %485 = vst [vmem:[#allocation2 + $0xd8] sm:$0x1] %v5050_v0  ;;  %4454 = vmatpush3.bf16.msra.mxu1 %v4718_v8  ;;  %4423 = vmatprep.subr.bf16.mxu0 %v4719_v9  ;;  %v5488_v29 = vld [vmem:[#allocation9 + $0x30] sm:$0xff]   ;;  %v652_v34 = vld [vmem:[#allocation2 + $0xf] sm:$0xff]  ;;  %v5511_v40 = vmul.f32 %v5480_v25, %v560_v19  ;;  %v5527_v48 = vmul.f32 %v5480_v25, %v561_v21 }
  0xd8   : > { %486 = vst [vmem:[#allocation2 + $0xf8] sm:$0x1] %v5050_v0  ;;  %487 = vst [vmem:[#allocation2 + $0x118] sm:$0x1] %v5050_v0  ;;  %4455 = vmatprep.subr.bf16.mxu1 %v4720_v10  ;;  %v5490_v30 = vld [vmem:[#allocation7 + $0x7] ss:$0 sm:$0xff]  ;;  %v5518_v43 = vmul.f32 %v5474_v20, %v652_v34 }
  0xd9   : > { %488 = vst [vmem:[#allocation2 + $0x138] sm:$0x1] %v5050_v0  ;;  %489 = vst [vmem:[#allocation2 + $0x158] sm:$0x1] %v5050_v0  ;;  %v5505_v36 = vmul.f32 %v5490_v30, %v560_v19  ;;  %v5508_v37 = vmul.f32 %v5490_v30, %v561_v21  ;;  %v891_v38 = vld [vmem:[#allocation2 + $0x9] sm:$0xff]  ;;  %v557_v46 = vld [vmem:[%s5364_s29 + $0x78] sm:$0xff] }
  0xda   : > { %490 = vst [vmem:[#allocation2 + $0x178] sm:$0x1] %v5050_v0  ;;  %491 = vst [vmem:[#allocation2 + $0x198] sm:$0x1] %v5050_v0  ;;  %4424 = vmatpush3.bf16.msra.mxu0 %v4719_v9  ;;  %v5513_v41 = vld [vmem:[#allocation9 + $0x38] sm:$0xff]   ;;  %v5521_v44 = vmul.f32 %v5478_v24, %v891_v38  ;;  %v556_v45 = vld [vmem:[%s5364_s29 + $0x70] sm:$0xff] }
  0xdb   : > { %492 = vst [vmem:[#allocation2 + $0x1b8] sm:$0x1] %v5050_v0  ;;  %493 = vst [vmem:[#allocation2 + $0x1d8] sm:$0x1] %v5050_v0  ;;  %4456 = vmatpush3.bf16.msra.mxu1 %v4720_v10  ;;  %4425 = vmatprep.subr.bf16.mxu0 %v4721_v11  ;;  %v5515_v42 = vld [vmem:[#allocation7 + $0x3] ss:$0 sm:$0xff] }
  0xdc   : > { %494 = vst [vmem:[#allocation2 + $0x1f8] sm:$0x1] %v5050_v0  ;;  %495 = vst [vmem:[#allocation2 + $0x218] sm:$0x1] %v5050_v0  ;;  %4457 = vmatprep.subr.bf16.mxu1 %v4722_v12  ;;  %v4186_v47 = vld [vmem:[%s5364_s29 + $0x80] sm:$0xff]  ;;  %v5532_v50 = vld [vmem:[#allocation9 + $0x38] sm:$0xff]  }
  0xdd   : > { %497 = vst [vmem:[#allocation3] sm:$0xff] %v5050_v0  ;;  %498 = vst [vmem:[#allocation3 + $0x8] sm:$0xff] %v5050_v0  ;;  %v572_v52 = vmax.f32 %v556_v45, 0.0  ;;  %v573_v53 = vmax.f32 %v557_v46, 0.0  ;;  %v4187_v54 = vld [vmem:[%s5364_s29 + $0x88] sm:$0xff]  ;;  %v4188_v55 = vld [vmem:[%s5364_s29 + $0x90] sm:$0xff] }
  0xde   : > { %499 = vst [vmem:[#allocation3 + $0x10] sm:$0xff] %v5050_v0  ;;  %500 = vst [vmem:[#allocation3 + $0x18] sm:$0x1] %v5050_v0  ;;  %4426 = vmatpush3.bf16.msra.mxu0 %v4721_v11  ;;  %v4189_v56 = vld [vmem:[%s5364_s29 + $0x98] sm:$0xff]  ;;  %v608_v57 = vmax.f32 %v4186_v47, 0.0  ;;  %v609_v59 = vmax.f32 %v4187_v54, 0.0 }
  0xdf   : > { %502 = vst [vmem:[#allocation3 + $0x220] sm:$0xff] %v5050_v0  ;;  %503 = vst [vmem:[#allocation3 + $0x228] sm:$0xff] %v5050_v0  ;;  %4458 = vmatpush3.bf16.msra.mxu1 %v4722_v12  ;;  %4427 = vmatprep.subr.bf16.mxu0 %v4723_v28  ;;  %v5540_v58 = vld [vmem:[#allocation7 + $0x6] ss:$0 sm:$0xff]  ;;  %v5542_v60 = vmax.f32 %v4188_v55, 0.0  ;;  %v5544_v61 = vmax.f32 %v4189_v56, 0.0  ;;  %v5556_v2 = vmul.f32 %v5476_v22, %v572_v52 }
  0xe0   : > { %504 = vst [vmem:[#allocation3 + $0x230] sm:$0xff] %v5050_v0  ;;  %505 = vst [vmem:[#allocation3 + $0x238] sm:$0x1] %v5050_v0  ;;  %v546_v62 = vld [vmem:[%s5364_s29 + $0x20] sm:$0xff]  ;;  %4459 = vmatprep.subr.bf16.mxu1 %v5488_v29  ;;  %v5553_v1 = vld [vmem:[#allocation7 + $0x8] ss:$0 sm:$0xff]  ;;  %v5559_v3 = vmul.f32 %v5476_v22, %v573_v53  ;;  %v5562_v4 = vmul.f32 %v5476_v22, %v608_v57  ;;  %v5565_v5 = vmul.f32 %v5480_v25, %v608_v57 }
  0xe1   : > { %507 = vst [vmem:[#allocation3 + $0x27] sm:$0x1] %v5050_v0  ;;  %508 = vst [vmem:[#allocation3 + $0x47] sm:$0x1] %v5050_v0  ;;  %v547_v6 = vld [vmem:[%s5364_s29 + $0x28] sm:$0xff]  ;;  %v5573_v10 = vmul.f32 %v5476_v22, %v609_v59  ;;  %v5576_v11 = vmul.f32 %v5480_v25, %v609_v59  ;;  %v5580_v12 = vmul.f32 %v5490_v30, %v5542_v60  ;;  %s5051_s21 = smov [#allocation15]  }
  0xe2   : > { %509 = vst [vmem:[#allocation3 + $0x67] sm:$0x1] %v5050_v0  ;;  %510 = vst [vmem:[#allocation3 + $0x87] sm:$0x1] %v5050_v0  ;;  %v5584_v13 = vmul.f32 %v5490_v30, %v5544_v61  ;;  %4428 = vmatpush3.bf16.msra.mxu0 %v4723_v28  ;;  %v5608_v45 = vmax.f32 %v547_v6, 0.0  ;;  %s4964_s22 = sshll.u32 %s5051_s21, 4  ;;  %s4965_s22 = int_to_ptr.vmem [resolvable:$false] %s4964_s22 }
  0xe3   : > { %511 = vst [vmem:[#allocation3 + $0xa7] sm:$0x1] %v5050_v0  ;;  %512 = vst [vmem:[#allocation3 + $0xc7] sm:$0x1] %v5050_v0  ;;  %4460 = vmatpush3.bf16.msra.mxu1 %v5488_v29  ;;  %4429 = vmatprep.subr.bf16.mxu0 %v5513_v41  ;;  %s4966_s9 = scalar_lea.vmem %s4965_s22, 8192  ;;  %p4967_p13 = scmp.lt.s32.totalorder %s8541_s1, %s4965_s22 }
  0xe4   : > { %513 = vst [vmem:[#allocation3 + $0xe7] sm:$0x1] %v5050_v0  ;;  %514 = vst [vmem:[#allocation3 + $0x107] sm:$0x1] %v5050_v0  ;;  %4461 = vmatprep.subr.bf16.mxu1 %v5532_v50 }
  0xe5   : > { %515 = vst [vmem:[#allocation3 + $0x127] sm:$0x1] %v5050_v0  ;;  %516 = vst [vmem:[#allocation3 + $0x147] sm:$0x1] %v5050_v0 }
  0xe6   : > { %517 = vst [vmem:[#allocation3 + $0x167] sm:$0x1] %v5050_v0  ;;  %518 = vst [vmem:[#allocation3 + $0x187] sm:$0x1] %v5050_v0  ;;  %4430 = vmatpush3.bf16.msra.mxu0 %v5513_v41 }
  0xe7   : > { %519 = vst [vmem:[#allocation3 + $0x1a7] sm:$0x1] %v5050_v0  ;;  %520 = vst [vmem:[#allocation3 + $0x1c7] sm:$0x1] %v5050_v0  ;;  %4462 = vmatpush3.bf16.msra.mxu1 %v5532_v50 }
  0xe8   : > { %521 = vst [vmem:[#allocation3 + $0x1e7] sm:$0x1] %v5050_v0  ;;  %522 = vst [vmem:[#allocation3 + $0x207] sm:$0x1] %v5050_v0 }
  0xe9   : > { %525 = vst [vmem:[#allocation3 + $0x38] sm:$0x1] %v5050_v0  ;;  %526 = vst [vmem:[#allocation3 + $0x58] sm:$0x1] %v5050_v0 }
  0xea   : > { %527 = vst [vmem:[#allocation3 + $0x78] sm:$0x1] %v5050_v0  ;;  %528 = vst [vmem:[#allocation3 + $0x98] sm:$0x1] %v5050_v0 }
  0xeb   : > { %529 = vst [vmem:[#allocation3 + $0xb8] sm:$0x1] %v5050_v0  ;;  %530 = vst [vmem:[#allocation3 + $0xd8] sm:$0x1] %v5050_v0 }
  0xec   : > { %531 = vst [vmem:[#allocation3 + $0xf8] sm:$0x1] %v5050_v0  ;;  %532 = vst [vmem:[#allocation3 + $0x118] sm:$0x1] %v5050_v0 }
  0xed   : > { %533 = vst [vmem:[#allocation3 + $0x138] sm:$0x1] %v5050_v0  ;;  %534 = vst [vmem:[#allocation3 + $0x158] sm:$0x1] %v5050_v0 }
  0xee   : > { %535 = vst [vmem:[#allocation3 + $0x178] sm:$0x1] %v5050_v0  ;;  %536 = vst [vmem:[#allocation3 + $0x198] sm:$0x1] %v5050_v0 }
  0xef   : > { %537 = vst [vmem:[#allocation3 + $0x1b8] sm:$0x1] %v5050_v0  ;;  %538 = vst [vmem:[#allocation3 + $0x1d8] sm:$0x1] %v5050_v0 }
  0xf0   : > { %539 = vst [vmem:[#allocation3 + $0x1f8] sm:$0x1] %v5050_v0  ;;  %540 = vst [vmem:[#allocation3 + $0x218] sm:$0x1] %v5050_v0 }
  0xf1   : > { %461 = vst [vmem:[#allocation2 + $0x7] sm:$0x1] %v5050_v0  ;;  %479 = vst [vmem:[#allocation2 + $0x18] sm:$0x1] %v5050_v0 }
  0xf2   : > { %478 = vst [vmem:[#allocation2 + $0x227] sm:$0x1] %v5050_v0  ;;  %496 = vst [vmem:[#allocation2 + $0x238] sm:$0x1] %v5050_v0 }
  0xf3   : > { %506 = vst [vmem:[#allocation3 + $0x7] sm:$0x1] %v5050_v0  ;;  %523 = vst [vmem:[#allocation3 + $0x227] sm:$0x1] %v5050_v0 }
  0xf4   : > { %524 = vst [vmem:[#allocation3 + $0x18] sm:$0x1] %v5050_v0  ;;  %541 = vst [vmem:[#allocation3 + $0x238] sm:$0x1] %v5050_v0  ;;  %v5551_v0 = vld [vmem:[#allocation7 + $0x5] ss:$0 sm:$0xff] }
  0xf5   : > { %8701 = vst [vmem:[#allocation21_spill] sm:$0xff] %v5476_v22  ;;  %575 = vst [vmem:[#allocation2 + $0x28] sm:$0xff] %v558_v17 }
  0xf6   : > { %576 = vst [vmem:[#allocation2 + $0x30] sm:$0xff] %v559_v18  ;;  %577 = vst [vmem:[#allocation2 + $0x48] sm:$0xff] %v560_v19 }
  0xf7   : > { %578 = vst [vmem:[#allocation2 + $0x50] sm:$0xff] %v561_v21  ;;  %8702 = vst [vmem:[#allocation22_spill] sm:$0xff] %v5530_v49  ;;  %v5592_v21 = vmax.f32 %v546_v62, 0.0 }
  0xf8   : > { %v651_v23 = vld [vmem:[#allocation2 + $0x7] sm:$0xff]  ;;  %v892_v39 = vld [vmem:[#allocation2 + $0x11] sm:$0xff]  ;;  %8703 = vst [vmem:[#allocation23_spill] sm:$0xff] %v5548_v63  ;;  %589 = vst [vmem:[#allocation2 + $0x108] sm:$0xff] %v572_v52 }
  0xf9   : > { %v5483_v26 = vmul.f32 %v5474_v20, %v651_v23  ;;  %v5535_v51 = vmul.f32 %v5478_v24, %v892_v39  ;;  %590 = vst [vmem:[#allocation2 + $0x110] sm:$0xff] %v573_v53  ;;  %625 = vst [vmem:[#allocation2 + $0x128] sm:$0xff] %v608_v57 }
  0xfa   : > { %8704 = vst [vmem:[#allocation24_spill] sm:$0xff] %v5562_v4  ;;  %626 = vst [vmem:[#allocation2 + $0x130] sm:$0xff] %v609_v59  ;;  %v5635_v59 = vmul.f32 %v5490_v30, %v5592_v21 }
  0xfb   : > { %627 = vst [vmem:[#allocation2 + $0x148] sm:$0xff] %v5542_v60  ;;  %628 = vst [vmem:[#allocation2 + $0x150] sm:$0xff] %v5544_v61 }
  0xfc   : > { %v653_v7 = vld [vmem:[#allocation2 + $0x27] sm:$0xff]  ;;  %8706 = vst [vmem:[#allocation26_spill] sm:$0xff] %v5573_v10  ;;  %8708 = vst [vmem:[#allocation28_spill] sm:$0xff] %v5592_v21 }
  0xfd   : > { %v654_v8 = vld [vmem:[#allocation2 + $0x2f] sm:$0xff]  ;;  %v5568_v9 = vld [vmem:[#allocation2 + $0x47] sm:$0xff]  ;;  %v695_v15 = vmul.f32 %v5515_v42, %v653_v7  ;;  %8710 = vst [vmem:[#allocation30_spill] sm:$0xff] %v5608_v45  ;;  %579 = vst [vmem:[#allocation2 + $0x68] sm:$0xff] %v5592_v21  ;;  %v677_v54 = vmul.f32 %v5474_v20, %v653_v7 }
  0xfe   : > { %8705 = vst [vmem:[#allocation25_spill] sm:$0xff] %v5568_v9  ;;  %v5586_v14 = vld [vmem:[#allocation2 + $0x4f] sm:$0xff]  ;;  %v696_v16 = vmul.f32 %v5515_v42, %v654_v8  ;;  %v731_v17 = vmul.f32 %v5540_v58, %v5568_v9  ;;  %580 = vst [vmem:[#allocation2 + $0x70] sm:$0xff] %v5608_v45 }
  0xff   : > { %8707 = vst [vmem:[#allocation27_spill] sm:$0xff] %v5586_v14  ;;  %v893_v18 = vld [vmem:[#allocation2 + $0x29] sm:$0xff]  ;;  %v894_v19 = vld [vmem:[#allocation2 + $0x31] sm:$0xff]  ;;  %v732_v23 = vmul.f32 %v5540_v58, %v5586_v14  ;;  %v711_v29 = vadd.f32 %v695_v15, %v5483_v26  ;;  %v678_v26 = vmul.f32 %v5474_v20, %v654_v8  ;;  %v698_v57 = vmul.f32 %v5515_v42, %v5586_v14 }
 0x100   : > { %v5598_v28 = vld [vmem:[#allocation2 + $0x49] sm:$0xff]  ;;  %v5600_v34 = vld [vmem:[#allocation2 + $0x51] sm:$0xff]  ;;  %v5603_v38 = vmul.f32 %v5478_v24, %v894_v19  ;;  %v5606_v39 = vmul.f32 %v5551_v0, %v893_v18  ;;  %v712_v46 = vadd.f32 %v696_v16, %v5518_v43  ;;  %v5614_v47 = vmul.f32 %v5551_v0, %v894_v19 }
 0x101   : > { %8709 = vst [vmem:[#allocation29_spill] sm:$0xff] %v5598_v28  ;;  %v5618_v52 = vmul.f32 %v5553_v1, %v5598_v28  ;;  %v5623_v53 = vmul.f32 %v5553_v1, %v5600_v34  ;;  %v697_v43 = vmul.f32 %v5515_v42, %v5568_v9  ;;  %v747_v55 = vadd.f32 %v731_v17, %v711_v29  ;;  %v1228_v62 = vld [vmem:[#allocation2 + $0x107] sm:$0xff]  ;;  %v1229_v6 = vld [vmem:[#allocation2 + $0x10f] sm:$0xff] }
 0x102   : > { %v748_v56 = vadd.f32 %v732_v23, %v712_v46  ;;  %v5638_v7 = vld [vmem:[#allocation2 + $0x127] sm:$0xff]  ;;  %v5642_v15 = vmul.f32 %v5490_v30, %v5608_v45  ;;  %v5645_v41 = vmul.f32 %v5478_v24, %v893_v18  ;;  %v5649_v16 = vmul.f32 %v5551_v0, %v5598_v28  ;;  %v5653_v19 = vld [vmem:[#allocation2 + $0x12f] sm:$0xff] }
 0x103   : > { %v713_v8 = vadd.f32 %v697_v43, %v677_v54  ;;  %v803_v17 = vadd.f32 %v5486_v27, %v747_v55  ;;  %v5655_v23 = vld [vmem:[#allocation2 + $0x147] sm:$0xff]  ;;  %v5657_v29 = vld [vmem:[#allocation2 + $0x14f] sm:$0xff]  ;;  %v1248_v46 = vmul.f32 %v5474_v20, %v1228_v62  ;;  %v1249_v54 = vmul.f32 %v5474_v20, %v1229_v6 }
 0x104   : > { %8711 = vst [vmem:[#allocation31_spill] sm:$0xff] %v5649_v16  ;;  %v804_v50 = vadd.f32 %v5486_v27, %v748_v56  ;;  %v1264_v18 = vmul.f32 %v5515_v42, %v5638_v7  ;;  %v1265_v43 = vmul.f32 %v5515_v42, %v5653_v19  ;;  %v1296_v55 = vmul.f32 %v5540_v58, %v5655_v23  ;;  %v1444_v56 = vld [vmem:[#allocation2 + $0x109] sm:$0xff]  ;;  %v1445_v63 = vld [vmem:[#allocation2 + $0x111] sm:$0xff] }
 0x105   : > { %v1297_v27 = vmul.f32 %v5540_v58, %v5657_v29  ;;  %v5669_v49 = vld [vmem:[#allocation2 + $0x129] sm:$0xff]  ;;  %v839_v62 = vadd.f32 %v5499_v33, %v803_v17  ;;  %v1447_v22 = vld [vmem:[#allocation2 + $0x131] sm:$0xff]  ;;  %v1464_v45 = vmul.f32 %v5478_v24, %v1444_v56  ;;  %v1465_v4 = vmul.f32 %v5478_v24, %v1445_v63 }
 0x106   : > { %v840_v6 = vadd.f32 %v5502_v35, %v804_v50  ;;  %v5673_v10 = vld [vmem:[#allocation2 + $0x149] sm:$0xff]  ;;  %v5675_v28 = vld [vmem:[#allocation2 + $0x151] sm:$0xff]  ;;  %v1280_v21 = vadd.f32 %v1264_v18, %v1248_v46  ;;  %v1281_v14 = vadd.f32 %v1265_v43, %v1249_v54  ;;  %v5680_v9 = vmul.f32 %v5478_v24, %v1447_v22 }
 0x107   : > { %8712 = vst [vmem:[#allocation32_spill] sm:$0xff] %v5673_v10  ;;  %v1496_v16 = vmul.f32 %v5551_v0, %v5669_v49  ;;  %v5684_v33 = vld [vmem:[#allocation2 + $0x67] sm:$0xff]  ;;  %v875_v35 = vadd.f32 %v5505_v36, %v839_v62  ;;  %v1497_v50 = vmul.f32 %v5551_v0, %v1447_v22  ;;  %v1528_v63 = vmul.f32 %v5553_v1, %v5673_v10  ;;  %v5691_v46 = vld [vmem:[#allocation2 + $0x6f] sm:$0xff] }
 0x108   : > { %8713 = vst [vmem:[#allocation33_spill] sm:$0xff] %v5680_v9  ;;  %v876_v17 = vadd.f32 %v5508_v37, %v840_v6  ;;  %8714 = vst [vmem:[#allocation34_spill] sm:$0xff] %v5691_v46  ;;  %v5693_v54 = vld [vmem:[#allocation2 + $0x69] sm:$0xff]  ;;  %v1312_v18 = vadd.f32 %v1296_v55, %v1280_v21  ;;  %v1313_v43 = vadd.f32 %v1297_v27, %v1281_v14  ;;  %v5703_v6 = vld [vmem:[#allocation2 + $0x71] sm:$0xff] }
 0x109   : > { %8715 = vst [vmem:[#allocation35_spill] sm:$0xff] %v5693_v54  ;;  %v1529_v56 = vmul.f32 %v5553_v1, %v5675_v28  ;;  %v714_v9 = vadd.f32 %v698_v57, %v678_v26  ;;  %v931_v36 = vadd.f32 %v5521_v44, %v875_v35  ;;  %v733_v22 = vmul.f32 %v5540_v58, %v5684_v33  ;;  %v4190_v10 = vld [vmem:[%s5364_s29 + $0xa0] sm:$0xff]  ;;  %v4191_v35 = vld [vmem:[%s5364_s29 + $0xa8] sm:$0xff] }
 0x10a   : > { %v932_v37 = vadd.f32 %v5535_v51, %v876_v17  ;;  %v734_v62 = vmul.f32 %v5540_v58, %v5691_v46  ;;  %8716 = vst [vmem:[#allocation36_spill] sm:$0xff] %v5703_v6  ;;  %v1364_v14 = vadd.f32 %v5556_v2, %v1312_v18  ;;  %v1365_v21 = vadd.f32 %v5559_v3, %v1313_v43 }
 0x10b   : > { %v954_v26 = vmul.f32 %v5551_v0, %v5600_v34  ;;  %v989_v44 = vmul.f32 %v5553_v1, %v5693_v54  ;;  %v967_v51 = vadd.f32 %v5606_v39, %v931_v36  ;;  %v749_v55 = vadd.f32 %v733_v22, %v713_v8 }
 0x10c   : > { %v968_v57 = vadd.f32 %v5614_v47, %v932_v37  ;;  %v750_v27 = vadd.f32 %v734_v62, %v714_v9  ;;  %v1396_v17 = vadd.f32 %v5565_v5, %v1364_v14  ;;  %v1397_v46 = vadd.f32 %v5576_v11, %v1365_v21 }
 0x10d   : > { %v990_v2 = vmul.f32 %v5553_v1, %v5703_v6  ;;  %v5719_v3 = vmax.f32 %v4190_v10, 0.0  ;;  %v1003_v18 = vadd.f32 %v5618_v52, %v967_v51  ;;  %v805_v39 = vadd.f32 %v5493_v31, %v749_v55 }
 0x10e   : > { %v1004_v43 = vadd.f32 %v5623_v53, %v968_v57  ;;  %v806_v47 = vadd.f32 %v5496_v32, %v750_v27  ;;  %v1428_v9 = vadd.f32 %v5580_v12, %v1396_v17  ;;  %v1429_v5 = vadd.f32 %v5584_v13, %v1397_v46 }
 0x10f   : > { %8717 = vst [vmem:[#allocation37_spill] sm:$0xff] %v5719_v3  ;;  %v5727_v8 = vmax.f32 %v4191_v35, 0.0  ;;  %629 = vst [vmem:[#allocation2 + $0x168] sm:$0xff] %v5719_v3  ;;  %v1250_v10 = vmul.f32 %v5474_v20, %v5638_v7  ;;  %v841_v52 = vadd.f32 %v5511_v40, %v805_v39  ;;  %v1251_v32 = vmul.f32 %v5474_v20, %v5653_v19  ;;  %v548_v7 = vld [vmem:[%s5364_s29 + $0x30] sm:$0xff] }
 0x110   : > { %v1019_v11 = vpack.c.bf16 %v1004_v43, %v1003_v18  ;;  %v842_v31 = vadd.f32 %v5527_v48, %v806_v47  ;;  %v1480_v53 = vadd.f32 %v1464_v45, %v1428_v9  ;;  %v1481_v12 = vadd.f32 %v1465_v4, %v1429_v5  ;;  %v549_v45 = vld [vmem:[%s5364_s29 + $0x38] sm:$0xff]  ;;  %v8721_v43 = vld [vmem:[#allocation25_spill] sm:$0xff] }
 0x111   : > { %630 = vst [vmem:[#allocation2 + $0x170] sm:$0xff] %v5727_v8  ;;  %v1266_v13 = vmul.f32 %v5515_v42, %v5655_v23  ;;  %v1267_v46 = vmul.f32 %v5515_v42, %v5657_v29  ;;  %v877_v36 = vadd.f32 %v5635_v59, %v841_v52  ;;  %v1382_v48 = vmul.f32 %v5480_v25, %v5542_v60 }
 0x112   : > { %4431 = vmatprep.mubr.bf16.mxu0 %v1019_v11  ;;  %v878_v40 = vadd.f32 %v5642_v15, %v842_v31  ;;  %v1383_v4 = vmul.f32 %v5480_v25, %v5544_v61  ;;  %v1512_v19 = vadd.f32 %v1496_v16, %v1480_v53  ;;  %v1513_v37 = vadd.f32 %v1497_v50, %v1481_v12  ;;  %v8718_v16 = vld [vmem:[#allocation32_spill] sm:$0xff]  ;;  %v8723_v11 = vld [vmem:[#allocation27_spill] sm:$0xff] }
 0x113   : > { %v1282_v22 = vadd.f32 %v1266_v13, %v1250_v10  ;;  %v1283_v62 = vadd.f32 %v1267_v46, %v1251_v32  ;;  %v933_v14 = vadd.f32 %v5645_v41, %v877_v36  ;;  %v1414_v59 = vmul.f32 %v5490_v30, %v5719_v3  ;;  %v8719_v41 = vld [vmem:[#allocation31_spill] sm:$0xff]  ;;  %v4193_v13 = vld [vmem:[%s5364_s29 + $0xb8] sm:$0xff] }
 0x114   : > { %v934_v21 = vadd.f32 %v5603_v38, %v878_v40  ;;  %v5755_v15 = vmul.f32 %v5490_v30, %v5727_v8  ;;  %v1544_v51 = vadd.f32 %v1528_v63, %v1512_v19  ;;  %v1545_v57 = vadd.f32 %v1529_v56, %v1513_v37  ;;  %v4192_v12 = vld [vmem:[%s5364_s29 + $0xb0] sm:$0xff] }
 0x115   : > { %v5759_v55 = vmul.f32 %v5478_v24, %v5669_v49  ;;  %v5763_v50 = vmul.f32 %v5551_v0, %v8718_v16  ;;  %v969_v27 = vadd.f32 %v8719_v41, %v933_v14  ;;  %v5770_v17 = vmul.f32 %v5551_v0, %v5675_v28 }
 0x116   : > { %v970_v38 = vadd.f32 %v954_v26, %v934_v21  ;;  %v5766_v35 = vld [vmem:[#allocation2 + $0x167] sm:$0xff]  ;;  %v5772_v18 = vmax.f32 %v548_v7, 0.0  ;;  %v1560_v63 = vpack.c.bf16 %v1545_v57, %v1544_v51  ;;  %v5776_v56 = vmax.f32 %v549_v45, 0.0  ;;  %v8725_v45 = vld [vmem:[#allocation28_spill] sm:$0xff] }
 0x117   : > { %8720 = vst [vmem:[#allocation32_spill] sm:$0xff] %v5766_v35  ;;  %v1298_v49 = vmul.f32 %v5540_v58, %v5766_v35  ;;  %v679_v39 = vmul.f32 %v5474_v20, %v8721_v43  ;;  %v1005_v26 = vadd.f32 %v989_v44, %v969_v27  ;;  %v680_v52 = vmul.f32 %v5474_v20, %v8723_v11  ;;  %v8724_v7 = vld [vmem:[#allocation34_spill] sm:$0xff] }
 0x118   : > { %v1006_v47 = vadd.f32 %v990_v2, %v970_v38  ;;  %v5780_v9 = vld [vmem:[#allocation2 + $0x16f] sm:$0xff]  ;;  %581 = vst [vmem:[#allocation2 + $0x88] sm:$0xff] %v5772_v18  ;;  %v699_v31 = vmul.f32 %v5515_v42, %v5684_v33  ;;  %4463 = vmatprep.mubr.bf16.mxu1 %v1560_v63  ;;  %582 = vst [vmem:[#allocation2 + $0x90] sm:$0xff] %v5776_v56  ;;  %v700_v36 = vmul.f32 %v5515_v42, %v8724_v7  ;;  %v8728_v38 = vld [vmem:[#allocation29_spill] sm:$0xff] }
 0x119   : > { %8722 = vst [vmem:[#allocation31_spill] sm:$0xff] %v5780_v9  ;;  %v5782_v5 = vld [vmem:[#allocation2 + $0x169] sm:$0xff]  ;;  %v5784_v10 = vld [vmem:[#allocation2 + $0x171] sm:$0xff]  ;;  %v1299_v32 = vmul.f32 %v5540_v58, %v5780_v9  ;;  %v1314_v44 = vadd.f32 %v1298_v49, %v1282_v22  ;;  %v827_v19 = vmul.f32 %v5480_v25, %v8725_v45  ;;  %v863_v57 = vmul.f32 %v5490_v30, %v5772_v18 }
 0x11a   : > { %v1530_v2 = vmul.f32 %v5553_v1, %v5782_v5  ;;  %v5797_v53 = vmul.f32 %v5553_v1, %v5784_v10  ;;  %v1020_v46 = vpack.c.bf16 %v1006_v47, %v1005_v26  ;;  %v715_v40 = vadd.f32 %v699_v31, %v679_v39  ;;  %v8726_v22 = vld [vmem:[#allocation24_spill] sm:$0xff]  ;;  %v8727_v21 = vld [vmem:[#allocation30_spill] sm:$0xff] }
 0x11b   : > { %v1315_v37 = vadd.f32 %v1299_v32, %v1283_v62  ;;  %v1366_v14 = vadd.f32 %v8726_v22, %v1314_v44  ;;  %v828_v51 = vmul.f32 %v5480_v25, %v8727_v21  ;;  %v716_v41 = vadd.f32 %v700_v36, %v680_v52  ;;  %v8729_v49 = vld [vmem:[#allocation26_spill] sm:$0xff] }
 0x11c   : > { %4432 = vmatmul.mubr.bf16.vlgmr.msra.gmra.mrb[0].mxu0 %v1020_v46  ;;  %v5813_v27 = vmul.f32 %v5490_v30, %v5776_v56  ;;  %v5817_v63 = vmul.f32 %v5478_v24, %v8728_v38  ;;  %v5821_v62 = vmul.f32 %v5478_v24, %v5600_v34  ;;  %v5826_v26 = vmul.f32 %v5551_v0, %v5693_v54 }
 0x11d   : > { %v1367_v43 = vadd.f32 %v8729_v49, %v1315_v37  ;;  %v1398_v39 = vadd.f32 %v1382_v48, %v1366_v14  ;;  %v5830_v47 = vmul.f32 %v5551_v0, %v5703_v6  ;;  %v5832_v11 = vmax.f32 %v4192_v12, 0.0  ;;  %v551_v6 = vld [vmem:[%s5364_s29 + $0x48] sm:$0xff] }
 0x11e   : > { %v5834_v52 = vmax.f32 %v4193_v13, 0.0  ;;  %v1252_v31 = vmul.f32 %v5474_v20, %v5655_v23  ;;  %v1253_v34 = vmul.f32 %v5474_v20, %v5657_v29  ;;  %v1268_v46 = vmul.f32 %v5515_v42, %v5766_v35 }
 0x11f   : > { %v1399_v32 = vadd.f32 %v1383_v4, %v1367_v43  ;;  %v1430_v48 = vadd.f32 %v1414_v59, %v1398_v39  ;;  %v5840_v44 = vld [vmem:[#allocation2 + $0x87] sm:$0xff]  ;;  %v1269_v12 = vmul.f32 %v5515_v42, %v5780_v9  ;;  %v5846_v36 = vld [vmem:[#allocation2 + $0x8f] sm:$0xff]  ;;  %631 = vst [vmem:[#allocation2 + $0x188] sm:$0xff] %v5832_v11  ;;  %v5862_v22 = vmul.f32 %v5480_v25, %v5719_v3 }
 0x120   : > { %v735_v13 = vmul.f32 %v5540_v58, %v5840_v44  ;;  %v5850_v23 = vld [vmem:[#allocation2 + $0x89] sm:$0xff]  ;;  %v5852_v29 = vld [vmem:[#allocation2 + $0x91] sm:$0xff]  ;;  %632 = vst [vmem:[#allocation2 + $0x190] sm:$0xff] %v5834_v52  ;;  %v8732_v4 = vld [vmem:[#allocation21_spill] sm:$0xff]  ;;  %v736_v49 = vmul.f32 %v5540_v58, %v5846_v36 }
 0x121   : > { %8730 = vst [vmem:[#allocation25_spill] sm:$0xff] %v5850_v23  ;;  %8731 = vst [vmem:[#allocation27_spill] sm:$0xff] %v5852_v29  ;;  %v1352_v59 = vmul.f32 %v8732_v4, %v5542_v60  ;;  %v1353_v37 = vmul.f32 %v8732_v4, %v5544_v61  ;;  %v1431_v14 = vadd.f32 %v5755_v15, %v1399_v32  ;;  %v550_v39 = vld [vmem:[%s5364_s29 + $0x40] sm:$0xff] }
 0x122   : > { %8733 = vst [vmem:[#allocation34_spill] sm:$0xff] %v5862_v22  ;;  %v1482_v38 = vadd.f32 %v5759_v55, %v1430_v48  ;;  %v991_v43 = vmul.f32 %v5553_v1, %v5850_v23  ;;  %v751_v9 = vadd.f32 %v735_v13, %v715_v40  ;;  %v992_v60 = vmul.f32 %v5553_v1, %v5852_v29  ;;  %v8734_v3 = vld [vmem:[#allocation33_spill] sm:$0xff]  ;;  %v8735_v48 = vld [vmem:[#allocation22_spill] sm:$0xff] }
 0x123   : > { %v1284_v61 = vadd.f32 %v1268_v46, %v1252_v31  ;;  %v1285_v35 = vadd.f32 %v1269_v12, %v1253_v34  ;;  %v1483_v54 = vadd.f32 %v8734_v3, %v1431_v14  ;;  %v752_v32 = vadd.f32 %v736_v49, %v716_v41 }
 0x124   : > { %v1514_v15 = vadd.f32 %v5763_v50, %v1482_v38  ;;  %v1385_v55 = vmul.f32 %v5480_v25, %v5727_v8  ;;  %v807_v22 = vadd.f32 %v8735_v48, %v751_v9  ;;  %v1416_v23 = vmul.f32 %v5490_v30, %v5832_v11  ;;  %v8736_v50 = vld [vmem:[#allocation23_spill] sm:$0xff] }
 0x125   : > { %v1417_v40 = vmul.f32 %v5490_v30, %v5834_v52  ;;  %v5885_v31 = vmul.f32 %v5478_v24, %v8718_v16  ;;  %v1515_v3 = vadd.f32 %v5770_v17, %v1483_v54  ;;  %v808_v41 = vadd.f32 %v8736_v50, %v752_v32 }
 0x126   : > { %v1546_v34 = vadd.f32 %v1530_v2, %v1514_v15  ;;  %v5891_v46 = vmul.f32 %v5478_v24, %v5675_v28  ;;  %v843_v9 = vadd.f32 %v827_v19, %v807_v22  ;;  %v5895_v12 = vmul.f32 %v5551_v0, %v5782_v5  ;;  %v5904_v2 = vld [vmem:[#allocation2 + $0x187] sm:$0xff] }
 0x127   : > { %v5899_v13 = vmul.f32 %v5551_v0, %v5784_v10  ;;  %v5901_v16 = vmax.f32 %v550_v39, 0.0  ;;  %v1547_v54 = vadd.f32 %v5797_v53, %v1515_v3  ;;  %v844_v17 = vadd.f32 %v828_v51, %v808_v41  ;;  %v5906_v14 = vld [vmem:[#allocation2 + $0x18f] sm:$0xff] }
 0x128   : > { %v5908_v28 = vld [vmem:[#allocation2 + $0x189] sm:$0xff]  ;;  %v5910_v19 = vmax.f32 %v551_v6, 0.0  ;;  %v681_v22 = vmul.f32 %v5474_v20, %v5684_v33  ;;  %v879_v38 = vadd.f32 %v863_v57, %v843_v9  ;;  %v1300_v49 = vmul.f32 %v5540_v58, %v5904_v2  ;;  %v5918_v53 = vld [vmem:[#allocation2 + $0x191] sm:$0xff] }
 0x129   : > { %v1301_v39 = vmul.f32 %v5540_v58, %v5906_v14  ;;  %v5922_v51 = vmul.f32 %v5553_v1, %v5908_v28  ;;  %583 = vst [vmem:[#allocation2 + $0xa8] sm:$0xff] %v5901_v16  ;;  %v1561_v6 = vpack.c.bf16 %v1547_v54, %v1546_v34  ;;  %v880_v15 = vadd.f32 %v5813_v27, %v844_v17 }
 0x12a   : > { %v1533_v33 = vmul.f32 %v5553_v1, %v5918_v53  ;;  %584 = vst [vmem:[#allocation2 + $0xb0] sm:$0xff] %v5910_v19  ;;  %v682_v57 = vmul.f32 %v5474_v20, %v8724_v7  ;;  %v935_v32 = vadd.f32 %v5817_v63, %v879_v38  ;;  %v1316_v48 = vadd.f32 %v1300_v49, %v1284_v61  ;;  %v8737_v49 = vld [vmem:[#allocation34_spill] sm:$0xff] }
 0x12b   : > { %v1317_v3 = vadd.f32 %v1301_v39, %v1285_v35  ;;  %v701_v50 = vmul.f32 %v5515_v42, %v5840_v44  ;;  %4464 = vmatmul.mubr.bf16.vlgmr.msra.gmra.mrb[0].mxu1 %v1561_v6  ;;  %v936_v34 = vadd.f32 %v5821_v62, %v880_v15  ;;  %v702_v27 = vmul.f32 %v5515_v42, %v5846_v36  ;;  %v8739_v15 = vld [vmem:[#allocation36_spill] sm:$0xff] }
 0x12c   : > { %v793_v41 = vmul.f32 %v8732_v4, %v8725_v45  ;;  %v794_v9 = vmul.f32 %v8732_v4, %v8727_v21  ;;  %v971_v7 = vadd.f32 %v5826_v26, %v935_v32  ;;  %v1368_v63 = vadd.f32 %v1352_v59, %v1316_v48  ;;  %v4194_v32 = vld [vmem:[%s5364_s29 + $0xc0] sm:$0xff] }
 0x12d   : > { %v1369_v35 = vadd.f32 %v1353_v37, %v1317_v3  ;;  %v717_v61 = vadd.f32 %v701_v50, %v681_v22  ;;  %v972_v54 = vadd.f32 %v5830_v47, %v936_v34  ;;  %v718_v17 = vadd.f32 %v702_v27, %v682_v57  ;;  %v8738_v22 = vld [vmem:[#allocation35_spill] sm:$0xff]  ;;  %v8741_v27 = vld [vmem:[#allocation25_spill] sm:$0xff] }
 0x12e   : > { %v829_v62 = vmul.f32 %v5480_v25, %v5772_v18  ;;  %v830_v38 = vmul.f32 %v5480_v25, %v5776_v56  ;;  %v1007_v45 = vadd.f32 %v991_v43, %v971_v7  ;;  %v1400_v39 = vadd.f32 %v8737_v49, %v1368_v63  ;;  %v4195_v43 = vld [vmem:[%s5364_s29 + $0xc8] sm:$0xff] }
 0x12f   : > { %v1401_v21 = vadd.f32 %v1385_v55, %v1369_v35  ;;  %v865_v26 = vmul.f32 %v5490_v30, %v5901_v16  ;;  %v1008_v59 = vadd.f32 %v992_v60, %v972_v54  ;;  %v866_v47 = vmul.f32 %v5490_v30, %v5910_v19 }
 0x130   : > { %v5950_v37 = vld [vmem:[#allocation2 + $0xa7] sm:$0xff]  ;;  %v921_v6 = vmul.f32 %v5478_v24, %v8738_v22  ;;  %v922_v57 = vmul.f32 %v5478_v24, %v8739_v15  ;;  %v1432_v48 = vadd.f32 %v1416_v23, %v1400_v39  ;;  %v957_v7 = vmul.f32 %v5551_v0, %v8741_v27  ;;  %v8742_v15 = vld [vmem:[#allocation32_spill] sm:$0xff] }
 0x131   : > { %v1433_v3 = vadd.f32 %v1417_v40, %v1401_v21  ;;  %v5960_v55 = vld [vmem:[#allocation2 + $0xaf] sm:$0xff]  ;;  %v737_v60 = vmul.f32 %v5540_v58, %v5950_v37  ;;  %v1021_v63 = vpack.c.bf16 %v1008_v59, %v1007_v45  ;;  %v958_v23 = vmul.f32 %v5551_v0, %v5852_v29 }
 0x132   : > { %v5964_v50 = vld [vmem:[#allocation2 + $0xa9] sm:$0xff]  ;;  %v5966_v34 = vld [vmem:[#allocation2 + $0xb1] sm:$0xff]  ;;  %v738_v35 = vmul.f32 %v5540_v58, %v5960_v55  ;;  %v1484_v54 = vadd.f32 %v5885_v31, %v1432_v48  ;;  %v5980_v45 = vmax.f32 %v4194_v32, 0.0  ;;  %v5982_v59 = vmax.f32 %v4195_v43, 0.0 }
 0x133   : > { %8740 = vst [vmem:[#allocation28_spill] sm:$0xff] %v5964_v50  ;;  %v993_v40 = vmul.f32 %v5553_v1, %v5964_v50  ;;  %v1485_v49 = vadd.f32 %v5891_v46, %v1433_v3  ;;  %v753_v39 = vadd.f32 %v737_v60, %v717_v61  ;;  %v994_v21 = vmul.f32 %v5553_v1, %v5966_v34  ;;  %v8743_v48 = vld [vmem:[#allocation31_spill] sm:$0xff] }
 0x134   : > { %4435 = vmatprep.mubr.bf16.mxu0 %v1021_v63  ;;  %v754_v22 = vadd.f32 %v738_v35, %v718_v17  ;;  %v1254_v29 = vmul.f32 %v5474_v20, %v8742_v15  ;;  %v1516_v27 = vadd.f32 %v5895_v12, %v1484_v54  ;;  %v1255_v46 = vmul.f32 %v5474_v20, %v8743_v48  ;;  %v8744_v12 = vld [vmem:[#allocation37_spill] sm:$0xff] }
 0x135   : > { %v1517_v50 = vadd.f32 %v5899_v13, %v1485_v49  ;;  %v809_v31 = vadd.f32 %v793_v41, %v753_v39  ;;  %633 = vst [vmem:[#allocation2 + $0x1a8] sm:$0xff] %v5980_v45  ;;  %634 = vst [vmem:[#allocation2 + $0x1b0] sm:$0xff] %v5982_v59  ;;  %v1270_v17 = vmul.f32 %v5515_v42, %v5904_v2  ;;  %v552_v49 = vld [vmem:[%s5364_s29 + $0x50] sm:$0xff] }
 0x136   : > { %v810_v61 = vadd.f32 %v794_v9, %v754_v22  ;;  %v1271_v32 = vmul.f32 %v5515_v42, %v5906_v14  ;;  %v1354_v13 = vmul.f32 %v8732_v4, %v8744_v12  ;;  %v1548_v41 = vadd.f32 %v5922_v51, %v1516_v27 }
 0x137   : > { %v1549_v43 = vadd.f32 %v1533_v33, %v1517_v50  ;;  %v845_v3 = vadd.f32 %v829_v62, %v809_v31  ;;  %v1355_v9 = vmul.f32 %v8732_v4, %v5727_v8  ;;  %v1286_v63 = vadd.f32 %v1270_v17, %v1254_v29  ;;  %v553_v33 = vld [vmem:[%s5364_s29 + $0x58] sm:$0xff] }
 0x138   : > { %v846_v60 = vadd.f32 %v830_v38, %v810_v61  ;;  %v1287_v35 = vadd.f32 %v1271_v32, %v1255_v46  ;;  %v1386_v54 = vmul.f32 %v5480_v25, %v5832_v11  ;;  %v1387_v15 = vmul.f32 %v5480_v25, %v5834_v52 }
 0x139   : > { %v1562_v39 = vpack.c.bf16 %v1549_v43, %v1548_v41  ;;  %v881_v22 = vadd.f32 %v865_v26, %v845_v3  ;;  %v6008_v51 = vmul.f32 %v5490_v30, %v5980_v45  ;;  %v6013_v8 = vmul.f32 %v5490_v30, %v5982_v59 }
 0x13a   : > { %v882_v62 = vadd.f32 %v866_v47, %v846_v60  ;;  %v6017_v29 = vmul.f32 %v5478_v24, %v5782_v5  ;;  %v6021_v38 = vmul.f32 %v5478_v24, %v5784_v10  ;;  %v6025_v50 = vmul.f32 %v5551_v0, %v5908_v28 }
 0x13b   : > { %4467 = vmatprep.mubr.bf16.mxu1 %v1562_v39  ;;  %v937_v26 = vadd.f32 %v921_v6, %v881_v22  ;;  %v6029_v47 = vmul.f32 %v5551_v0, %v5918_v53  ;;  %v6031_v27 = vmax.f32 %v552_v49, 0.0  ;;  %v6033_v48 = vmax.f32 %v553_v33, 0.0 }
 0x13c   : > { %v938_v31 = vadd.f32 %v922_v57, %v882_v62  ;;  %v683_v5 = vmul.f32 %v5474_v20, %v5840_v44  ;;  %v684_v10 = vmul.f32 %v5474_v20, %v5846_v36  ;;  %v6039_v46 = vld [vmem:[#allocation2 + $0x1a7] sm:$0xff]  ;;  %v6041_v61 = vld [vmem:[#allocation2 + $0x1af] sm:$0xff]  ;;  %v703_v57 = vmul.f32 %v5515_v42, %v5950_v37 }
 0x13d   : > { %v973_v6 = vadd.f32 %v957_v7, %v937_v26  ;;  %v6043_v17 = vld [vmem:[#allocation2 + $0x1a9] sm:$0xff]  ;;  %585 = vst [vmem:[#allocation2 + $0xc8] sm:$0xff] %v6031_v27  ;;  %v704_v32 = vmul.f32 %v5515_v42, %v5960_v55  ;;  %v795_v44 = vmul.f32 %v8732_v4, %v5772_v18  ;;  %v1302_v7 = vmul.f32 %v5540_v58, %v6039_v46  ;;  %v6056_v41 = vld [vmem:[#allocation2 + $0x1b1] sm:$0xff] }
 0x13e   : > { %8745 = vst [vmem:[#allocation24_spill] sm:$0xff] %v6043_v17  ;;  %v974_v36 = vadd.f32 %v958_v23, %v938_v31  ;;  %v1303_v12 = vmul.f32 %v5540_v58, %v6041_v61  ;;  %v6060_v43 = vmul.f32 %v5553_v1, %v6043_v17  ;;  %586 = vst [vmem:[#allocation2 + $0xd0] sm:$0xff] %v6033_v48  ;;  %v4196_v62 = vld [vmem:[%s5364_s29 + $0xd0] sm:$0xff] }
 0x13f   : > { %v1009_v3 = vadd.f32 %v993_v40, %v973_v6  ;;  %v6065_v18 = vmul.f32 %v5553_v1, %v6056_v41  ;;  %v719_v23 = vadd.f32 %v703_v57, %v683_v5  ;;  %v720_v60 = vadd.f32 %v704_v32, %v684_v10  ;;  %v8746_v6 = vld [vmem:[#allocation25_spill] sm:$0xff] }
 0x140   : > { %v1010_v49 = vadd.f32 %v994_v21, %v974_v36  ;;  %v1318_v39 = vadd.f32 %v1302_v7, %v1286_v63  ;;  %v1319_v22 = vadd.f32 %v1303_v12, %v1287_v35  ;;  %v796_v33 = vmul.f32 %v8732_v4, %v5776_v56  ;;  %v4197_v21 = vld [vmem:[%s5364_s29 + $0xd8] sm:$0xff]  ;;  %v8747_v4 = vld [vmem:[#allocation27_spill] sm:$0xff] }
 0x141   : > { %v831_v26 = vmul.f32 %v5480_v25, %v5901_v16  ;;  %v832_v31 = vmul.f32 %v5480_v25, %v5910_v19  ;;  %v867_v40 = vmul.f32 %v5490_v30, %v6031_v27  ;;  %v6078_v5 = vmul.f32 %v5490_v30, %v6033_v48  ;;  %v8748_v25 = vld [vmem:[#allocation28_spill] sm:$0xff] }
 0x142   : > { %v1022_v63 = vpack.c.bf16 %v1010_v49, %v1009_v3  ;;  %v1370_v35 = vadd.f32 %v1354_v13, %v1318_v39  ;;  %v1371_v10 = vadd.f32 %v1355_v9, %v1319_v22  ;;  %v6083_v56 = vmul.f32 %v5478_v24, %v8746_v6 }
 0x143   : > { %v6087_v57 = vmul.f32 %v5478_v24, %v8747_v4  ;;  %v6091_v32 = vmul.f32 %v5551_v0, %v8748_v25  ;;  %v6095_v30 = vmul.f32 %v5551_v0, %v5966_v34  ;;  %v6097_v36 = vmax.f32 %v4196_v62, 0.0  ;;  %v6135_v4 = vld [vmem:[#allocation7 + $0x1] ss:$0 sm:$0xff] }
 0x144   : > { %4436 = vmatmul.mubr.bf16.gmra.mrb[4].mxu0 %v1022_v63  ;;  %v1402_v13 = vadd.f32 %v1386_v54, %v1370_v35  ;;  %v1403_v9 = vadd.f32 %v1387_v15, %v1371_v10  ;;  %v6099_v7 = vld [vmem:[#allocation2 + $0xc7] sm:$0xff]  ;;  %v6101_v12 = vmax.f32 %v4197_v21, 0.0  ;;  %v1256_v24 = vmul.f32 %v5474_v20, %v5904_v2 }
 0x145   : > { %v6105_v3 = vld [vmem:[#allocation2 + $0xcf] sm:$0xff]  ;;  %v739_v49 = vmul.f32 %v5540_v58, %v6099_v7  ;;  %635 = vst [vmem:[#allocation2 + $0x1c8] sm:$0xff] %v6097_v36  ;;  %v1257_v54 = vmul.f32 %v5474_v20, %v5906_v14  ;;  %v1272_v15 = vmul.f32 %v5515_v42, %v6039_v46  ;;  %v1273_v2 = vmul.f32 %v5515_v42, %v6041_v61 }
 0x146   : > { %v6109_v39 = vld [vmem:[#allocation2 + $0xc9] sm:$0xff]  ;;  %v6111_v22 = vld [vmem:[#allocation2 + $0xd1] sm:$0xff]  ;;  %v1434_v62 = vadd.f32 %v6008_v51, %v1402_v13  ;;  %v1435_v21 = vadd.f32 %v6013_v8, %v1403_v9  ;;  %v740_v63 = vmul.f32 %v5540_v58, %v6105_v3  ;;  %636 = vst [vmem:[#allocation2 + $0x1d0] sm:$0xff] %v6101_v12  ;;  %v1356_v13 = vmul.f32 %v6135_v4, %v5832_v11 }
 0x147   : > { %v6126_v35 = vmul.f32 %v5553_v1, %v6109_v39  ;;  %v755_v20 = vadd.f32 %v739_v49, %v719_v23  ;;  %v6131_v14 = vmul.f32 %v5553_v1, %v6111_v22  ;;  %v1288_v10 = vadd.f32 %v1272_v15, %v1256_v24  ;;  %v6141_v49 = vld [vmem:[#allocation7 + $0x4] ss:$0 sm:$0xff]  ;;  %v6149_v15 = vld [vmem:[#allocation7 + $0x7] ss:$0 sm:$0xff] }
 0x148   : > { %v1289_v42 = vadd.f32 %v1273_v2, %v1257_v54  ;;  %v1486_v51 = vadd.f32 %v6017_v29, %v1434_v62  ;;  %v1487_v8 = vadd.f32 %v6021_v38, %v1435_v21  ;;  %v756_v6 = vadd.f32 %v740_v63, %v720_v60  ;;  %v6156_v62 = vld [vmem:[#allocation7 + $0x2] ss:$0 sm:$0xff] }
 0x149   : > { %v811_v9 = vadd.f32 %v795_v44, %v755_v20  ;;  %v1357_v23 = vmul.f32 %v6135_v4, %v5834_v52  ;;  %v1388_v24 = vmul.f32 %v6141_v49, %v5980_v45  ;;  %v1389_v29 = vmul.f32 %v6141_v49, %v5982_v59  ;;  %v554_v52 = vld [vmem:[%s5364_s29 + $0x60] sm:$0xff] }
 0x14a   : > { %v1518_v38 = vadd.f32 %v6025_v50, %v1486_v51  ;;  %v1519_v60 = vadd.f32 %v6029_v47, %v1487_v8  ;;  %v812_v54 = vadd.f32 %v796_v33, %v756_v6  ;;  %v1420_v11 = vmul.f32 %v6149_v15, %v6097_v36  ;;  %v555_v51 = vld [vmem:[%s5364_s29 + $0x68] sm:$0xff] }
 0x14b   : > { %v847_v44 = vadd.f32 %v831_v26, %v811_v9  ;;  %v1421_v2 = vmul.f32 %v6149_v15, %v6101_v12  ;;  %v1472_v21 = vmul.f32 %v6156_v62, %v5908_v28  ;;  %v6162_v50 = vmul.f32 %v6156_v62, %v5918_v53 }
 0x14c   : > { %v1550_v47 = vadd.f32 %v6060_v43, %v1518_v38  ;;  %v1551_v33 = vadd.f32 %v6065_v18, %v1519_v60  ;;  %v848_v63 = vadd.f32 %v832_v31, %v812_v54  ;;  %v6166_v20 = vld [vmem:[#allocation2 + $0x1c7] sm:$0xff]  ;;  %v6170_v26 = vmul.f32 %v5551_v0, %v6043_v17 }
 0x14d   : > { %8749 = vst [vmem:[#allocation30_spill] sm:$0xff] %v6166_v20  ;;  %v883_v8 = vadd.f32 %v867_v40, %v847_v44  ;;  %v6173_v6 = vld [vmem:[#allocation2 + $0x1cf] sm:$0xff]  ;;  %v1304_v28 = vmul.f32 %v5540_v58, %v6166_v20  ;;  %v6183_v43 = vmul.f32 %v5551_v0, %v6056_v41  ;;  %v6185_v18 = vmax.f32 %v554_v52, 0.0 }
 0x14e   : > { %v6177_v53 = vld [vmem:[#allocation2 + $0x1c9] sm:$0xff]  ;;  %v6179_v9 = vld [vmem:[#allocation2 + $0x1d1] sm:$0xff]  ;;  %v1563_v31 = vpack.c.bf16 %v1551_v33, %v1550_v47  ;;  %v884_v38 = vadd.f32 %v6078_v5, %v848_v63  ;;  %v1305_v40 = vmul.f32 %v5540_v58, %v6173_v6  ;;  %v6199_v0 = vmax.f32 %v555_v51, 0.0  ;;  %v6203_v58 = vld [vmem:[#allocation7] ss:$0 sm:$0xff] }
 0x14f   : > { %8750 = vst [vmem:[#allocation29_spill] sm:$0xff] %v6179_v9  ;;  %v6192_v60 = vmul.f32 %v5553_v1, %v6177_v53  ;;  %v939_v54 = vadd.f32 %v6083_v56, %v883_v8  ;;  %v1320_v44 = vadd.f32 %v1304_v28, %v1288_v10  ;;  %v6197_v17 = vmul.f32 %v5553_v1, %v6179_v9  ;;  %v6211_v33 = vld [vmem:[#allocation7 + $0x3] ss:$0 sm:$0xff] }
 0x150   : > { %587 = vst [vmem:[#allocation2 + $0xe8] sm:$0xff] %v6185_v18  ;;  %4468 = vmatmul.mubr.bf16.gmra.mrb[4].mxu1 %v1563_v31  ;;  %v940_v5 = vadd.f32 %v6087_v57, %v884_v38  ;;  %v1321_v52 = vadd.f32 %v1305_v40, %v1289_v42  ;;  %v685_v47 = vmul.f32 %v6203_v58, %v5950_v37  ;;  %588 = vst [vmem:[#allocation2 + $0xf0] sm:$0xff] %v6199_v0 }
 0x151   : > { %v686_v56 = vmul.f32 %v6203_v58, %v5960_v55  ;;  %v975_v10 = vadd.f32 %v6091_v32, %v939_v54  ;;  %v1372_v1 = vadd.f32 %v1356_v13, %v1320_v44  ;;  %v705_v57 = vmul.f32 %v6211_v33, %v6099_v7 }
 0x152   : > { %v706_v42 = vmul.f32 %v6211_v33, %v6105_v3  ;;  %v976_v63 = vadd.f32 %v6095_v30, %v940_v5  ;;  %v1373_v37 = vadd.f32 %v1357_v23, %v1321_v52  ;;  %v797_v55 = vmul.f32 %v6135_v4, %v5901_v16  ;;  %v4198_v23 = vld [vmem:[%s5364_s29 + $0xe0] sm:$0xff] }
 0x153   : > { %v798_v32 = vmul.f32 %v6135_v4, %v5910_v19  ;;  %v1011_v13 = vadd.f32 %v6126_v35, %v975_v10  ;;  %v1404_v51 = vadd.f32 %v1388_v24, %v1372_v1  ;;  %v721_v8 = vadd.f32 %v705_v57, %v685_v47  ;;  %v4199_v24 = vld [vmem:[%s5364_s29 + $0xe8] sm:$0xff]  ;;  %v6242_v52 = vld [vmem:[#allocation7 + $0x5] ss:$0 sm:$0xff] }
 0x154   : > { %v722_v28 = vadd.f32 %v706_v42, %v686_v56  ;;  %v1012_v31 = vadd.f32 %v6131_v14, %v976_v63  ;;  %v1405_v38 = vadd.f32 %v1389_v29, %v1373_v37  ;;  %v833_v40 = vmul.f32 %v6141_v49, %v6031_v27  ;;  %v6248_v56 = vld [vmem:[#allocation7 + $0x6] ss:$0 sm:$0xff] }
 0x155   : > { %v834_v30 = vmul.f32 %v6141_v49, %v6033_v48  ;;  %v1436_v54 = vadd.f32 %v1420_v11, %v1404_v51  ;;  %v869_v16 = vmul.f32 %v6149_v15, %v6185_v18  ;;  %v870_v19 = vmul.f32 %v6149_v15, %v6199_v0 }
 0x156   : > { %v925_v35 = vmul.f32 %v6156_v62, %v8748_v25  ;;  %v1023_v14 = vpack.c.bf16 %v1012_v31, %v1011_v13  ;;  %v1437_v29 = vadd.f32 %v1421_v2, %v1405_v38  ;;  %v6240_v5 = vmul.f32 %v6156_v62, %v5966_v34  ;;  %v6274_v31 = vld [vmem:[#allocation7 + $0x8] ss:$0 sm:$0xff] }
 0x157   : > { %v6236_v44 = vld [vmem:[#allocation2 + $0xe7] sm:$0xff]  ;;  %v6246_v11 = vmul.f32 %v6242_v52, %v6109_v39  ;;  %v1488_v47 = vadd.f32 %v1472_v21, %v1436_v54  ;;  %v6254_v2 = vmul.f32 %v6242_v52, %v6111_v22  ;;  %v6256_v10 = vmax.f32 %v4198_v23, 0.0  ;;  %v6259_v1 = vld [vmem:[#allocation2 + $0xef] sm:$0xff] }
 0x158   : > { %8751 = vst [vmem:[#allocation26_spill] sm:$0xff] %v6236_v44  ;;  %v741_v25 = vmul.f32 %v6248_v56, %v6236_v44  ;;  %4439 = vmatprep.mubr.bf16.mxu0 %v1023_v14  ;;  %v1489_v34 = vadd.f32 %v6162_v50, %v1437_v29  ;;  %8752 = vst [vmem:[#allocation21_spill] sm:$0xff] %v6259_v1  ;;  %v6261_v57 = vld [vmem:[#allocation2 + $0xe9] sm:$0xff]  ;;  %v6263_v42 = vld [vmem:[#allocation2 + $0xf1] sm:$0xff]  ;;  %v6265_v21 = vmax.f32 %v4199_v24, 0.0 }
 0x159   : > { %8753 = vst [vmem:[#allocation33_spill] sm:$0xff] %v6263_v42  ;;  %v1258_v63 = vmul.f32 %v6203_v58, %v6039_v46  ;;  %v1259_v37 = vmul.f32 %v6203_v58, %v6041_v61  ;;  %v1520_v13 = vadd.f32 %v6170_v26, %v1488_v47  ;;  %v742_v51 = vmul.f32 %v6248_v56, %v6259_v1 }
 0x15a   : > { %v757_v50 = vadd.f32 %v741_v25, %v721_v8  ;;  %v997_v38 = vmul.f32 %v6274_v31, %v6261_v57  ;;  %637 = vst [vmem:[#allocation2 + $0x1e8] sm:$0xff] %v6256_v10  ;;  %v1521_v23 = vadd.f32 %v6183_v43, %v1489_v34  ;;  %v998_v46 = vmul.f32 %v6274_v31, %v6263_v42 }
 0x15b   : > { %638 = vst [vmem:[#allocation2 + $0x1f0] sm:$0xff] %v6265_v21  ;;  %v1274_v61 = vmul.f32 %v6211_v33, %v6166_v20  ;;  %v1275_v26 = vmul.f32 %v6211_v33, %v6173_v6  ;;  %v1552_v8 = vadd.f32 %v6192_v60, %v1520_v13  ;;  %v758_v54 = vadd.f32 %v742_v51, %v722_v28 }
 0x15c   : > { %v813_v24 = vadd.f32 %v797_v55, %v757_v50  ;;  %v1358_v14 = vmul.f32 %v6135_v4, %v5980_v45  ;;  %v1553_v43 = vadd.f32 %v6197_v17, %v1521_v23  ;;  %v1359_v25 = vmul.f32 %v6135_v4, %v5982_v59  ;;  %v8754_v17 = vld [vmem:[#allocation24_spill] sm:$0xff]  ;;  %v6319_v50 = vld [vmem:[#allocation2 + $0x107] sm:$0xff]  ;;  %v6321_v23 = vld [vmem:[#allocation2 + $0x10f] sm:$0xff] }
 0x15d   : > { %v1290_v29 = vadd.f32 %v1274_v61, %v1258_v63  ;;  %v1291_v47 = vadd.f32 %v1275_v26, %v1259_v37  ;;  %v814_v34 = vadd.f32 %v798_v32, %v758_v54  ;;  %v1390_v20 = vmul.f32 %v6141_v49, %v6097_v36 }
 0x15e   : > { %v849_v42 = vadd.f32 %v833_v40, %v813_v24  ;;  %v1391_v60 = vmul.f32 %v6141_v49, %v6101_v12  ;;  %v1564_v28 = vpack.c.bf16 %v1553_v43, %v1552_v8  ;;  %v1422_v55 = vmul.f32 %v6149_v15, %v6256_v10 }
 0x15f   : > { %v1423_v45 = vmul.f32 %v6149_v15, %v6265_v21  ;;  %v6303_v63 = vmul.f32 %v6156_v62, %v8754_v17  ;;  %v850_v59 = vadd.f32 %v834_v30, %v814_v34  ;;  %v6307_v40 = vmul.f32 %v6156_v62, %v6056_v41 }
 0x160   : > { %v885_v32 = vadd.f32 %v869_v16, %v849_v42  ;;  %v6311_v37 = vmul.f32 %v6242_v52, %v6177_v53  ;;  %4471 = vmatprep.mubr.bf16.mxu1 %v1564_v28  ;;  %v6317_v51 = vmul.f32 %v6242_v52, %v6179_v9  ;;  %v687_v30 = vmul.f32 %v6203_v58, %v6099_v7  ;;  %v6353_v9 = vld [vmem:[#allocation2 + $0x108] sm:$0xff] }
 0x161   : > { %v6313_v13 = vld [vmem:[#allocation2 + $0x1e7] sm:$0xff]  ;;  %v688_v41 = vmul.f32 %v6203_v58, %v6105_v3  ;;  %v707_v16 = vmul.f32 %v6211_v33, %v6236_v44  ;;  %v886_v42 = vadd.f32 %v870_v19, %v850_v59  ;;  %v708_v7 = vmul.f32 %v6211_v33, %v6259_v1 }
 0x162   : > { %v941_v61 = vadd.f32 %v925_v35, %v885_v32  ;;  %v6329_v26 = vld [vmem:[#allocation2 + $0x1ef] sm:$0xff]  ;;  %v1306_v8 = vmul.f32 %v6248_v56, %v6313_v13  ;;  %v743_v1 = vmul.f32 %v6248_v56, %v6319_v50  ;;  %v744_v44 = vmul.f32 %v6248_v56, %v6321_v23 }
 0x163   : > { %v6333_v54 = vld [vmem:[#allocation2 + $0x1e9] sm:$0xff]  ;;  %v6335_v24 = vld [vmem:[#allocation2 + $0x1f1] sm:$0xff]  ;;  %v1307_v3 = vmul.f32 %v6248_v56, %v6329_v26  ;;  %v723_v35 = vadd.f32 %v707_v16, %v687_v30  ;;  %v942_v34 = vadd.f32 %v6240_v5, %v886_v42  ;;  %v724_v59 = vadd.f32 %v708_v7, %v688_v41 }
 0x164   : > { %8755 = vst [vmem:[#allocation22_spill] sm:$0xff] %v6335_v24  ;;  %v1538_v43 = vmul.f32 %v6274_v31, %v6333_v54  ;;  %v6345_v19 = vmul.f32 %v6274_v31, %v6335_v24  ;;  %v977_v28 = vadd.f32 %v6246_v11, %v941_v61  ;;  %v1322_v17 = vadd.f32 %v1306_v8, %v1290_v29  ;;  %v6358_v42 = vld [vmem:[#allocation2 + $0x110] sm:$0xff] }
 0x165   : > { %v1323_v32 = vadd.f32 %v1307_v3, %v1291_v47  ;;  %v799_v24 = vmul.f32 %v6135_v4, %v6031_v27  ;;  %v978_v30 = vadd.f32 %v6254_v2, %v942_v34  ;;  %v800_v11 = vmul.f32 %v6135_v4, %v6033_v48  ;;  %v4200_v34 = vld [vmem:[%s5364_s29 + $0xf0] sm:$0xff] }
 0x166   : > { %v1013_v16 = vadd.f32 %v997_v38, %v977_v28  ;;  %v1374_v5 = vadd.f32 %v1358_v14, %v1322_v17  ;;  %v759_v47 = vadd.f32 %v743_v1, %v723_v35  ;;  %v760_v41 = vadd.f32 %v744_v44, %v724_v59  ;;  %v6370_v44 = vld [vmem:[#allocation2 + $0x109] sm:$0xff]  ;;  %v6372_v1 = vld [vmem:[#allocation2 + $0x111] sm:$0xff] }
 0x167   : > { %v1375_v29 = vadd.f32 %v1359_v25, %v1323_v32  ;;  %v835_v61 = vmul.f32 %v6141_v49, %v6185_v18  ;;  %v1014_v8 = vadd.f32 %v998_v46, %v978_v30  ;;  %v836_v27 = vmul.f32 %v6141_v49, %v6199_v0  ;;  %v4201_v59 = vld [vmem:[%s5364_s29 + $0xf8] sm:$0xff]  ;;  %v8756_v30 = vld [vmem:[#allocation33_spill] sm:$0xff] }
 0x168   : > { %v1406_v7 = vadd.f32 %v1390_v20, %v1374_v5  ;;  %v871_v2 = vmul.f32 %v6149_v15, %v6353_v9  ;;  %v815_v14 = vadd.f32 %v799_v24, %v759_v47  ;;  %v816_v3 = vadd.f32 %v800_v11, %v760_v41 }
 0x169   : > { %v1407_v38 = vadd.f32 %v1391_v60, %v1375_v29  ;;  %v872_v48 = vmul.f32 %v6149_v15, %v6358_v42  ;;  %v1024_v25 = vpack.c.bf16 %v1014_v8, %v1013_v16  ;;  %v927_v20 = vmul.f32 %v6156_v62, %v6109_v39 }
 0x16a   : > { %v1438_v46 = vadd.f32 %v1422_v55, %v1406_v7  ;;  %v928_v35 = vmul.f32 %v6156_v62, %v6111_v22  ;;  %v851_v60 = vadd.f32 %v835_v61, %v815_v14  ;;  %v852_v24 = vadd.f32 %v836_v27, %v816_v3 }
 0x16b   : > { %v1439_v28 = vadd.f32 %v1423_v45, %v1407_v38  ;;  %v963_v17 = vmul.f32 %v6242_v52, %v6261_v57  ;;  %4440 = vmatmul.mubr.bf16.gmra.mrb[8].mxu0 %v1024_v25  ;;  %v964_v55 = vmul.f32 %v6242_v52, %v8756_v30  ;;  %v999_v39 = vmul.f32 %v6274_v31, %v6370_v44 }
 0x16c   : > { %v1490_v32 = vadd.f32 %v6303_v63, %v1438_v46  ;;  %v1000_v22 = vmul.f32 %v6274_v31, %v6372_v1  ;;  %v887_v16 = vadd.f32 %v871_v2, %v851_v60  ;;  %v888_v5 = vadd.f32 %v872_v48, %v852_v24  ;;  %v8757_v63 = vld [vmem:[#allocation30_spill] sm:$0xff]  ;;  %v8758_v24 = vld [vmem:[#allocation29_spill] sm:$0xff] }
 0x16d   : > { %v1491_v45 = vadd.f32 %v6307_v40, %v1439_v28  ;;  %v6390_v11 = vmax.f32 %v4200_v34, 0.0  ;;  %v6393_v47 = vmax.f32 %v4201_v59, 0.0  ;;  %v1260_v41 = vmul.f32 %v6203_v58, %v8757_v63  ;;  %v670_v28 = vld [vmem:[#allocation2 + $0x12f] sm:$0xff] }
 0x16e   : > { %v1522_v29 = vadd.f32 %v6311_v37, %v1490_v32  ;;  %v1261_v61 = vmul.f32 %v6203_v58, %v6173_v6  ;;  %v943_v7 = vadd.f32 %v927_v20, %v887_v16  ;;  %v944_v27 = vadd.f32 %v928_v35, %v888_v5  ;;  %v8759_v32 = vld [vmem:[#allocation22_spill] sm:$0xff]  ;;  %v8761_v16 = vld [vmem:[#allocation21_spill] sm:$0xff] }
 0x16f   : > { %v1523_v8 = vadd.f32 %v6317_v51, %v1491_v45  ;;  %639 = vst [vmem:[#allocation2 + $0x208] sm:$0xff] %v6390_v11  ;;  %v1276_v40 = vmul.f32 %v6211_v33, %v6313_v13  ;;  %640 = vst [vmem:[#allocation2 + $0x210] sm:$0xff] %v6393_v47  ;;  %v1277_v37 = vmul.f32 %v6211_v33, %v6329_v26 }
 0x170   : > { %v1554_v2 = vadd.f32 %v1538_v43, %v1522_v29  ;;  %v1360_v38 = vmul.f32 %v6135_v4, %v6097_v36  ;;  %v1361_v6 = vmul.f32 %v6135_v4, %v6101_v12  ;;  %v979_v14 = vadd.f32 %v963_v17, %v943_v7  ;;  %v782_v7 = vld [vmem:[#allocation2 + $0x130] sm:$0xff] }
 0x171   : > { %v1555_v51 = vadd.f32 %v6345_v19, %v1523_v8  ;;  %v980_v3 = vadd.f32 %v964_v55, %v944_v27  ;;  %v1292_v48 = vadd.f32 %v1276_v40, %v1260_v41  ;;  %v1293_v25 = vadd.f32 %v1277_v37, %v1261_v61  ;;  %v669_v19 = vld [vmem:[#allocation2 + $0x127] sm:$0xff] }
 0x172   : > { %v1392_v43 = vmul.f32 %v6141_v49, %v6256_v10  ;;  %v1393_v46 = vmul.f32 %v6141_v49, %v6265_v21  ;;  %v6417_v20 = vmul.f32 %v6149_v15, %v6390_v11  ;;  %v1015_v35 = vadd.f32 %v999_v39, %v979_v14  ;;  %v781_v8 = vld [vmem:[#allocation2 + $0x128] sm:$0xff] }
 0x173   : > { %v1565_v36 = vpack.c.bf16 %v1555_v51, %v1554_v2  ;;  %v1016_v34 = vadd.f32 %v1000_v22, %v980_v3  ;;  %v6421_v12 = vmul.f32 %v6149_v15, %v6393_v47  ;;  %v6425_v60 = vmul.f32 %v6156_v62, %v6177_v53  ;;  %v8760_v22 = vld [vmem:[#allocation26_spill] sm:$0xff] }
 0x174   : > { %v6429_v17 = vmul.f32 %v6156_v62, %v8758_v24  ;;  %v6433_v59 = vmul.f32 %v6242_v52, %v6333_v54  ;;  %v6437_v55 = vmul.f32 %v6242_v52, %v8759_v32  ;;  %v689_v45 = vmul.f32 %v6203_v58, %v8760_v22 }
 0x175   : > { %4472 = vmatmul.mubr.bf16.gmra.mrb[8].mxu1 %v1565_v36  ;;  %v1025_v39 = vpack.c.bf16 %v1016_v34, %v1015_v35  ;;  %v690_v53 = vmul.f32 %v6203_v58, %v8761_v16  ;;  %v709_v5 = vmul.f32 %v6211_v33, %v6319_v50  ;;  %v710_v63 = vmul.f32 %v6211_v33, %v6321_v23 }
 0x176   : > { %v1244_v29 = vld [vmem:[#allocation2 + $0x207] sm:$0xff]  ;;  %v745_v41 = vmul.f32 %v6248_v56, %v669_v19  ;;  %v746_v61 = vmul.f32 %v6248_v56, %v670_v28  ;;  %v801_v27 = vmul.f32 %v6135_v4, %v6185_v18  ;;  %v1245_v40 = vld [vmem:[#allocation2 + $0x20f] sm:$0xff]  ;;  %v802_v23 = vmul.f32 %v6135_v4, %v6199_v0 }
 0x177   : > { %4443 = vmatprep.mubr.bf16.mxu0 %v1025_v39  ;;  %v1308_v2 = vmul.f32 %v6248_v56, %v1244_v29  ;;  %v6452_v37 = vld [vmem:[#allocation2 + $0x209] sm:$0xff]  ;;  %v6454_v50 = vld [vmem:[#allocation2 + $0x211] sm:$0xff]  ;;  %v725_v51 = vadd.f32 %v709_v5, %v689_v45  ;;  %v837_v14 = vmul.f32 %v6141_v49, %v6353_v9  ;;  %v1309_v3 = vmul.f32 %v6248_v56, %v1245_v40 }
 0x178   : > { %8762 = vst [vmem:[#allocation23_spill] sm:$0xff] %v6452_v37  ;;  %v1540_v18 = vmul.f32 %v6274_v31, %v6452_v37  ;;  %v1541_v36 = vmul.f32 %v6274_v31, %v6454_v50  ;;  %v726_v35 = vadd.f32 %v710_v63, %v690_v53  ;;  %v838_v28 = vmul.f32 %v6141_v49, %v6358_v42  ;;  %v909_v0 = vld [vmem:[#allocation2 + $0x129] sm:$0xff]  ;;  %v910_v45 = vld [vmem:[#allocation2 + $0x131] sm:$0xff] }
 0x179   : > { %v1324_v34 = vadd.f32 %v1308_v2, %v1292_v48  ;;  %v761_v19 = vadd.f32 %v745_v41, %v725_v51  ;;  %v873_v24 = vmul.f32 %v6149_v15, %v781_v8  ;;  %v1325_v39 = vadd.f32 %v1309_v3, %v1293_v25 }
 0x17a   : > { %v762_v22 = vadd.f32 %v746_v61, %v726_v35  ;;  %v874_v9 = vmul.f32 %v6149_v15, %v782_v7  ;;  %v929_v16 = vmul.f32 %v6156_v62, %v6261_v57  ;;  %v930_v48 = vmul.f32 %v6156_v62, %v8756_v30  ;;  %v1246_v61 = vld [vmem:[#allocation2 + $0x227] sm:$0xff] }
 0x17b   : > { %v1376_v5 = vadd.f32 %v1360_v38, %v1324_v34  ;;  %v817_v37 = vadd.f32 %v801_v27, %v761_v19  ;;  %v965_v53 = vmul.f32 %v6242_v52, %v6370_v44  ;;  %v1377_v42 = vadd.f32 %v1361_v6, %v1325_v39  ;;  %v1247_v38 = vld [vmem:[#allocation2 + $0x22f] sm:$0xff] }
 0x17c   : > { %v818_v63 = vadd.f32 %v802_v23, %v762_v22  ;;  %v966_v25 = vmul.f32 %v6242_v52, %v6372_v1  ;;  %v1001_v41 = vmul.f32 %v6274_v31, %v909_v0  ;;  %v1002_v57 = vmul.f32 %v6274_v31, %v910_v45  ;;  %v6501_v22 = vld [vmem:[#allocation2 + $0x8] sm:$0xff] }
 0x17d   : > { %v1408_v8 = vadd.f32 %v1392_v43, %v1376_v5  ;;  %v853_v7 = vadd.f32 %v837_v14, %v817_v37  ;;  %v1262_v27 = vmul.f32 %v6203_v58, %v6313_v13  ;;  %v1409_v30 = vadd.f32 %v1393_v46, %v1377_v42  ;;  %v1462_v45 = vld [vmem:[#allocation2 + $0x229] sm:$0xff]  ;;  %v1463_v5 = vld [vmem:[#allocation2 + $0x231] sm:$0xff] }
 0x17e   : > { %v854_v2 = vadd.f32 %v838_v28, %v818_v63  ;;  %v1263_v44 = vmul.f32 %v6203_v58, %v6329_v26  ;;  %v1278_v6 = vmul.f32 %v6211_v33, %v1244_v29  ;;  %v1279_v23 = vmul.f32 %v6211_v33, %v1245_v40 }
 0x17f   : > { %v1440_v1 = vadd.f32 %v6417_v20, %v1408_v8  ;;  %v889_v51 = vadd.f32 %v873_v24, %v853_v7  ;;  %v1310_v43 = vmul.f32 %v6248_v56, %v1246_v61  ;;  %v1441_v37 = vadd.f32 %v6421_v12, %v1409_v30  ;;  %v4727_v7 = vld [vmem:[#allocation12] sm:$0xff]   ;;  %v4734_v30 = vld [vmem:[#allocation12 + $0x8] sm:$0xff]  }
 0x180   : > { %v890_v14 = vadd.f32 %v874_v9, %v854_v2  ;;  %v1294_v3 = vadd.f32 %v1278_v6, %v1262_v27  ;;  %v1311_v13 = vmul.f32 %v6248_v56, %v1247_v38  ;;  %v1295_v34 = vadd.f32 %v1279_v23, %v1263_v44  ;;  %4479 = vmatprep.subr.bf16.mxu0 %v4727_v7  ;;  %v4731_v38 = vld [vmem:[#allocation12 + $0x20] sm:$0xff]   ;;  %v4733_v27 = vld [vmem:[#allocation12 + $0x28] sm:$0xff]   ;;  %v4735_v2 = vld [vmem:[#allocation12 + $0x30] sm:$0xff]  }
 0x181   : > { %v1492_v46 = vadd.f32 %v6425_v60, %v1440_v1  ;;  %v945_v35 = vadd.f32 %v929_v16, %v889_v51  ;;  %v1362_v58 = vmul.f32 %v6135_v4, %v6256_v10  ;;  %v1493_v26 = vadd.f32 %v6429_v17, %v1441_v37  ;;  %4480 = vmatpush3.bf16.msra.mxu0 %v4727_v7  ;;  %v4736_v44 = vld [vmem:[#allocation12 + $0x10] sm:$0xff]   ;;  %v4737_v6 = vld [vmem:[#allocation12 + $0x38] sm:$0xff]   ;;  %v6518_v1 = vld [vmem:[%s8591_s3] ss:$0 sm:$0xff] }
 0x182   : > { %v946_v20 = vadd.f32 %v930_v48, %v890_v14  ;;  %v1326_v29 = vadd.f32 %v1310_v43, %v1294_v3  ;;  %v1363_v33 = vmul.f32 %v6135_v4, %v6265_v21  ;;  %v1327_v19 = vadd.f32 %v1311_v13, %v1295_v34  ;;  %v8763_v48 = vld [vmem:[#allocation23_spill] sm:$0xff]  ;;  %8764 = vst [vmem:[#allocation34_spill] sm:$0xff] %v6518_v1  ;;  %v4738_v51 = vld [vmem:[#allocation12 + $0x18] sm:$0xff]   ;;  %v4739_v34 = vld [vmem:[#allocation12 + $0x20] sm:$0xff]  }
 0x183   : > { %v1524_v12 = vadd.f32 %v6433_v59, %v1492_v46  ;;  %v981_v40 = vadd.f32 %v965_v53, %v945_v35  ;;  %v1394_v56 = vmul.f32 %v6141_v49, %v6390_v11  ;;  %v1525_v60 = vadd.f32 %v6437_v55, %v1493_v26 }
 0x184   : > { %v982_v28 = vadd.f32 %v966_v25, %v946_v20  ;;  %v1378_v24 = vadd.f32 %v1362_v58, %v1326_v29  ;;  %v1395_v10 = vmul.f32 %v6141_v49, %v6393_v47  ;;  %v1379_v39 = vadd.f32 %v1363_v33, %v1327_v19  ;;  %v4740_v33 = vld [vmem:[#allocation12 + $0x28] sm:$0xff]   ;;  %v6538_v19 = vld [vmem:[#allocation10 + $0x3] ss:$0 sm:$0xff] }
 0x185   : > { %v1556_v17 = vadd.f32 %v1540_v18, %v1524_v12  ;;  %v1017_v0 = vadd.f32 %v1001_v41, %v981_v40  ;;  %v1426_v4 = vmul.f32 %v6501_v22, %v6149_v15  ;;  %v1557_v21 = vadd.f32 %v1541_v36, %v1525_v60  ;;  %v6536_v12 = vld [vmem:[#allocation10] ss:$0 sm:$0xff]  ;;  %v1772_v40 = vld [vmem:[#allocation3 + $0x7] sm:$0xff] }
 0x186   : > { %v1018_v59 = vadd.f32 %v1002_v57, %v982_v28  ;;  %v1410_v9 = vadd.f32 %v1394_v56, %v1378_v24  ;;  %v1478_v11 = vmul.f32 %v6156_v62, %v6333_v54  ;;  %v1411_v55 = vadd.f32 %v1395_v10, %v1379_v39  ;;  %v4728_v57 = vld [vmem:[#allocation12 + $0x8] sm:$0xff]   ;;  %v4741_v60 = vld [vmem:[#allocation12 + $0x30] sm:$0xff]  }
 0x187   : > { %v1479_v16 = vmul.f32 %v6156_v62, %v8759_v32  ;;  %v1566_v49 = vpack.c.bf16 %v1557_v21, %v1556_v17  ;;  %v1510_v53 = vmul.f32 %v6242_v52, %v8763_v48  ;;  %v1511_v15 = vmul.f32 %v6242_v52, %v6454_v50  ;;  %4481 = vmatprep.subr.bf16.mxu0 %v4728_v57  ;;  %v4729_v52 = vld [vmem:[#allocation12 + $0x10] sm:$0xff]   ;;  %v4730_v50 = vld [vmem:[#allocation12 + $0x18] sm:$0xff]  }
 0x188   : > { %v1026_v47 = vpack.c.bf16 %v1018_v59, %v1017_v0  ;;  %v1442_v18 = vadd.f32 %v1426_v4, %v1410_v9  ;;  %v1443_v42 = vadd.f32 %v1426_v4, %v1411_v55  ;;  %v1542_v54 = vmul.f32 %v6274_v31, %v1462_v45  ;;  %4482 = vmatpush3.bf16.msra.mxu0 %v4728_v57  ;;  %v1773_v56 = vld [vmem:[#allocation3 + $0xf] sm:$0xff]  ;;  %v4742_v9 = vld [vmem:[#allocation12 + $0x38] sm:$0xff]  }
 0x189   : > { %4475 = vmatprep.mubr.bf16.mxu1 %v1566_v49  ;;  %v1543_v25 = vmul.f32 %v6274_v31, %v1463_v5  ;;  %4483 = vmatprep.subr.bf16.mxu0 %v4729_v52  ;;  %v4732_v31 = vld [vmem:[#allocation12] sm:$0xff]   ;;  %v1796_v28 = vmul.f32 %v6536_v12, %v1772_v40  ;;  %v6543_v10 = vld [vmem:[#allocation10 + $0x6] ss:$0 sm:$0xff]  ;;  %v1797_v0 = vmul.f32 %v6536_v12, %v1773_v56  ;;  %v6555_v45 = vld [vmem:[#allocation10 + $0x1] ss:$0 sm:$0xff] }
 0x18a   : > { %4444 = vmatmul.mubr.bf16.gmra.mrb[12].mxu0 %v1026_v47  ;;  %v1494_v36 = vadd.f32 %v1478_v11, %v1442_v18  ;;  %v1495_v63 = vadd.f32 %v1479_v16, %v1443_v42  ;;  %4511 = vmatprep.subr.bf16.mxu1 %v4732_v31  ;;  %8765 = vst [vmem:[#allocation35_spill] sm:$0xff] %v6555_v45 }
 0x18b   : > { %4512 = vmatpush3.bf16.msra.mxu1 %v4732_v31  ;;  %v1908_v48 = vmul.f32 %v6501_v22, %v6555_v45 }
 0x18c   : > { %v1526_v62 = vadd.f32 %v1510_v53, %v1494_v36  ;;  %v1527_v32 = vadd.f32 %v1511_v15, %v1495_v63  ;;  %4484 = vmatpush3.bf16.msra.mxu0 %v4729_v52  ;;  %4513 = vmatprep.subr.bf16.mxu1 %v4734_v30  ;;  %v6567_v36 = vld [vmem:[#allocation10 + $0x4] ss:$0 sm:$0xff] }
 0x18d   : > { %4485 = vmatprep.subr.bf16.mxu0 %v4730_v50  ;;  %8766 = vst [vmem:[#allocation36_spill] sm:$0xff] %v6567_v36 }
 0x18e   : > { %v1558_v41 = vadd.f32 %v1542_v54, %v1526_v62  ;;  %v1559_v61 = vadd.f32 %v1543_v25, %v1527_v32 }
 0x18f   : > { %4514 = vmatpush3.bf16.msra.mxu1 %v4734_v30 }
 0x190   : > { %v1567_v8 = vpack.c.bf16 %v1559_v61, %v1558_v41  ;;  %4486 = vmatpush3.bf16.msra.mxu0 %v4730_v50  ;;  %4515 = vmatprep.subr.bf16.mxu1 %v4736_v44  ;;  %v6577_v41 = vld [vmem:[#allocation10 + $0x7] ss:$0 sm:$0xff] }
 0x191   : > { %4487 = vmatprep.subr.bf16.mxu0 %v4731_v38  ;;  %v2013_v50 = vld [vmem:[#allocation3 + $0x11] sm:$0xff] }
 0x192   : > { %4476 = vmatmul.mubr.bf16.gmra.mrb[12].mxu1 %v1567_v8  ;;  %v2012_v8 = vld [vmem:[#allocation3 + $0x9] sm:$0xff] }
 0x193   : > { %4516 = vmatpush3.bf16.msra.mxu1 %v4736_v44 }
 0x194   : > { %4488 = vmatpush3.bf16.msra.mxu0 %v4731_v38  ;;  %4517 = vmatprep.subr.bf16.mxu1 %v4738_v51  ;;  %v6585_v38 = vld [vmem:[#allocation10 + $0x2] ss:$0 sm:$0xff] }
 0x195   : > { %4489 = vmatprep.subr.bf16.mxu0 %v4733_v27  ;;  %v2036_v44 = vmul.f32 %v6585_v38, %v2012_v8 }
 0x197   : > { %4518 = vmatpush3.bf16.msra.mxu1 %v4738_v51 }
 0x198   : > { %4490 = vmatpush3.bf16.msra.mxu0 %v4733_v27  ;;  %4519 = vmatprep.subr.bf16.mxu1 %v4739_v34 }
 0x199   : > { %4491 = vmatprep.subr.bf16.mxu0 %v4735_v2 }
 0x19b   : > { %4520 = vmatpush3.bf16.msra.mxu1 %v4739_v34 }
 0x19c   : > { %4492 = vmatpush3.bf16.msra.mxu0 %v4735_v2  ;;  %4521 = vmatprep.subr.bf16.mxu1 %v4740_v33 }
 0x19d   : > { %4493 = vmatprep.subr.bf16.mxu0 %v4737_v6 }
 0x19f   : > { %4522 = vmatpush3.bf16.msra.mxu1 %v4740_v33 }
 0x1a0   : > { %4494 = vmatpush3.bf16.msra.mxu0 %v4737_v6  ;;  %4523 = vmatprep.subr.bf16.mxu1 %v4741_v60  ;;  %v6593_v6 = vld [vmem:[#allocation10 + $0x5] ss:$0 sm:$0xff] }
 0x1a3   : > { %4524 = vmatpush3.bf16.msra.mxu1 %v4741_v60 }
 0x1a4   : > { %4525 = vmatprep.subr.bf16.mxu1 %v4742_v9 }
 0x1a7   : > { %4526 = vmatpush3.bf16.msra.mxu1 %v4742_v9 }
 0x1ef   : > { %v4433_v23 = vpop.f32.mrb[0].mxu0 }
 0x1f0   : > { %v1140_v43 = vadd.f32 %v4433_v23, %v6518_v1  ;;  %v1131_v37 = vpop.f32.mrb[1].mxu0 }
 0x1f1   : > { %v1132_v14 = vadd.f32 %v6518_v1, %v1131_v37  ;;  %v4434_v3 = vpop.f32.mrb[2].mxu0  ;;  %v2037_v37 = vmul.f32 %v6585_v38, %v2013_v50 }
 0x1f2   : > { %v6522_v13 = vmax.f32 %v1140_v43, 0.0  ;;  %v1143_v46 = vadd.f32 %v4434_v3, %v6518_v1  ;;  %v1134_v35 = vpop.f32.mrb[3].mxu0 }
 0x1f3   : > { %v6525_v58 = vmax.f32 %v1132_v14, 0.0  ;;  %v1135_v26 = vadd.f32 %v6518_v1, %v1134_v35  ;;  %v6598_v35 = vld [vmem:[#allocation10 + $0x8] ss:$0 sm:$0xff] }
 0x1f4   : > { %1213 = vst [vmem:[#allocation3 + $0x48] sm:$0xff] %v6522_v13  ;;  %v6529_v20 = vmax.f32 %v1143_v46, 0.0  ;;  %v1980_v2 = vmul.f32 %v6577_v41, %v6522_v13 }
 0x1f5   : > { %1211 = vst [vmem:[#allocation3 + $0x28] sm:$0xff] %v6525_v58  ;;  %v6532_v29 = vmax.f32 %v1135_v26, 0.0  ;;  %v1944_v52 = vmul.f32 %v6567_v36, %v6525_v58 }
 0x1f6   : > { %1214 = vst [vmem:[#allocation3 + $0x50] sm:$0xff] %v6529_v20  ;;  %v1981_v23 = vmul.f32 %v6577_v41, %v6529_v20 }
 0x1f7   : > { %1212 = vst [vmem:[#allocation3 + $0x30] sm:$0xff] %v6532_v29  ;;  %v1945_v27 = vmul.f32 %v6567_v36, %v6532_v29 }
 0x1fb   : > { %v6545_v17 = vld [vmem:[#allocation3 + $0x47] sm:$0xff] }
 0x1fc   : > { %v6541_v24 = vld [vmem:[#allocation3 + $0x27] sm:$0xff]  ;;  %v1852_v5 = vmul.f32 %v6543_v10, %v6545_v17 }
 0x1fd   : > { %v1816_v39 = vmul.f32 %v6538_v19, %v6541_v24  ;;  %v6552_v59 = vld [vmem:[#allocation3 + $0x4f] sm:$0xff]  ;;  %v1798_v9 = vmul.f32 %v6536_v12, %v6541_v24  ;;  %v6622_v24 = vmul.f32 %v6555_v45, %v6522_v13 }
 0x1fe   : > { %v4465_v4 = vpop.f32.mrb[0].mxu1  ;;  %v6550_v21 = vld [vmem:[#allocation3 + $0x2f] sm:$0xff]  ;;  %v1853_v63 = vmul.f32 %v6543_v10, %v6552_v59 }
 0x1ff   : > { %v1675_v11 = vadd.f32 %v4465_v4, %v6518_v1  ;;  %v1666_v55 = vpop.f32.mrb[1].mxu1  ;;  %v1817_v16 = vmul.f32 %v6538_v19, %v6550_v21  ;;  %v1832_v49 = vadd.f32 %v1816_v39, %v1796_v28  ;;  %v2014_v43 = vld [vmem:[#allocation3 + $0x29] sm:$0xff]  ;;  %v2015_v3 = vld [vmem:[#allocation3 + $0x31] sm:$0xff] }
 0x200   : > { %v1667_v47 = vadd.f32 %v6518_v1, %v1666_v55  ;;  %v4466_v18 = vpop.f32.mrb[2].mxu1  ;;  %v2016_v34 = vld [vmem:[#allocation3 + $0x49] sm:$0xff]  ;;  %v2017_v26 = vld [vmem:[#allocation3 + $0x51] sm:$0xff]  ;;  %v2072_v40 = vmul.f32 %v6593_v6, %v2014_v43  ;;  %v2073_v60 = vmul.f32 %v6593_v6, %v2015_v3  ;;  %v1799_v55 = vmul.f32 %v6536_v12, %v6550_v21 }
 0x201   : > { %v6564_v53 = vmax.f32 %v1675_v11, 0.0  ;;  %v1678_v42 = vadd.f32 %v4466_v18, %v6518_v1  ;;  %v1669_v15 = vpop.f32.mrb[3].mxu1  ;;  %v1833_v54 = vadd.f32 %v1817_v16, %v1797_v0  ;;  %v1868_v32 = vadd.f32 %v1852_v5, %v1832_v49 }
 0x202   : > { %v6571_v25 = vmax.f32 %v1667_v47, 0.0  ;;  %v1670_v62 = vadd.f32 %v6518_v1, %v1669_v15  ;;  %v2108_v39 = vmul.f32 %v6598_v35, %v2016_v34  ;;  %v2109_v4 = vmul.f32 %v6598_v35, %v2017_v26 }
 0x203   : > { %1748 = vst [vmem:[#allocation3 + $0x148] sm:$0xff] %v6564_v53  ;;  %v6575_v22 = vmax.f32 %v1678_v42, 0.0  ;;  %v1869_v61 = vadd.f32 %v1853_v63, %v1833_v54  ;;  %v1924_v57 = vadd.f32 %v1908_v48, %v1868_v32  ;;  %v1818_v11 = vmul.f32 %v6538_v19, %v6545_v17 }
 0x204   : > { %1746 = vst [vmem:[#allocation3 + $0x128] sm:$0xff] %v6571_v25  ;;  %v6580_v7 = vmax.f32 %v1670_v62, 0.0  ;;  %v1819_v16 = vmul.f32 %v6538_v19, %v6552_v59  ;;  %v6614_v18 = vmul.f32 %v6555_v45, %v6525_v58  ;;  %v6618_v5 = vmul.f32 %v6567_v36, %v6522_v13 }
 0x205   : > { %1749 = vst [vmem:[#allocation3 + $0x150] sm:$0xff] %v6575_v22  ;;  %v1925_v31 = vadd.f32 %v1908_v48, %v1869_v61  ;;  %v1960_v30 = vadd.f32 %v1944_v52, %v1924_v57  ;;  %v6626_v21 = vmul.f32 %v6555_v45, %v6532_v29  ;;  %v6630_v48 = vmul.f32 %v6567_v36, %v6529_v20 }
 0x206   : > { %1747 = vst [vmem:[#allocation3 + $0x130] sm:$0xff] %v6580_v7  ;;  %v6634_v58 = vmul.f32 %v6555_v45, %v6529_v20  ;;  %v6636_v15 = vadd.f32 %v1818_v11, %v1798_v9  ;;  %v6639_v54 = vmul.f32 %v6593_v6, %v2016_v34  ;;  %v6642_v13 = vmul.f32 %v6593_v6, %v2017_v26 }
 0x207   : > { %v1961_v51 = vadd.f32 %v1945_v27, %v1925_v31  ;;  %v1996_v14 = vadd.f32 %v1980_v2, %v1960_v30  ;;  %v6646_v29 = vmul.f32 %v6536_v12, %v6545_v17  ;;  %v6648_v63 = vadd.f32 %v1819_v16, %v1799_v55 }
 0x208   : > { %v6651_v62 = vmul.f32 %v6585_v38, %v2014_v43  ;;  %v6654_v20 = vmul.f32 %v6585_v38, %v2015_v3  ;;  %v6658_v32 = vmul.f32 %v6536_v12, %v6552_v59  ;;  %v6661_v61 = vmul.f32 %v6585_v38, %v2016_v34 }
 0x209   : > { %v1997_v46 = vadd.f32 %v1981_v23, %v1961_v51  ;;  %v2052_v33 = vadd.f32 %v2036_v44, %v1996_v14  ;;  %v6664_v8 = vmul.f32 %v6585_v38, %v2017_v26  ;;  %v6668_v52 = vmul.f32 %v6555_v45, %v6571_v25 }
 0x20a   : > { %v2352_v57 = vld [vmem:[#allocation3 + $0x147] sm:$0xff]  ;;  %v6672_v50 = vmul.f32 %v6555_v45, %v6580_v7  ;;  %v6676_v59 = vmul.f32 %v6567_v36, %v6571_v25  ;;  %v6680_v30 = vmul.f32 %v6567_v36, %v6580_v7  ;;  %v6684_v2 = vmul.f32 %v6567_v36, %v6564_v53 }
 0x20b   : > { %v2053_v56 = vadd.f32 %v2037_v37, %v1997_v46  ;;  %v2088_v28 = vadd.f32 %v2072_v40, %v2052_v33  ;;  %v2350_v17 = vld [vmem:[#allocation3 + $0x127] sm:$0xff]  ;;  %v6688_v44 = vmul.f32 %v6567_v36, %v6575_v22  ;;  %v6692_v23 = vmul.f32 %v6577_v41, %v6564_v53 }
 0x20c   : > { %v2353_v27 = vld [vmem:[#allocation3 + $0x14f] sm:$0xff]  ;;  %8767 = vst [vmem:[#allocation32_spill] sm:$0xff] %v6676_v59  ;;  %8768 = vst [vmem:[#allocation31_spill] sm:$0xff] %v6680_v30  ;;  %v6696_v25 = vmul.f32 %v6577_v41, %v6575_v22  ;;  %v6700_v7 = vmul.f32 %v6555_v45, %v6564_v53  ;;  %v6704_v43 = vmul.f32 %v6555_v45, %v6575_v22 }
 0x20d   : > { %v2089_v0 = vadd.f32 %v2073_v60, %v2053_v56  ;;  %v2124_v49 = vadd.f32 %v2108_v39, %v2088_v28  ;;  %v2351_v31 = vld [vmem:[#allocation3 + $0x12f] sm:$0xff]  ;;  %8769 = vst [vmem:[#allocation37_spill] sm:$0xff] %v6688_v44  ;;  %8770 = vst [vmem:[#allocation25_spill] sm:$0xff] %v6692_v23  ;;  %v2370_v3 = vmul.f32 %v6536_v12, %v2350_v17 }
 0x20e   : > { %8771 = vst [vmem:[#allocation27_spill] sm:$0xff] %v6696_v25  ;;  %8772 = vst [vmem:[#allocation28_spill] sm:$0xff] %v6700_v7  ;;  %v2386_v46 = vmul.f32 %v6538_v19, %v2352_v57  ;;  %v6710_v34 = vmul.f32 %v6543_v10, %v2352_v57  ;;  %v2568_v26 = vld [vmem:[#allocation3 + $0x149] sm:$0xff]  ;;  %v2371_v53 = vmul.f32 %v6536_v12, %v2351_v31  ;;  %v2567_v9 = vld [vmem:[#allocation3 + $0x131] sm:$0xff] }
 0x20f   : > { %v2125_v47 = vadd.f32 %v2109_v4, %v2089_v0  ;;  %8773 = vst [vmem:[#allocation24_spill] sm:$0xff] %v6704_v43  ;;  %v2387_v56 = vmul.f32 %v6538_v19, %v2353_v27  ;;  %v2566_v22 = vld [vmem:[#allocation3 + $0x129] sm:$0xff]  ;;  %v6716_v60 = vmul.f32 %v6536_v12, %v2352_v57  ;;  %v6720_v4 = vmul.f32 %v6538_v19, %v2350_v17 }
 0x210   : > { %8774 = vst [vmem:[#allocation33_spill] sm:$0xff] %v6710_v34  ;;  %v6723_v11 = vmul.f32 %v6543_v10, %v2350_v17  ;;  %v6738_v17 = vmul.f32 %v6585_v38, %v2566_v22  ;;  %v6749_v25 = vmul.f32 %v6593_v6, %v2567_v9 }
 0x211   : > { %v2140_v42 = vpack.c.bf16 %v2125_v47, %v2124_v49  ;;  %8775 = vst [vmem:[#allocation30_spill] sm:$0xff] %v6720_v4  ;;  %v6727_v49 = vmul.f32 %v6543_v10, %v2353_v27  ;;  %v2569_v47 = vld [vmem:[#allocation3 + $0x151] sm:$0xff] }
 0x212   : > { %8776 = vst [vmem:[#allocation29_spill] sm:$0xff] %v6723_v11  ;;  %8780 = vst [vmem:[#allocation23_spill] sm:$0xff] %v6738_v17  ;;  %v1902_v11 = vld [vmem:[#allocation3 + $0x128] sm:$0xff] }
 0x213   : > { %4495 = vmatprep.mubr.bf16.mxu0 %v2140_v42  ;;  %8777 = vst [vmem:[#allocation22_spill] sm:$0xff] %v6727_v49  ;;  %v6730_v42 = vmul.f32 %v6593_v6, %v2568_v26  ;;  %8783 = vst [vmem:[#allocation40_spill] sm:$0xff] %v6749_v25  ;;  %v6770_v25 = vmul.f32 %v6543_v10, %v2351_v31  ;;  %v6773_v23 = vmul.f32 %v6577_v41, %v1902_v11 }
 0x215   : > { %8778 = vst [vmem:[#allocation26_spill] sm:$0xff] %v6730_v42  ;;  %8789 = vst [vmem:[#allocation46_spill] sm:$0xff] %v6770_v25 }
 0x216   : > { %8790 = vst [vmem:[#allocation47_spill] sm:$0xff] %v6773_v23 }
 0x217   : > { %v4437_v51 = vpop.f32.mrb[4].mxu0 }
 0x218   : > { %v1156_v37 = vadd.f32 %v4437_v51, %v6518_v1  ;;  %v1147_v14 = vpop.f32.mrb[5].mxu0  ;;  %v6733_v51 = vmul.f32 %v6538_v19, %v2351_v31 }
 0x219   : > { %v1148_v33 = vadd.f32 %v6518_v1, %v1147_v14  ;;  %v4438_v40 = vpop.f32.mrb[6].mxu0 }
 0x21a   : > { %v1200_v28 = vmax.f32 %v1156_v37, 0.0  ;;  %v1159_v0 = vadd.f32 %v4438_v40, %v6518_v1  ;;  %v1150_v39 = vpop.f32.mrb[7].mxu0  ;;  %8779 = vst [vmem:[#allocation21_spill] sm:$0xff] %v6733_v51  ;;  %v6735_v37 = vadd.f32 %v2386_v46, %v2370_v3  ;;  %v6743_v40 = vmul.f32 %v6585_v38, %v2567_v9 }
 0x21b   : > { %v1198_v55 = vmax.f32 %v1148_v33, 0.0  ;;  %v1151_v16 = vadd.f32 %v6518_v1, %v1150_v39  ;;  %v6740_v33 = vadd.f32 %v2387_v56, %v2371_v53  ;;  %v6746_v39 = vmul.f32 %v6593_v6, %v2566_v22 }
 0x21c   : > { %1217 = vst [vmem:[#allocation3 + $0x88] sm:$0xff] %v1200_v28  ;;  %v1201_v57 = vmax.f32 %v1159_v0, 0.0  ;;  %8781 = vst [vmem:[#allocation38_spill] sm:$0xff] %v6743_v40  ;;  %v1903_v0 = vld [vmem:[#allocation3 + $0x130] sm:$0xff]  ;;  %v6752_v3 = vmul.f32 %v6593_v6, %v2569_v47  ;;  %v6755_v46 = vmul.f32 %v6598_v35, %v2568_v26  ;;  %v6758_v53 = vmul.f32 %v6598_v35, %v2569_v47 }
 0x21d   : > { %1215 = vst [vmem:[#allocation3 + $0x68] sm:$0xff] %v1198_v55  ;;  %v1199_v14 = vmax.f32 %v1151_v16, 0.0  ;;  %8782 = vst [vmem:[#allocation39_spill] sm:$0xff] %v6746_v39  ;;  %v6761_v56 = vmul.f32 %v6536_v12, %v2353_v27  ;;  %v6764_v16 = vmul.f32 %v6585_v38, %v2568_v26  ;;  %v6767_v39 = vmul.f32 %v6585_v38, %v2569_v47 }
 0x21e   : > { %1218 = vst [vmem:[#allocation3 + $0x90] sm:$0xff] %v1201_v57  ;;  %8784 = vst [vmem:[#allocation41_spill] sm:$0xff] %v6752_v3  ;;  %v6782_v27 = vmul.f32 %v6598_v35, %v2567_v9  ;;  %v6785_v26 = vmul.f32 %v6577_v41, %v1198_v55  ;;  %v6788_v47 = vmul.f32 %v6577_v41, %v1200_v28 }
 0x21f   : > { %8785 = vst [vmem:[#allocation42_spill] sm:$0xff] %v6755_v46  ;;  %8786 = vst [vmem:[#allocation43_spill] sm:$0xff] %v6758_v53  ;;  %v6776_v46 = vmul.f32 %v6577_v41, %v1903_v0  ;;  %v6779_v53 = vmul.f32 %v6598_v35, %v2566_v22  ;;  %v6791_v31 = vmul.f32 %v6567_v36, %v1200_v28 }
 0x220   : > { %1216 = vst [vmem:[#allocation3 + $0x70] sm:$0xff] %v1199_v14  ;;  %8787 = vst [vmem:[#allocation44_spill] sm:$0xff] %v6764_v16  ;;  %v6794_v11 = vmul.f32 %v6555_v45, %v1200_v28  ;;  %v6797_v0 = vmul.f32 %v6567_v36, %v1198_v55  ;;  %v6800_v22 = vmul.f32 %v6577_v41, %v1201_v57 }
 0x221   : > { %8788 = vst [vmem:[#allocation45_spill] sm:$0xff] %v6767_v39  ;;  %8791 = vst [vmem:[#allocation48_spill] sm:$0xff] %v6776_v46  ;;  %v6803_v9 = vmul.f32 %v6555_v45, %v1198_v55  ;;  %v6809_v46 = vmul.f32 %v6577_v41, %v1199_v14  ;;  %v6812_v28 = vmul.f32 %v6567_v36, %v1199_v14 }
 0x222   : > { %8792 = vst [vmem:[#allocation49_spill] sm:$0xff] %v6779_v53  ;;  %8793 = vst [vmem:[#allocation50_spill] sm:$0xff] %v6782_v27  ;;  %v6806_v27 = vmul.f32 %v6567_v36, %v1201_v57  ;;  %v6815_v25 = vmul.f32 %v6555_v45, %v1199_v14  ;;  %v6818_v30 = vmul.f32 %v6555_v45, %v1201_v57 }
 0x223   : > { %8794 = vst [vmem:[#allocation51_spill] sm:$0xff] %v6791_v31  ;;  %8795 = vst [vmem:[#allocation52_spill] sm:$0xff] %v6794_v11  ;;  %v4469_v53 = vpop.f32.mrb[4].mxu1  ;;  %v1780_v23 = vld [vmem:[#allocation3 + $0x87] sm:$0xff] }
 0x224   : > { %8796 = vst [vmem:[#allocation53_spill] sm:$0xff] %v6803_v9  ;;  %8797 = vst [vmem:[#allocation54_spill] sm:$0xff] %v6806_v27  ;;  %v1691_v55 = vadd.f32 %v4469_v53, %v6518_v1  ;;  %v1682_v59 = vpop.f32.mrb[5].mxu1  ;;  %v1778_v49 = vld [vmem:[#allocation3 + $0x67] sm:$0xff]  ;;  %v1856_v34 = vmul.f32 %v6543_v10, %v1780_v23  ;;  %v1822_v51 = vmul.f32 %v6538_v19, %v1780_v23 }
 0x225   : > { %8798 = vst [vmem:[#allocation55_spill] sm:$0xff] %v6815_v25  ;;  %8799 = vst [vmem:[#allocation56_spill] sm:$0xff] %v6818_v30  ;;  %v6824_v4 = vmul.f32 %v6536_v12, %v1780_v23  ;;  %v1683_v27 = vadd.f32 %v6518_v1, %v1682_v59  ;;  %v4470_v11 = vpop.f32.mrb[6].mxu1  ;;  %v1854_v14 = vmul.f32 %v6543_v10, %v1778_v49  ;;  %v1781_v31 = vld [vmem:[#allocation3 + $0x8f] sm:$0xff] }
 0x226   : > { %v1820_v57 = vmul.f32 %v6538_v19, %v1778_v49  ;;  %v2020_v30 = vld [vmem:[#allocation3 + $0x89] sm:$0xff]  ;;  %v1802_v53 = vmul.f32 %v6536_v12, %v1778_v49  ;;  %v1735_v25 = vmax.f32 %v1691_v55, 0.0  ;;  %v1694_v9 = vadd.f32 %v4470_v11, %v6518_v1  ;;  %v1685_v39 = vpop.f32.mrb[7].mxu1  ;;  %v2021_v55 = vld [vmem:[#allocation3 + $0x91] sm:$0xff] }
 0x227   : > { %8800 = vst [vmem:[#allocation57_spill] sm:$0xff] %v6824_v4  ;;  %v1779_v16 = vld [vmem:[#allocation3 + $0x6f] sm:$0xff]  ;;  %v1857_v23 = vmul.f32 %v6543_v10, %v1781_v31  ;;  %v6833_v59 = vmul.f32 %v6598_v35, %v2020_v30  ;;  %v6835_v4 = vmax.f32 %v1683_v27, 0.0  ;;  %v1686_v42 = vadd.f32 %v6518_v1, %v1685_v39 }
 0x228   : > { %v2018_v45 = vld [vmem:[#allocation3 + $0x69] sm:$0xff]  ;;  %v2019_v3 = vld [vmem:[#allocation3 + $0x71] sm:$0xff]  ;;  %v1855_v40 = vmul.f32 %v6543_v10, %v1779_v16  ;;  %v1870_v49 = vadd.f32 %v1854_v14, %v6636_v15  ;;  %1752 = vst [vmem:[#allocation3 + $0x188] sm:$0xff] %v1735_v25  ;;  %v1736_v11 = vmax.f32 %v1694_v9, 0.0  ;;  %v1821_v7 = vmul.f32 %v6538_v19, %v1779_v16 }
 0x229   : > { %v2110_v17 = vmul.f32 %v6598_v35, %v2018_v45  ;;  %v2111_v43 = vmul.f32 %v6598_v35, %v2019_v3  ;;  %1750 = vst [vmem:[#allocation3 + $0x168] sm:$0xff] %v6835_v4  ;;  %v6844_v44 = vmax.f32 %v1686_v42, 0.0  ;;  %v1836_v1 = vadd.f32 %v1820_v57, %v6646_v29 }
 0x22a   : > { %v1871_v27 = vadd.f32 %v1855_v40, %v6648_v63  ;;  %v1926_v39 = vadd.f32 %v6614_v18, %v1870_v49  ;;  %1753 = vst [vmem:[#allocation3 + $0x190] sm:$0xff] %v1736_v11  ;;  %v1837_v15 = vadd.f32 %v1821_v7, %v6658_v32  ;;  %v2076_v25 = vmul.f32 %v6593_v6, %v2018_v45 }
 0x22b   : > { %v2077_v9 = vmul.f32 %v6593_v6, %v2019_v3  ;;  %v2113_v14 = vmul.f32 %v6598_v35, %v2021_v55  ;;  %1751 = vst [vmem:[#allocation3 + $0x170] sm:$0xff] %v6844_v44  ;;  %v1872_v63 = vadd.f32 %v1856_v34, %v1836_v1  ;;  %v1803_v18 = vmul.f32 %v6536_v12, %v1779_v16 }
 0x22c   : > { %v1927_v42 = vadd.f32 %v6626_v21, %v1871_v27  ;;  %v1962_v36 = vadd.f32 %v6618_v5, %v1926_v39  ;;  %v1873_v40 = vadd.f32 %v1857_v23, %v1837_v15  ;;  %v1823_v29 = vmul.f32 %v6538_v19, %v1781_v31 }
 0x22d   : > { %v6858_v57 = vadd.f32 %v1822_v51, %v1802_v53  ;;  %v6861_v32 = vmul.f32 %v6585_v38, %v2018_v45  ;;  %v1928_v11 = vadd.f32 %v6622_v24, %v1872_v63  ;;  %v6867_v21 = vmul.f32 %v6585_v38, %v2019_v3 }
 0x22e   : > { %v1963_v7 = vadd.f32 %v6630_v48, %v1927_v42  ;;  %v1998_v49 = vadd.f32 %v6785_v26, %v1962_v36  ;;  %v1929_v1 = vadd.f32 %v6634_v58, %v1873_v40  ;;  %v6870_v5 = vadd.f32 %v1823_v29, %v1803_v18 }
 0x22f   : > { %v6873_v34 = vmul.f32 %v6593_v6, %v2020_v30  ;;  %v6876_v51 = vmul.f32 %v6593_v6, %v2021_v55  ;;  %v1964_v36 = vadd.f32 %v6797_v0, %v1928_v11  ;;  %v6882_v24 = vmul.f32 %v6536_v12, %v1781_v31  ;;  %v6884_v3 = vld [vmem:[#allocation3 + $0x187] sm:$0xff] }
 0x230   : > { %v1999_v45 = vadd.f32 %v6809_v46, %v1963_v7  ;;  %v2054_v48 = vadd.f32 %v6651_v62, %v1998_v49  ;;  %v1965_v58 = vadd.f32 %v6812_v28, %v1929_v1  ;;  %v6888_v16 = vmul.f32 %v6585_v38, %v2020_v30  ;;  %v2354_v53 = vld [vmem:[#allocation3 + $0x167] sm:$0xff] }
 0x231   : > { %v6891_v26 = vmul.f32 %v6585_v38, %v2021_v55  ;;  %v2534_v46 = vmul.f32 %v6577_v41, %v6835_v4  ;;  %v2000_v31 = vadd.f32 %v6788_v47, %v1964_v36  ;;  %v2418_v23 = vmul.f32 %v6543_v10, %v2354_v53  ;;  %v6912_v63 = vld [vmem:[#allocation3 + $0x18f] sm:$0xff] }
 0x232   : > { %v2055_v62 = vadd.f32 %v6654_v20, %v1999_v45  ;;  %v2090_v0 = vadd.f32 %v6639_v54, %v2054_v48  ;;  %v2001_v28 = vadd.f32 %v6800_v22, %v1965_v58  ;;  %v2355_v27 = vld [vmem:[#allocation3 + $0x16f] sm:$0xff]  ;;  %v2535_v30 = vmul.f32 %v6577_v41, %v6844_v44 }
 0x233   : > { %v6902_v55 = vld [vmem:[#allocation3 + $0x169] sm:$0xff]  ;;  %v6904_v39 = vld [vmem:[#allocation3 + $0x171] sm:$0xff]  ;;  %v2388_v15 = vmul.f32 %v6538_v19, %v2354_v53  ;;  %v2420_v20 = vmul.f32 %v6543_v10, %v6884_v3  ;;  %v2056_v42 = vadd.f32 %v6661_v61, %v2000_v31  ;;  %v2419_v22 = vmul.f32 %v6543_v10, %v2355_v27 }
 0x234   : > { %v2091_v54 = vadd.f32 %v6642_v13, %v2055_v62  ;;  %v2126_v47 = vadd.f32 %v2110_v17, %v2090_v0  ;;  %v2057_v18 = vadd.f32 %v6664_v8, %v2001_v28  ;;  %v2434_v40 = vadd.f32 %v2418_v23, %v6735_v37  ;;  %v6926_v37 = vld [vmem:[#allocation3 + $0x188] sm:$0xff]  ;;  %v8804_v0 = vld [vmem:[#allocation37_spill] sm:$0xff]  ;;  %v6943_v28 = vld [vmem:[#allocation3 + $0x191] sm:$0xff] }
 0x235   : > { %v2650_v29 = vmul.f32 %v6598_v35, %v6902_v55  ;;  %v2651_v7 = vmul.f32 %v6598_v35, %v6904_v39  ;;  %v2092_v11 = vadd.f32 %v2076_v25, %v2056_v42  ;;  %v2435_v13 = vadd.f32 %v2419_v22, %v6740_v33  ;;  %8801 = vst [vmem:[#allocation58_spill] sm:$0xff] %v6926_v37  ;;  %v6931_v33 = vld [vmem:[#allocation3 + $0x190] sm:$0xff]  ;;  %v8808_v42 = vld [vmem:[#allocation24_spill] sm:$0xff] }
 0x236   : > { %v2127_v49 = vadd.f32 %v2111_v43, %v2091_v54  ;;  %v2389_v61 = vmul.f32 %v6538_v19, %v2355_v27  ;;  %v2093_v17 = vadd.f32 %v2077_v9, %v2057_v18  ;;  %v2486_v1 = vadd.f32 %v6668_v52, %v2434_v40  ;;  %8802 = vst [vmem:[#allocation59_spill] sm:$0xff] %v6931_v33 }
 0x237   : > { %v2404_v45 = vadd.f32 %v2388_v15, %v6716_v60  ;;  %v2421_v8 = vmul.f32 %v6543_v10, %v6912_v63  ;;  %v2128_v36 = vadd.f32 %v6833_v59, %v2092_v11  ;;  %v2487_v43 = vadd.f32 %v6672_v50, %v2435_v13  ;;  %v8803_v60 = vld [vmem:[#allocation36_spill] sm:$0xff]  ;;  %8806 = vst [vmem:[#allocation60_spill] sm:$0xff] %v6943_v28 }
 0x238   : > { %v2141_v48 = vpack.c.bf16 %v2127_v49, %v2126_v47  ;;  %v2405_v25 = vadd.f32 %v2389_v61, %v6761_v56  ;;  %v2129_v58 = vadd.f32 %v2113_v14, %v2093_v17  ;;  %v2518_v9 = vadd.f32 %v6684_v2, %v2486_v1  ;;  %v6941_v56 = vld [vmem:[#allocation3 + $0x189] sm:$0xff]  ;;  %v8807_v15 = vld [vmem:[#allocation28_spill] sm:$0xff] }
 0x239   : > { %v2436_v52 = vadd.f32 %v2420_v20, %v2404_v45  ;;  %v2504_v62 = vmul.f32 %v8803_v60, %v6835_v4  ;;  %v2519_v31 = vadd.f32 %v8804_v0, %v2487_v43  ;;  %v2505_v59 = vmul.f32 %v8803_v60, %v6844_v44  ;;  %8805 = vst [vmem:[#allocation37_spill] sm:$0xff] %v6941_v56  ;;  %v8809_v49 = vld [vmem:[#allocation23_spill] sm:$0xff]  ;;  %v8810_v17 = vld [vmem:[#allocation38_spill] sm:$0xff] }
 0x23a   : > { %4496 = vmatmul.mubr.bf16.vlgmr.msra.gmra.mrb[16].mxu0 %v2141_v48  ;;  %v2437_v23 = vadd.f32 %v2421_v8, %v2405_v25  ;;  %v2536_v50 = vmul.f32 %v6577_v41, %v6926_v37  ;;  %v2142_v14 = vpack.c.bf16 %v2129_v58, %v2128_v36  ;;  %v2550_v2 = vadd.f32 %v2534_v46, %v2518_v9  ;;  %v8811_v36 = vld [vmem:[#allocation26_spill] sm:$0xff] }
 0x23b   : > { %v2488_v20 = vadd.f32 %v8807_v15, %v2436_v52  ;;  %v2537_v54 = vmul.f32 %v6577_v41, %v6931_v33  ;;  %v2551_v47 = vadd.f32 %v2535_v30, %v2519_v31  ;;  %v2620_v18 = vmul.f32 %v6593_v6, %v6902_v55  ;;  %v8812_v52 = vld [vmem:[#allocation34_spill] sm:$0xff]  ;;  %v8813_v31 = vld [vmem:[#allocation41_spill] sm:$0xff]  ;;  %v8816_v15 = vld [vmem:[#allocation44_spill] sm:$0xff] }
 0x23c   : > { %v2489_v22 = vadd.f32 %v8808_v42, %v2437_v23  ;;  %v2621_v40 = vmul.f32 %v6593_v6, %v6904_v39  ;;  %4499 = vmatprep.mubr.bf16.mxu0 %v2142_v14  ;;  %v2602_v11 = vadd.f32 %v8809_v49, %v2550_v2  ;;  %v2652_v46 = vmul.f32 %v6598_v35, %v6941_v56 }
 0x23d   : > { %v2520_v13 = vadd.f32 %v2504_v62, %v2488_v20  ;;  %v2653_v61 = vmul.f32 %v6598_v35, %v6943_v28  ;;  %v2603_v30 = vadd.f32 %v8810_v17, %v2551_v47  ;;  %v2374_v45 = vmul.f32 %v6536_v12, %v2354_v53  ;;  %v8814_v53 = vld [vmem:[#allocation35_spill] sm:$0xff] }
 0x23e   : > { %v2521_v1 = vadd.f32 %v2505_v59, %v2489_v22  ;;  %v2375_v8 = vmul.f32 %v6536_v12, %v2355_v27  ;;  %v4441_v48 = vpop.f32.mrb[8].mxu0  ;;  %v2634_v43 = vadd.f32 %v8811_v36, %v2602_v11  ;;  %v2390_v58 = vmul.f32 %v6538_v19, %v6884_v3 }
 0x23f   : > { %v2552_v25 = vadd.f32 %v2536_v50, %v2520_v13  ;;  %v2391_v9 = vmul.f32 %v6538_v19, %v6912_v63  ;;  %v1172_v62 = vadd.f32 %v4441_v48, %v8812_v52  ;;  %v1163_v0 = vpop.f32.mrb[9].mxu0  ;;  %v2635_v23 = vadd.f32 %v8813_v31, %v2603_v30 }
 0x240   : > { %v2553_v59 = vadd.f32 %v2537_v54, %v2521_v1  ;;  %v6970_v14 = vmul.f32 %v8814_v53, %v6835_v4  ;;  %v1164_v27 = vadd.f32 %v8812_v52, %v1163_v0  ;;  %v4442_v2 = vpop.f32.mrb[10].mxu0  ;;  %v6973_v50 = vadd.f32 %v2650_v29, %v2634_v43  ;;  %v8818_v54 = vld [vmem:[#allocation45_spill] sm:$0xff] }
 0x241   : > { %v2604_v20 = vadd.f32 %v8816_v15, %v2552_v25  ;;  %v6976_v47 = vadd.f32 %v2390_v58, %v2374_v45  ;;  %v1204_v42 = vmax.f32 %v1172_v62, 0.0  ;;  %v1175_v22 = vadd.f32 %v4442_v2, %v8812_v52  ;;  %v1166_v49 = vpop.f32.mrb[11].mxu0 }
 0x242   : > { %8815 = vst [vmem:[#allocation28_spill] sm:$0xff] %v6973_v50  ;;  %v6979_v11 = vadd.f32 %v2651_v7, %v2635_v23  ;;  %v2605_v13 = vadd.f32 %v8818_v54, %v2553_v59  ;;  %v1202_v17 = vmax.f32 %v1164_v27, 0.0  ;;  %v1167_v4 = vadd.f32 %v8812_v52, %v1166_v49 }
 0x243   : > { %v2636_v30 = vadd.f32 %v2620_v18, %v2604_v20  ;;  %v6983_v1 = vadd.f32 %v2391_v9, %v2375_v8  ;;  %1221 = vst [vmem:[#allocation3 + $0xc8] sm:$0xff] %v1204_v42  ;;  %v1205_v29 = vmax.f32 %v1175_v22, 0.0  ;;  %v6986_v48 = vmul.f32 %v6577_v41, %v1204_v42 }
 0x244   : > { %8817 = vst [vmem:[#allocation24_spill] sm:$0xff] %v6979_v11  ;;  %v6989_v45 = vmul.f32 %v8803_v60, %v1204_v42  ;;  %v6992_v36 = vmul.f32 %v8814_v53, %v1204_v42  ;;  %1219 = vst [vmem:[#allocation3 + $0xa8] sm:$0xff] %v1202_v17  ;;  %v1203_v7 = vmax.f32 %v1167_v4, 0.0  ;;  %v6995_v43 = vmul.f32 %v6577_v41, %v1202_v17 }
 0x245   : > { %v6998_v18 = vmul.f32 %v8803_v60, %v1202_v17  ;;  %v7001_v8 = vmul.f32 %v8814_v53, %v1202_v17  ;;  %1222 = vst [vmem:[#allocation3 + $0xd0] sm:$0xff] %v1205_v29  ;;  %v7004_v25 = vmul.f32 %v6577_v41, %v1205_v29  ;;  %v7007_v58 = vmul.f32 %v8803_v60, %v1205_v29 }
 0x246   : > { %8819 = vst [vmem:[#allocation23_spill] sm:$0xff] %v6989_v45  ;;  %8820 = vst [vmem:[#allocation38_spill] sm:$0xff] %v6992_v36  ;;  %v7010_v9 = vmul.f32 %v8814_v53, %v1205_v29  ;;  %v7015_v0 = vmul.f32 %v6577_v41, %v1203_v7  ;;  %v7018_v31 = vmul.f32 %v8803_v60, %v1203_v7  ;;  %v8832_v45 = vld [vmem:[#allocation57_spill] sm:$0xff] }
 0x247   : > { %8821 = vst [vmem:[#allocation26_spill] sm:$0xff] %v7001_v8  ;;  %8822 = vst [vmem:[#allocation34_spill] sm:$0xff] %v7007_v58  ;;  %v7021_v23 = vmul.f32 %v8814_v53, %v1203_v7  ;;  %v2637_v59 = vadd.f32 %v2621_v40, %v2605_v13  ;;  %v7023_v2 = vadd.f32 %v2652_v46, %v2636_v30 }
 0x248   : > { %8823 = vst [vmem:[#allocation41_spill] sm:$0xff] %v7010_v9  ;;  %1220 = vst [vmem:[#allocation3 + $0xb0] sm:$0xff] %v1203_v7  ;;  %v4473_v27 = vpop.f32.mrb[8].mxu1  ;;  %v7027_v15 = vmul.f32 %v8814_v53, %v6844_v44  ;;  %v7031_v20 = vmul.f32 %v8803_v60, %v6926_v37  ;;  %v7035_v42 = vmul.f32 %v8803_v60, %v6931_v33  ;;  %v8835_v53 = vld [vmem:[#allocation51_spill] sm:$0xff] }
 0x249   : > { %8824 = vst [vmem:[#allocation44_spill] sm:$0xff] %v7021_v23  ;;  %8825 = vst [vmem:[#allocation45_spill] sm:$0xff] %v7023_v2  ;;  %v1707_v22 = vadd.f32 %v4473_v27, %v8812_v52  ;;  %v1698_v49 = vpop.f32.mrb[9].mxu1  ;;  %v7038_v54 = vadd.f32 %v2653_v61, %v2637_v59  ;;  %v7042_v40 = vmul.f32 %v6585_v38, %v6902_v55 }
 0x24a   : > { %v7046_v44 = vmul.f32 %v6585_v38, %v6904_v39  ;;  %v1699_v46 = vadd.f32 %v8812_v52, %v1698_v49  ;;  %v4474_v13 = vpop.f32.mrb[10].mxu1  ;;  %v7051_v17 = vmul.f32 %v6593_v6, %v6941_v56  ;;  %v7055_v4 = vmul.f32 %v6593_v6, %v6943_v28  ;;  %v1784_v29 = vld [vmem:[#allocation3 + $0xc7] sm:$0xff] }
 0x24b   : > { %8826 = vst [vmem:[#allocation61_spill] sm:$0xff] %v7038_v54  ;;  %8827 = vst [vmem:[#allocation62_spill] sm:$0xff] %v7042_v40  ;;  %v7059_v61 = vmul.f32 %v6536_v12, %v6884_v3  ;;  %v1739_v55 = vmax.f32 %v1707_v22, 0.0  ;;  %v1710_v30 = vadd.f32 %v4474_v13, %v8812_v52  ;;  %v1701_v39 = vpop.f32.mrb[11].mxu1  ;;  %v7066_v59 = vmul.f32 %v6536_v12, %v6912_v63  ;;  %v1782_v62 = vld [vmem:[#allocation3 + $0xa7] sm:$0xff] }
 0x24c   : > { %8828 = vst [vmem:[#allocation63_spill] sm:$0xff] %v7046_v44  ;;  %8829 = vst [vmem:[#allocation64_spill] sm:$0xff] %v7051_v17  ;;  %v1737_v27 = vmax.f32 %v1699_v46, 0.0  ;;  %v1702_v49 = vadd.f32 %v8812_v52, %v1701_v39  ;;  %v1860_v28 = vmul.f32 %v6543_v10, %v1784_v29  ;;  %v1826_v3 = vmul.f32 %v6538_v19, %v1784_v29  ;;  %v1785_v56 = vld [vmem:[#allocation3 + $0xcf] sm:$0xff] }
 0x24d   : > { %8830 = vst [vmem:[#allocation65_spill] sm:$0xff] %v7055_v4  ;;  %1756 = vst [vmem:[#allocation3 + $0x1c8] sm:$0xff] %v1739_v55  ;;  %v1740_v22 = vmax.f32 %v1710_v30, 0.0  ;;  %v1858_v13 = vmul.f32 %v6543_v10, %v1782_v62  ;;  %v1824_v50 = vmul.f32 %v6538_v19, %v1782_v62  ;;  %v2024_v7 = vld [vmem:[#allocation3 + $0xc9] sm:$0xff]  ;;  %v2025_v2 = vld [vmem:[#allocation3 + $0xd1] sm:$0xff]  ;;  %v1806_v63 = vmul.f32 %v6536_v12, %v1782_v62 }
 0x24e   : > { %1754 = vst [vmem:[#allocation3 + $0x1a8] sm:$0xff] %v1737_v27  ;;  %v1738_v46 = vmax.f32 %v1702_v49, 0.0  ;;  %v1861_v9 = vmul.f32 %v6543_v10, %v1785_v56  ;;  %v7076_v36 = vmul.f32 %v6598_v35, %v2024_v7  ;;  %v7079_v55 = vmul.f32 %v6598_v35, %v2025_v2  ;;  %v8833_v4 = vld [vmem:[#allocation53_spill] sm:$0xff] }
 0x24f   : > { %v1783_v54 = vld [vmem:[#allocation3 + $0xaf] sm:$0xff]  ;;  %1757 = vst [vmem:[#allocation3 + $0x1d0] sm:$0xff] %v1740_v22  ;;  %v1874_v58 = vadd.f32 %v1858_v13, %v6858_v57  ;;  %v1840_v23 = vadd.f32 %v1824_v50, %v8832_v45  ;;  %v1827_v13 = vmul.f32 %v6538_v19, %v1785_v56  ;;  %v7096_v44 = vadd.f32 %v1826_v3, %v1806_v63 }
 0x250   : > { %v2022_v39 = vld [vmem:[#allocation3 + $0xa9] sm:$0xff]  ;;  %v2023_v11 = vld [vmem:[#allocation3 + $0xb1] sm:$0xff]  ;;  %8831 = vst [vmem:[#allocation66_spill] sm:$0xff] %v7079_v55  ;;  %v1859_v30 = vmul.f32 %v6543_v10, %v1783_v54  ;;  %1755 = vst [vmem:[#allocation3 + $0x1b0] sm:$0xff] %v1738_v46  ;;  %v1825_v49 = vmul.f32 %v6538_v19, %v1783_v54  ;;  %v1807_v57 = vmul.f32 %v6536_v12, %v1783_v54 }
 0x251   : > { %v2114_v62 = vmul.f32 %v6598_v35, %v2022_v39  ;;  %v2115_v27 = vmul.f32 %v6598_v35, %v2023_v11  ;;  %v2080_v8 = vmul.f32 %v6593_v6, %v2022_v39  ;;  %v7089_v33 = vmul.f32 %v6593_v6, %v2023_v11  ;;  %v8834_v45 = vld [vmem:[#allocation55_spill] sm:$0xff]  ;;  %v8836_v54 = vld [vmem:[#allocation52_spill] sm:$0xff] }
 0x252   : > { %v1875_v22 = vadd.f32 %v1859_v30, %v6870_v5  ;;  %v1930_v37 = vadd.f32 %v8833_v4, %v1874_v58  ;;  %v1841_v17 = vadd.f32 %v1825_v49, %v6882_v24  ;;  %v1876_v46 = vadd.f32 %v1860_v28, %v1840_v23  ;;  %v8837_v23 = vld [vmem:[#allocation54_spill] sm:$0xff] }
 0x253   : > { %v7099_v50 = vmul.f32 %v6585_v38, %v2022_v39  ;;  %v7103_v55 = vadd.f32 %v1827_v13, %v1807_v57  ;;  %v7106_v5 = vmul.f32 %v6585_v38, %v2023_v11  ;;  %v7110_v24 = vmul.f32 %v6593_v6, %v2024_v7 }
 0x254   : > { %v1931_v60 = vadd.f32 %v8834_v45, %v1875_v22  ;;  %v1966_v40 = vadd.f32 %v8835_v53, %v1930_v37  ;;  %v1877_v58 = vadd.f32 %v1861_v9, %v1841_v17  ;;  %v1932_v4 = vadd.f32 %v8836_v54, %v1876_v46  ;;  %v8840_v17 = vld [vmem:[#allocation56_spill] sm:$0xff] }
 0x255   : > { %v7113_v28 = vmul.f32 %v6593_v6, %v2025_v2  ;;  %v7118_v37 = vmul.f32 %v6536_v12, %v1784_v29  ;;  %v7121_v53 = vmul.f32 %v6536_v12, %v1785_v56  ;;  %v7123_v11 = vld [vmem:[#allocation3 + $0x1a7] sm:$0xff]  ;;  %v7130_v49 = vmul.f32 %v6585_v38, %v2024_v7 }
 0x256   : > { %v1967_v3 = vadd.f32 %v8837_v23, %v1931_v60  ;;  %v2002_v63 = vadd.f32 %v6995_v43, %v1966_v40  ;;  %8838 = vst [vmem:[#allocation57_spill] sm:$0xff] %v7123_v11  ;;  %v7125_v9 = vld [vmem:[#allocation3 + $0x1a8] sm:$0xff]  ;;  %v1933_v39 = vadd.f32 %v8840_v17, %v1877_v58  ;;  %v1968_v30 = vadd.f32 %v6998_v18, %v1932_v4 }
 0x257   : > { %8839 = vst [vmem:[#allocation53_spill] sm:$0xff] %v7125_v9  ;;  %v7133_v60 = vmul.f32 %v6585_v38, %v2025_v2  ;;  %v7137_v12 = vld [vmem:[#allocation3 + $0x1af] sm:$0xff]  ;;  %v2422_v56 = vmul.f32 %v6543_v10, %v7123_v11  ;;  %v2538_v18 = vmul.f32 %v6577_v41, %v7125_v9  ;;  %v7169_v23 = vld [vmem:[#allocation3 + $0x1c7] sm:$0xff] }
 0x258   : > { %v2003_v43 = vadd.f32 %v7015_v0, %v1967_v3  ;;  %v2058_v40 = vadd.f32 %v6861_v32, %v2002_v63  ;;  %8841 = vst [vmem:[#allocation55_spill] sm:$0xff] %v7137_v12  ;;  %v7141_v29 = vld [vmem:[#allocation3 + $0x1b0] sm:$0xff]  ;;  %v1969_v7 = vadd.f32 %v7018_v31, %v1933_v39  ;;  %v2004_v2 = vadd.f32 %v6986_v48, %v1968_v30 }
 0x259   : > { %8842 = vst [vmem:[#allocation51_spill] sm:$0xff] %v7141_v29  ;;  %v7145_v22 = vld [vmem:[#allocation3 + $0x1a9] sm:$0xff]  ;;  %v2423_v0 = vmul.f32 %v6543_v10, %v7137_v12  ;;  %v2539_v32 = vmul.f32 %v6577_v41, %v7141_v29  ;;  %v7153_v57 = vld [vmem:[#allocation3 + $0x1b1] sm:$0xff]  ;;  %v2438_v45 = vadd.f32 %v2422_v56, %v6976_v47  ;;  %8845 = vst [vmem:[#allocation56_spill] sm:$0xff] %v7169_v23 }
 0x25a   : > { %8843 = vst [vmem:[#allocation52_spill] sm:$0xff] %v7145_v22  ;;  %8844 = vst [vmem:[#allocation54_spill] sm:$0xff] %v7153_v57  ;;  %v2059_v13 = vadd.f32 %v6867_v21, %v2003_v43  ;;  %v2094_v46 = vadd.f32 %v6873_v34, %v2058_v40  ;;  %v7160_v58 = vmul.f32 %v6598_v35, %v7145_v22  ;;  %v7187_v40 = vld [vmem:[#allocation3 + $0x1cf] sm:$0xff] }
 0x25b   : > { %v2005_v48 = vadd.f32 %v7004_v25, %v1969_v7  ;;  %v2060_v31 = vadd.f32 %v6888_v16, %v2004_v2  ;;  %v2439_v54 = vadd.f32 %v2423_v0, %v6983_v1  ;;  %v7167_v4 = vmul.f32 %v6598_v35, %v7153_v57  ;;  %8846 = vst [vmem:[#allocation67_spill] sm:$0xff] %v7187_v40  ;;  %v8861_v57 = vld [vmem:[#allocation22_spill] sm:$0xff] }
 0x25c   : > { %v2095_v21 = vadd.f32 %v6876_v51, %v2059_v13  ;;  %v2130_v34 = vadd.f32 %v2114_v62, %v2094_v46  ;;  %v2490_v47 = vadd.f32 %v6970_v14, %v2438_v45  ;;  %v2392_v3 = vmul.f32 %v6538_v19, %v7123_v11  ;;  %v8847_v13 = vld [vmem:[#allocation66_spill] sm:$0xff] }
 0x25d   : > { %v2061_v25 = vadd.f32 %v6891_v26, %v2005_v48  ;;  %v2096_v63 = vadd.f32 %v2080_v8, %v2060_v31  ;;  %v2491_v16 = vadd.f32 %v7027_v15, %v2439_v54  ;;  %v2393_v1 = vmul.f32 %v6538_v19, %v7137_v12  ;;  %v4445_v17 = vpop.f32.mrb[12].mxu0  ;;  %v8848_v48 = vld [vmem:[#allocation62_spill] sm:$0xff] }
 0x25e   : > { %v2131_v39 = vadd.f32 %v2115_v27, %v2095_v21  ;;  %v2522_v30 = vadd.f32 %v7031_v20, %v2490_v47  ;;  %v2408_v51 = vadd.f32 %v2392_v3, %v7059_v61  ;;  %v2424_v14 = vmul.f32 %v6543_v10, %v7169_v23  ;;  %v1179_v43 = vpop.f32.mrb[13].mxu0  ;;  %v8850_v3 = vld [vmem:[#allocation36_spill] sm:$0xff]  ;;  %v8860_v12 = vld [vmem:[#allocation26_spill] sm:$0xff] }
 0x25f   : > { %v1188_v62 = vadd.f32 %v4445_v17, %v8812_v52  ;;  %v2097_v26 = vadd.f32 %v7089_v33, %v2061_v25  ;;  %v2132_v8 = vadd.f32 %v7076_v36, %v2096_v63  ;;  %v2523_v15 = vadd.f32 %v7035_v42, %v2491_v16  ;;  %v4446_v27 = vpop.f32.mrb[14].mxu0  ;;  %v4769_v36 = vld [vmem:[%s8591_s3] ss:$0 sm:$0xff] }
 0x260   : > { %v1180_v19 = vadd.f32 %v8812_v52, %v1179_v43  ;;  %v2143_v20 = vpack.c.bf16 %v2131_v39, %v2130_v34  ;;  %v2554_v56 = vadd.f32 %v2538_v18, %v2522_v30  ;;  %v2409_v61 = vadd.f32 %v2393_v1, %v7066_v59  ;;  %v1182_v0 = vpop.f32.mrb[15].mxu0  ;;  %v8851_v43 = vld [vmem:[#allocation63_spill] sm:$0xff] }
 0x261   : > { %v1208_v7 = vmax.f32 %v1188_v62, 0.0  ;;  %v1191_v2 = vadd.f32 %v4446_v27, %v8812_v52  ;;  %v2133_v46 = vadd.f32 %v8847_v13, %v2097_v26  ;;  %v2555_v33 = vadd.f32 %v2539_v32, %v2523_v15  ;;  %v8849_v52 = vld [vmem:[#allocation35_spill] sm:$0xff]  ;;  %v8852_v15 = vld [vmem:[#allocation64_spill] sm:$0xff] }
 0x262   : > { %v1206_v45 = vmax.f32 %v1180_v19, 0.0  ;;  %v1183_v42 = vadd.f32 %v4769_v36, %v1182_v0  ;;  %4500 = vmatmul.mubr.bf16.gmra.mrb[20].mxu0 %v2143_v20  ;;  %v2606_v31 = vadd.f32 %v8848_v48, %v2554_v56  ;;  %v2425_v18 = vmul.f32 %v6543_v10, %v7187_v40  ;;  %v8853_v56 = vld [vmem:[#allocation58_spill] sm:$0xff]  ;;  %v8859_v40 = vld [vmem:[#allocation33_spill] sm:$0xff] }
 0x263   : > { %1225 = vst [vmem:[#allocation3 + $0x108] sm:$0xff] %v1208_v7  ;;  %v1209_v59 = vmax.f32 %v1191_v2, 0.0  ;;  %v2144_v54 = vpack.c.bf16 %v2133_v46, %v2132_v8  ;;  %v7200_v21 = vmul.f32 %v8849_v52, %v1208_v7  ;;  %v7203_v32 = vmul.f32 %v6577_v41, %v1208_v7  ;;  %v8855_v46 = vld [vmem:[#allocation59_spill] sm:$0xff] }
 0x264   : > { %1223 = vst [vmem:[#allocation3 + $0xe8] sm:$0xff] %v1206_v45  ;;  %v1207_v34 = vmax.f32 %v1183_v42, 0.0  ;;  %v7206_v47 = vmul.f32 %v6577_v41, %v1206_v45  ;;  %v7209_v25 = vmul.f32 %v8850_v3, %v1206_v45  ;;  %v7212_v63 = vmul.f32 %v8849_v52, %v1206_v45 }
 0x265   : > { %1226 = vst [vmem:[#allocation3 + $0x110] sm:$0xff] %v1209_v59  ;;  %4503 = vmatprep.mubr.bf16.mxu0 %v2144_v54  ;;  %v7215_v10 = vmul.f32 %v8849_v52, %v1209_v59  ;;  %v7218_v16 = vmul.f32 %v6577_v41, %v1209_v59  ;;  %v7221_v1 = vmul.f32 %v8850_v3, %v1208_v7  ;;  %v4477_v8 = vpop.f32.mrb[12].mxu1 }
 0x266   : > { %v7224_v17 = vmul.f32 %v8850_v3, %v1209_v59  ;;  %1224 = vst [vmem:[#allocation3 + $0xf0] sm:$0xff] %v1207_v34  ;;  %v7227_v39 = vmul.f32 %v6577_v41, %v1207_v34  ;;  %v7230_v30 = vmul.f32 %v8850_v3, %v1207_v34  ;;  %v7233_v62 = vmul.f32 %v8849_v52, %v1207_v34  ;;  %v1714_v0 = vpop.f32.mrb[13].mxu1  ;;  %v8854_v41 = vld [vmem:[#allocation65_spill] sm:$0xff] }
 0x267   : > { %v2607_v26 = vadd.f32 %v8851_v43, %v2555_v33  ;;  %v2638_v19 = vadd.f32 %v8852_v15, %v2606_v31  ;;  %v2440_v27 = vadd.f32 %v2424_v14, %v2408_v51  ;;  %v2441_v20 = vadd.f32 %v2425_v18, %v2409_v61  ;;  %v4478_v48 = vpop.f32.mrb[14].mxu1 }
 0x268   : > { %v2476_v7 = vmul.f32 %v8849_v52, %v8853_v56  ;;  %v1723_v2 = vadd.f32 %v4769_v36, %v4477_v8  ;;  %v2477_v45 = vmul.f32 %v8849_v52, %v8855_v46  ;;  %v7244_v42 = vmul.f32 %v8850_v3, %v7125_v9  ;;  %v1717_v59 = vpop.f32.mrb[15].mxu1  ;;  %v7262_v8 = vld [vmem:[#allocation10] ss:$0 sm:$0xff] }
 0x269   : > { %v2639_v13 = vadd.f32 %v8854_v41, %v2607_v26  ;;  %v1715_v33 = vadd.f32 %v4769_v36, %v1714_v0  ;;  %v7247_v31 = vadd.f32 %v7160_v58, %v2638_v19  ;;  %v7253_v14 = vmul.f32 %v8850_v3, %v7141_v29  ;;  %v7266_v3 = vld [vmem:[#allocation10 + $0x6] ss:$0 sm:$0xff] }
 0x26a   : > { %v7249_v51 = vadd.f32 %v2476_v7, %v2440_v27  ;;  %v1743_v61 = vmax.f32 %v1723_v2, 0.0  ;;  %v1726_v18 = vadd.f32 %v4769_v36, %v4478_v48  ;;  %v7255_v54 = vld [vmem:[#allocation3 + $0x107] sm:$0xff]  ;;  %v7260_v34 = vadd.f32 %v2477_v45, %v2441_v20 }
 0x26b   : > { %8856 = vst [vmem:[#allocation66_spill] sm:$0xff] %v7253_v14  ;;  %v7258_v52 = vadd.f32 %v7167_v4, %v2639_v13  ;;  %v1741_v43 = vmax.f32 %v1715_v33, 0.0  ;;  %v1718_v26 = vadd.f32 %v4769_v36, %v1717_v59  ;;  %v1786_v58 = vld [vmem:[#allocation3 + $0xe7] sm:$0xff]  ;;  %v2368_v15 = vmul.f32 %v7262_v8, %v7255_v54  ;;  %v7275_v36 = vld [vmem:[#allocation10 + $0x3] ss:$0 sm:$0xff] }
 0x26c   : > { %v1864_v19 = vmul.f32 %v7266_v3, %v7255_v54  ;;  %1760 = vst [vmem:[#allocation3 + $0x208] sm:$0xff] %v1743_v61  ;;  %v1744_v27 = vmax.f32 %v1726_v18, 0.0  ;;  %v1862_v4 = vmul.f32 %v7266_v3, %v1786_v58  ;;  %v2349_v56 = vld [vmem:[#allocation3 + $0x10f] sm:$0xff]  ;;  %v1828_v2 = vmul.f32 %v7275_v36, %v1786_v58 }
 0x26d   : > { %v7271_v20 = vld [vmem:[#allocation3 + $0x109] sm:$0xff]  ;;  %v7273_v7 = vld [vmem:[#allocation3 + $0x111] sm:$0xff]  ;;  %v1810_v0 = vmul.f32 %v7262_v8, %v1786_v58  ;;  %1758 = vst [vmem:[#allocation3 + $0x1e8] sm:$0xff] %v1741_v43  ;;  %v1742_v41 = vmax.f32 %v1718_v26, 0.0  ;;  %v2369_v33 = vmul.f32 %v7262_v8, %v2349_v56  ;;  %v8858_v58 = vld [vmem:[#allocation21_spill] sm:$0xff]  ;;  %v1865_v11 = vmul.f32 %v7266_v3, %v2349_v56 }
 0x26e   : > { %v1787_v13 = vld [vmem:[#allocation3 + $0xef] sm:$0xff]  ;;  %v2584_v18 = vmul.f32 %v6585_v38, %v7271_v20  ;;  %1761 = vst [vmem:[#allocation3 + $0x210] sm:$0xff] %v1744_v27  ;;  %v1878_v29 = vadd.f32 %v1862_v4, %v7096_v44  ;;  %v1844_v4 = vadd.f32 %v1828_v2, %v7118_v37 }
 0x26f   : > { %v7279_v46 = vld [vmem:[#allocation3 + $0xe9] sm:$0xff]  ;;  %v7281_v45 = vld [vmem:[#allocation3 + $0xf1] sm:$0xff]  ;;  %v1863_v59 = vmul.f32 %v7266_v3, %v1787_v13  ;;  %1759 = vst [vmem:[#allocation3 + $0x1f0] sm:$0xff] %v1742_v41  ;;  %v2401_v9 = vadd.f32 %v8858_v58, %v2369_v33  ;;  %v1829_v27 = vmul.f32 %v7275_v36, %v1787_v13 }
 0x270   : > { %v8857_v48 = vld [vmem:[#allocation30_spill] sm:$0xff]  ;;  %v2118_v43 = vmul.f32 %v6598_v35, %v7279_v46  ;;  %v2119_v26 = vmul.f32 %v6598_v35, %v7281_v45  ;;  %v1934_v44 = vadd.f32 %v8860_v12, %v1878_v29  ;;  %v8863_v58 = vld [vmem:[#allocation23_spill] sm:$0xff] }
 0x271   : > { %v2400_v61 = vadd.f32 %v8857_v48, %v2368_v15  ;;  %v2585_v15 = vmul.f32 %v6585_v38, %v7273_v7  ;;  %v1879_v48 = vadd.f32 %v1863_v59, %v7103_v55  ;;  %v2433_v22 = vadd.f32 %v8861_v57, %v2401_v9  ;;  %v8862_v38 = vld [vmem:[#allocation44_spill] sm:$0xff]  ;;  %v7309_v59 = vld [vmem:[#allocation10 + $0x5] ss:$0 sm:$0xff]  ;;  %v8866_v2 = vld [vmem:[#allocation38_spill] sm:$0xff] }
 0x272   : > { %v1845_v33 = vadd.f32 %v1829_v27, %v7121_v53  ;;  %v1970_v14 = vadd.f32 %v8863_v58, %v1934_v44  ;;  %v1880_v55 = vadd.f32 %v1864_v19, %v1844_v4  ;;  %v2085_v37 = vmul.f32 %v7309_v59, %v7281_v45  ;;  %v8864_v9 = vld [vmem:[#allocation32_spill] sm:$0xff]  ;;  %v8867_v44 = vld [vmem:[#allocation31_spill] sm:$0xff] }
 0x273   : > { %v2432_v23 = vadd.f32 %v8859_v40, %v2400_v61  ;;  %v2084_v40 = vmul.f32 %v6593_v6, %v7279_v46  ;;  %v1935_v61 = vadd.f32 %v8862_v38, %v1879_v48  ;;  %v2485_v12 = vadd.f32 %v7215_v10, %v2433_v22  ;;  %v7320_v19 = vld [vmem:[#allocation10 + $0x8] ss:$0 sm:$0xff]  ;;  %v8868_v22 = vld [vmem:[#allocation25_spill] sm:$0xff] }
 0x274   : > { %v1881_v57 = vadd.f32 %v1865_v11, %v1845_v33  ;;  %v2120_v53 = vmul.f32 %v6598_v35, %v7271_v20  ;;  %v1936_v27 = vadd.f32 %v8866_v2, %v1880_v55  ;;  %v2121_v48 = vmul.f32 %v7320_v19, %v7273_v7  ;;  %v8872_v2 = vld [vmem:[#allocation29_spill] sm:$0xff] }
 0x275   : > { %v2484_v41 = vadd.f32 %v7200_v21, %v2432_v23  ;;  %v8865_v23 = vld [vmem:[#allocation34_spill] sm:$0xff]  ;;  %v2006_v21 = vadd.f32 %v7206_v47, %v1970_v14  ;;  %v2517_v4 = vadd.f32 %v8867_v44, %v2485_v12  ;;  %v1811_v33 = vmul.f32 %v7262_v8, %v1787_v13 }
 0x276   : > { %v1971_v6 = vadd.f32 %v8865_v23, %v1935_v61  ;;  %v1972_v47 = vadd.f32 %v7209_v25, %v1936_v27  ;;  %v1830_v14 = vmul.f32 %v7275_v36, %v7255_v54  ;;  %v8870_v61 = vld [vmem:[#allocation27_spill] sm:$0xff]  ;;  %v8873_v27 = vld [vmem:[#allocation40_spill] sm:$0xff]  ;;  %v8874_v44 = vld [vmem:[#allocation42_spill] sm:$0xff] }
 0x277   : > { %v2516_v29 = vadd.f32 %v8864_v9, %v2484_v41  ;;  %v8869_v41 = vld [vmem:[#allocation41_spill] sm:$0xff]  ;;  %v2062_v38 = vadd.f32 %v7099_v50, %v2006_v21  ;;  %v2549_v58 = vadd.f32 %v8870_v61, %v2517_v4  ;;  %v1831_v9 = vmul.f32 %v7275_v36, %v2349_v56  ;;  %v8871_v23 = vld [vmem:[#allocation39_spill] sm:$0xff] }
 0x278   : > { %v1937_v11 = vadd.f32 %v8869_v41, %v1881_v57  ;;  %v2007_v35 = vadd.f32 %v7227_v39, %v1971_v6  ;;  %v2008_v39 = vadd.f32 %v7203_v32, %v1972_v47  ;;  %v1846_v57 = vadd.f32 %v1830_v14, %v1810_v0  ;;  %v8875_v0 = vld [vmem:[#allocation46_spill] sm:$0xff] }
 0x279   : > { %v2548_v10 = vadd.f32 %v8868_v22, %v2516_v29  ;;  %v2098_v13 = vadd.f32 %v7110_v24, %v2062_v38  ;;  %v2601_v50 = vadd.f32 %v2585_v15, %v2549_v58  ;;  %v1847_v54 = vadd.f32 %v1831_v9, %v1811_v33  ;;  %v7362_v38 = vld [vmem:[#allocation3 + $0x1d0] sm:$0xff] }
 0x27a   : > { %v1973_v12 = vadd.f32 %v7230_v30, %v1937_v11  ;;  %v2063_v29 = vadd.f32 %v7106_v5, %v2007_v35  ;;  %v2064_v30 = vadd.f32 %v7130_v49, %v2008_v39  ;;  %v1882_v56 = vadd.f32 %v8872_v2, %v1846_v57  ;;  %v8876_v49 = vld [vmem:[#allocation43_spill] sm:$0xff]  ;;  %v8884_v39 = vld [vmem:[#allocation60_spill] sm:$0xff] }
 0x27b   : > { %v2600_v55 = vadd.f32 %v2584_v18, %v2548_v10  ;;  %v2134_v18 = vadd.f32 %v2118_v43, %v2098_v13  ;;  %v2633_v5 = vadd.f32 %v8873_v27, %v2601_v50  ;;  %v1883_v15 = vadd.f32 %v8875_v0, %v1847_v54  ;;  %v7349_v10 = vld [vmem:[#allocation10 + $0x2] ss:$0 sm:$0xff]  ;;  %v7381_v9 = vld [vmem:[#allocation3 + $0x1c9] sm:$0xff]  ;;  %v8885_v50 = vld [vmem:[#allocation52_spill] sm:$0xff] }
 0x27c   : > { %v2009_v6 = vadd.f32 %v7218_v16, %v1973_v12  ;;  %v2099_v21 = vadd.f32 %v7113_v28, %v2063_v29  ;;  %v2100_v22 = vadd.f32 %v2084_v40, %v2064_v30  ;;  %v1938_v16 = vadd.f32 %v7212_v63, %v1882_v56  ;;  %v7360_v40 = vld [vmem:[#allocation3 + $0x1c8] sm:$0xff]  ;;  %v8883_v29 = vld [vmem:[#allocation37_spill] sm:$0xff] }
 0x27d   : > { %v2632_v25 = vadd.f32 %v8871_v23, %v2600_v55  ;;  %v2050_v28 = vmul.f32 %v7349_v10, %v7279_v46  ;;  %v2665_v43 = vadd.f32 %v8876_v49, %v2633_v5  ;;  %v1939_v11 = vadd.f32 %v7233_v62, %v1883_v15  ;;  %v8889_v56 = vld [vmem:[#allocation54_spill] sm:$0xff] }
 0x27e   : > { %v2065_v32 = vadd.f32 %v7133_v60, %v2009_v6  ;;  %v2135_v4 = vadd.f32 %v2119_v26, %v2099_v21  ;;  %v2051_v33 = vmul.f32 %v7349_v10, %v7281_v45  ;;  %v2136_v35 = vadd.f32 %v2120_v53, %v2100_v22  ;;  %v8877_v45 = vld [vmem:[#allocation47_spill] sm:$0xff]  ;;  %v8878_v53 = vld [vmem:[#allocation66_spill] sm:$0xff]  ;;  %v8887_v6 = vld [vmem:[#allocation45_spill] sm:$0xff] }
 0x27f   : > { %v2664_v24 = vadd.f32 %v8874_v44, %v2632_v25  ;;  %v1974_v26 = vadd.f32 %v7221_v1, %v1938_v16  ;;  %v2086_v63 = vmul.f32 %v7309_v59, %v7271_v20  ;;  %v2087_v62 = vmul.f32 %v7309_v59, %v7273_v7  ;;  %v8886_v25 = vld [vmem:[#allocation61_spill] sm:$0xff] }
 0x280   : > { %v2101_v41 = vadd.f32 %v2085_v37, %v2065_v32  ;;  %v2145_v60 = vpack.c.bf16 %v2135_v4, %v2134_v18  ;;  %v1975_v37 = vadd.f32 %v7224_v17, %v1939_v11  ;;  %v2683_v1 = vpack.c.bf16 %v7258_v52, %v7247_v31  ;;  %v7375_v17 = vld [vmem:[#allocation10 + $0x7] ss:$0 sm:$0xff]  ;;  %v7405_v4 = vld [vmem:[#allocation3 + $0x1ef] sm:$0xff]  ;;  %v8890_v22 = vld [vmem:[#allocation57_spill] sm:$0xff] }
 0x281   : > { %v2680_v46 = vpack.c.bf16 %v2665_v43, %v2664_v24  ;;  %v2010_v14 = vadd.f32 %v8877_v45, %v1974_v26  ;;  %v2524_v20 = vadd.f32 %v7244_v42, %v7249_v51  ;;  %v2525_v61 = vadd.f32 %v8878_v53, %v7260_v34  ;;  %v7383_v31 = vld [vmem:[#allocation3 + $0x1d1] sm:$0xff]  ;;  %v7403_v24 = vld [vmem:[#allocation3 + $0x1e7] sm:$0xff] }
 0x282   : > { %v2137_v47 = vadd.f32 %v2121_v48, %v2101_v41  ;;  %4504 = vmatmul.mubr.bf16.gmra.mrb[24].mxu0 %v2145_v60  ;;  %v8879_v48 = vld [vmem:[#allocation48_spill] sm:$0xff]  ;;  %v2540_v7 = vmul.f32 %v7375_v17, %v7360_v40  ;;  %v2541_v12 = vmul.f32 %v7375_v17, %v7362_v38  ;;  %v2592_v13 = vmul.f32 %v7349_v10, %v8883_v29  ;;  %v8892_v43 = vld [vmem:[#allocation55_spill] sm:$0xff]  ;;  %v8895_v26 = vld [vmem:[#allocation50_spill] sm:$0xff] }
 0x283   : > { %4527 = vmatprep.mubr.bf16.mxu1 %v2680_v46  ;;  %v2011_v55 = vadd.f32 %v8879_v48, %v1975_v37  ;;  %v8880_v42 = vld [vmem:[#allocation24_spill] sm:$0xff]  ;;  %v2066_v34 = vadd.f32 %v2050_v28, %v2010_v14  ;;  %v2593_v57 = vmul.f32 %v7349_v10, %v8884_v39  ;;  %v2624_v23 = vmul.f32 %v7309_v59, %v8885_v50  ;;  %v8891_v28 = vld [vmem:[#allocation49_spill] sm:$0xff]  ;;  %v8894_v60 = vld [vmem:[#allocation67_spill] sm:$0xff] }
 0x284   : > { %v2146_v58 = vpack.c.bf16 %v2137_v47, %v2136_v35  ;;  %v8881_v51 = vld [vmem:[#allocation28_spill] sm:$0xff]  ;;  %v8888_v54 = vpack.c.bf16 %v8886_v25, %v8887_v6  ;;  %v2556_v18 = vadd.f32 %v2540_v7, %v2524_v20  ;;  %v2557_v30 = vadd.f32 %v2541_v12, %v2525_v61  ;;  %v7421_v20 = vld [vmem:[#allocation10 + $0x1] ss:$0 sm:$0xff]  ;;  %v8896_v53 = vld [vmem:[#allocation53_spill] sm:$0xff] }
 0x285   : > { %v8882_v52 = vpack.c.bf16 %v8880_v42, %v8881_v51  ;;  %v2067_v21 = vadd.f32 %v2051_v33, %v2011_v55  ;;  %v2102_v2 = vadd.f32 %v2086_v63, %v2066_v34  ;;  %v2625_v27 = vmul.f32 %v7309_v59, %v8889_v56  ;;  %v8893_v11 = vld [vmem:[#allocation56_spill] sm:$0xff]  ;;  %v7425_v12 = vld [vmem:[#allocation3 + $0x1e8] sm:$0xff]  ;;  %v7427_v42 = vld [vmem:[#allocation3 + $0x1f0] sm:$0xff] }
 0x286   : > { %4507 = vmatprep.mubr.bf16.mxu0 %v2146_v58  ;;  %v2656_v5 = vmul.f32 %v7320_v19, %v7381_v9  ;;  %v2657_v44 = vmul.f32 %v7320_v19, %v7383_v31  ;;  %v2608_v0 = vadd.f32 %v2592_v13, %v2556_v18  ;;  %v2609_v15 = vadd.f32 %v2593_v57, %v2557_v30  ;;  %v2366_v58 = vld [vmem:[#allocation3 + $0x227] sm:$0xff]  ;;  %v8897_v51 = vld [vmem:[#allocation51_spill] sm:$0xff] }
 0x287   : > { %4528 = vmatmul.mubr.bf16.vlgmr.msra.gmra.mrb[16].mxu1 %v8882_v52  ;;  %v2103_v32 = vadd.f32 %v2087_v62, %v2067_v21  ;;  %v2378_v16 = vmul.f32 %v7262_v8, %v8890_v22  ;;  %v2138_v49 = vadd.f32 %v8891_v28, %v2102_v2  ;;  %v2379_v41 = vmul.f32 %v7262_v8, %v8892_v43  ;;  %v7431_v13 = vld [vmem:[#allocation10 + $0x4] ss:$0 sm:$0xff]  ;;  %v2364_v18 = vld [vmem:[#allocation3 + $0x207] sm:$0xff] }
 0x288   : > { %4531 = vmatprep.mubr.bf16.mxu1 %v8888_v54  ;;  %v2394_v33 = vmul.f32 %v7275_v36, %v8893_v11  ;;  %v2395_v35 = vmul.f32 %v7275_v36, %v8894_v60  ;;  %v2640_v46 = vadd.f32 %v2624_v23, %v2608_v0  ;;  %v2641_v47 = vadd.f32 %v2625_v27, %v2609_v15  ;;  %v2365_v30 = vld [vmem:[#allocation3 + $0x20f] sm:$0xff] }
 0x289   : > { %v2139_v63 = vadd.f32 %v8895_v26, %v2103_v32  ;;  %v2426_v37 = vmul.f32 %v7266_v3, %v7403_v24  ;;  %v2427_v14 = vmul.f32 %v7266_v3, %v7405_v4  ;;  %v2478_v61 = vmul.f32 %v7421_v20, %v8896_v53  ;;  %v7452_v15 = vld [vmem:[#allocation3 + $0x1e9] sm:$0xff]  ;;  %v7454_v22 = vld [vmem:[#allocation3 + $0x1f1] sm:$0xff] }
 0x28a   : > { %v2410_v62 = vadd.f32 %v2394_v33, %v2378_v16  ;;  %v2411_v45 = vadd.f32 %v2395_v35, %v2379_v41  ;;  %v2672_v55 = vadd.f32 %v2656_v5, %v2640_v46  ;;  %v2673_v7 = vadd.f32 %v2657_v44, %v2641_v47  ;;  %v2464_v35 = vld [vmem:[#allocation3 + $0x208] sm:$0xff] }
 0x28b   : > { %v2147_v48 = vpack.c.bf16 %v2139_v63, %v2138_v49  ;;  %v2479_v52 = vmul.f32 %v7421_v20, %v8897_v51  ;;  %v2510_v39 = vmul.f32 %v7431_v13, %v7360_v40  ;;  %v2511_v57 = vmul.f32 %v7431_v13, %v7362_v38  ;;  %v2367_v26 = vld [vmem:[#allocation3 + $0x22f] sm:$0xff] }
 0x28c   : > { %v2442_v34 = vadd.f32 %v2426_v37, %v2410_v62  ;;  %v2443_v29 = vadd.f32 %v2427_v14, %v2411_v45  ;;  %v2684_v23 = vpack.c.bf16 %v2673_v7, %v2672_v55  ;;  %v7438_v25 = vmul.f32 %v7266_v3, %v2366_v58  ;;  %v2465_v37 = vld [vmem:[#allocation3 + $0x210] sm:$0xff] }
 0x28d   : > { %4508 = vmatmul.mubr.bf16.gmra.mrb[28].mxu0 %v2147_v48  ;;  %v2543_v21 = vmul.f32 %v7375_v17, %v7427_v42  ;;  %v2594_v2 = vmul.f32 %v7349_v10, %v8885_v50  ;;  %v2595_v27 = vmul.f32 %v7349_v10, %v8889_v56  ;;  %v2626_v5 = vmul.f32 %v7309_v59, %v7381_v9 }
 0x28e   : > { %v2494_v6 = vadd.f32 %v2478_v61, %v2442_v34  ;;  %v2495_v54 = vadd.f32 %v2479_v52, %v2443_v29  ;;  %v2380_v44 = vmul.f32 %v7262_v8, %v8893_v11  ;;  %v2381_v16 = vmul.f32 %v7262_v8, %v8894_v60 }
 0x28f   : > { %4532 = vmatmul.mubr.bf16.gmra.mrb[20].mxu1 %v2683_v1  ;;  %v2542_v1 = vmul.f32 %v7375_v17, %v7425_v12  ;;  %v2396_v50 = vmul.f32 %v7275_v36, %v7403_v24  ;;  %v2627_v56 = vmul.f32 %v7309_v59, %v7383_v31  ;;  %v2397_v28 = vmul.f32 %v7275_v36, %v7405_v4 }
 0x290   : > { %4535 = vmatprep.mubr.bf16.mxu1 %v2684_v23  ;;  %v2526_v32 = vadd.f32 %v2510_v39, %v2494_v6  ;;  %v2527_v0 = vadd.f32 %v2511_v57, %v2495_v54  ;;  %v2428_v49 = vmul.f32 %v7266_v3, %v2364_v18  ;;  %v2429_v43 = vmul.f32 %v7266_v3, %v2365_v30 }
 0x291   : > { %v2412_v33 = vadd.f32 %v2396_v50, %v2380_v44  ;;  %v2480_v60 = vmul.f32 %v7421_v20, %v7360_v40  ;;  %v2658_v63 = vmul.f32 %v7320_v19, %v7452_v15  ;;  %v2659_v46 = vmul.f32 %v7320_v19, %v7454_v22 }
 0x292   : > { %v2558_v41 = vadd.f32 %v2542_v1, %v2526_v32  ;;  %v2559_v11 = vadd.f32 %v2543_v21, %v2527_v0  ;;  %v2413_v47 = vadd.f32 %v2397_v28, %v2381_v16  ;;  %v2481_v62 = vmul.f32 %v7421_v20, %v7362_v38  ;;  %v2580_v21 = vld [vmem:[#allocation3 + $0x209] sm:$0xff] }
 0x293   : > { %v2444_v53 = vadd.f32 %v2428_v49, %v2412_v33  ;;  %v2512_v61 = vmul.f32 %v7431_v13, %v7425_v12  ;;  %v2513_v40 = vmul.f32 %v7431_v13, %v7427_v42  ;;  %v2544_v48 = vmul.f32 %v7375_v17, %v2464_v35 }
 0x294   : > { %v2610_v45 = vadd.f32 %v2594_v2, %v2558_v41  ;;  %v2611_v14 = vadd.f32 %v2595_v27, %v2559_v11  ;;  %v2445_v58 = vadd.f32 %v2429_v43, %v2413_v47  ;;  %v2431_v55 = vmul.f32 %v7266_v3, %v2367_v26  ;;  %v2581_v2 = vld [vmem:[#allocation3 + $0x211] sm:$0xff] }
 0x295   : > { %v2496_v52 = vadd.f32 %v2480_v60, %v2444_v53  ;;  %v2545_v34 = vmul.f32 %v7375_v17, %v2465_v37  ;;  %v2596_v29 = vmul.f32 %v7349_v10, %v7381_v9  ;;  %v2597_v39 = vmul.f32 %v7349_v10, %v7383_v31  ;;  %v7504_v60 = vld [vmem:[#allocation2 + $0x8] sm:$0xff]  ;;  %v2583_v47 = vld [vmem:[#allocation3 + $0x231] sm:$0xff] }
 0x296   : > { %v2642_v7 = vadd.f32 %v2626_v5, %v2610_v45  ;;  %v2643_v51 = vadd.f32 %v2627_v56, %v2611_v14  ;;  %v2497_v38 = vadd.f32 %v2481_v62, %v2445_v58  ;;  %v2382_v57 = vmul.f32 %v7262_v8, %v7403_v24 }
 0x297   : > { %v2528_v54 = vadd.f32 %v2512_v61, %v2496_v52  ;;  %v2383_v3 = vmul.f32 %v7262_v8, %v7405_v4  ;;  %v2628_v27 = vmul.f32 %v7309_v59, %v7452_v15  ;;  %v2398_v9 = vmul.f32 %v7275_v36, %v2364_v18  ;;  %v4746_v52 = vld [vmem:[#allocation13 + $0x18] sm:$0xff]  }
 0x298   : > { %v2674_v23 = vadd.f32 %v2658_v63, %v2642_v7  ;;  %v2675_v6 = vadd.f32 %v2659_v46, %v2643_v51  ;;  %v2529_v1 = vadd.f32 %v2513_v40, %v2497_v38  ;;  %v2399_v5 = vmul.f32 %v7275_v36, %v2365_v30  ;;  %v4743_v7 = vld [vmem:[#allocation13] sm:$0xff]   ;;  %v4744_v51 = vld [vmem:[#allocation13 + $0x8] sm:$0xff]  }
 0x299   : > { %v2560_v44 = vadd.f32 %v2544_v48, %v2528_v54  ;;  %v2629_v24 = vmul.f32 %v7309_v59, %v7454_v22  ;;  %v2482_v32 = vmul.f32 %v7421_v20, %v7425_v12  ;;  %v2414_v8 = vadd.f32 %v2398_v9, %v2382_v57  ;;  %4543 = vmatprep.subr.bf16.mxu0 %v4743_v7  ;;  %v4749_v38 = vld [vmem:[#allocation13 + $0x28] sm:$0xff]   ;;  %v4752_v57 = vld [vmem:[#allocation13 + $0x10] sm:$0xff]   ;;  %v4755_v54 = vld [vmem:[#allocation13 + $0x20] sm:$0xff]  }
 0x29a   : > { %v2685_v31 = vpack.c.bf16 %v2675_v6, %v2674_v23  ;;  %v2561_v0 = vadd.f32 %v2545_v34, %v2529_v1  ;;  %v2415_v4 = vadd.f32 %v2399_v5, %v2383_v3  ;;  %v2483_v16 = vmul.f32 %v7421_v20, %v7427_v42  ;;  %4544 = vmatpush3.bf16.msra.mxu0 %v4743_v7  ;;  %v4747_v34 = vld [vmem:[#allocation13 + $0x20] sm:$0xff]   ;;  %v4753_v23 = vld [vmem:[#allocation13 + $0x38] sm:$0xff]   ;;  %v4756_v3 = vld [vmem:[#allocation13 + $0x28] sm:$0xff]  }
 0x29b   : > { %v2612_v50 = vadd.f32 %v2596_v29, %v2560_v44  ;;  %v2660_v18 = vmul.f32 %v7320_v19, %v2580_v21  ;;  %v2661_v36 = vmul.f32 %v7320_v19, %v2581_v2  ;;  %v2514_v30 = vmul.f32 %v7431_v13, %v2464_v35  ;;  %4545 = vmatprep.subr.bf16.mxu0 %v4744_v51  ;;  %v4750_v29 = vld [vmem:[#allocation13 + $0x8] sm:$0xff]   ;;  %v4754_v6 = vld [vmem:[#allocation13 + $0x18] sm:$0xff]   ;;  %v4757_v1 = vld [vmem:[#allocation13 + $0x30] sm:$0xff]  }
 0x29c   : > { %4536 = vmatmul.mubr.bf16.gmra.mrb[24].mxu1 %v2685_v31  ;;  %v2613_v56 = vadd.f32 %v2597_v39, %v2561_v0  ;;  %v2446_v28 = vadd.f32 %v7438_v25, %v2414_v8  ;;  %v2447_v49 = vadd.f32 %v2431_v55, %v2415_v4  ;;  %v2515_v12 = vmul.f32 %v7431_v13, %v2465_v37  ;;  %v2582_v13 = vld [vmem:[#allocation3 + $0x229] sm:$0xff] }
 0x29d   : > { %v2644_v43 = vadd.f32 %v2628_v27, %v2612_v50  ;;  %v2546_v20 = vmul.f32 %v7504_v60, %v7375_v17  ;;  %v2598_v42 = vmul.f32 %v7349_v10, %v7452_v15  ;;  %v2599_v35 = vmul.f32 %v7349_v10, %v7454_v22  ;;  %v4751_v39 = vld [vmem:[#allocation13 + $0x30] sm:$0xff]  }
 0x29e   : > { %v2645_v41 = vadd.f32 %v2629_v24, %v2613_v56  ;;  %v2498_v11 = vadd.f32 %v2482_v32, %v2446_v28  ;;  %v2499_v33 = vadd.f32 %v2483_v16, %v2447_v49  ;;  %v2630_v37 = vmul.f32 %v7309_v59, %v2580_v21  ;;  %4546 = vmatpush3.bf16.msra.mxu0 %v4744_v51  ;;  %v7519_v21 = vld [vmem:[%s8594_s6] ss:$0 sm:$0xff]  ;;  %v2892_v56 = vld [vmem:[#allocation2 + $0xf] sm:$0xff]  ;;  %v7551_v49 = vld [vmem:[%s8595_s7 + $0x6] ss:$0 sm:$0xff] }
 0x29f   : > { %v2676_v26 = vadd.f32 %v2660_v18, %v2644_v43  ;;  %v2631_v53 = vmul.f32 %v7309_v59, %v2581_v2  ;;  %v2662_v15 = vmul.f32 %v7320_v19, %v2582_v13  ;;  %v2663_v10 = vmul.f32 %v7320_v19, %v2583_v47  ;;  %v4745_v59 = vld [vmem:[#allocation13 + $0x10] sm:$0xff]   ;;  %v4748_v19 = vld [vmem:[#allocation13] sm:$0xff]   ;;  %v4758_v2 = vld [vmem:[#allocation13 + $0x38] sm:$0xff]  }
 0x2a0   : > { %v2677_v25 = vadd.f32 %v2661_v36, %v2645_v41  ;;  %v2530_v63 = vadd.f32 %v2514_v30, %v2498_v11  ;;  %v2531_v46 = vadd.f32 %v2515_v12, %v2499_v33  ;;  %4547 = vmatprep.subr.bf16.mxu0 %v4745_v59  ;;  %4575 = vmatprep.subr.bf16.mxu1 %v4748_v19  ;;  %v7540_v18 = vld [vmem:[%s8595_s7] ss:$0 sm:$0xff]  ;;  %v2891_v36 = vld [vmem:[#allocation2 + $0x7] sm:$0xff]  ;;  %v7545_v30 = vld [vmem:[%s8595_s7 + $0x3] ss:$0 sm:$0xff] }
 0x2a1   : > { %4576 = vmatpush3.bf16.msra.mxu1 %v4748_v19  ;;  %v2915_v28 = vmul.f32 %v7540_v18, %v2891_v36  ;;  %v2916_v41 = vmul.f32 %v7540_v18, %v2892_v56  ;;  %v7563_v33 = vld [vmem:[%s8595_s7 + $0x1] ss:$0 sm:$0xff] }
 0x2a2   : > { %v2686_v62 = vpack.c.bf16 %v2677_v25, %v2676_v26  ;;  %v2562_v45 = vadd.f32 %v2546_v20, %v2530_v63  ;;  %v2563_v14 = vadd.f32 %v2546_v20, %v2531_v46  ;;  %4548 = vmatpush3.bf16.msra.mxu0 %v4745_v59  ;;  %4577 = vmatprep.subr.bf16.mxu1 %v4750_v29  ;;  %v7578_v46 = vld [vmem:[%s8595_s7 + $0x4] ss:$0 sm:$0xff] }
 0x2a3   : > { %4549 = vmatprep.subr.bf16.mxu0 %v4746_v52  ;;  %v3027_v63 = vmul.f32 %v7504_v60, %v7563_v33  ;;  %8898 = vst [vmem:[#allocation62_spill] sm:$0xff] %v7578_v46  ;;  %v7590_v60 = vld [vmem:[%s8595_s7 + $0x2] ss:$0 sm:$0xff] }
 0x2a4   : > { %4539 = vmatprep.mubr.bf16.mxu1 %v2686_v62  ;;  %v2614_v17 = vadd.f32 %v2598_v42, %v2562_v45  ;;  %v2615_v61 = vadd.f32 %v2599_v35, %v2563_v14  ;;  %v3131_v62 = vld [vmem:[#allocation2 + $0x9] sm:$0xff]  ;;  %v7585_v45 = vld [vmem:[%s8595_s7 + $0x7] ss:$0 sm:$0xff] }
 0x2a5   : > { %4578 = vmatpush3.bf16.msra.mxu1 %v4750_v29 }
 0x2a6   : > { %v2646_v22 = vadd.f32 %v2630_v37, %v2614_v17  ;;  %v2647_v58 = vadd.f32 %v2631_v53, %v2615_v61  ;;  %4550 = vmatpush3.bf16.msra.mxu0 %v4746_v52  ;;  %4579 = vmatprep.subr.bf16.mxu1 %v4752_v57  ;;  %v3132_v61 = vld [vmem:[#allocation2 + $0x11] sm:$0xff] }
 0x2a7   : > { %4551 = vmatprep.subr.bf16.mxu0 %v4747_v34  ;;  %v3156_v52 = vmul.f32 %v7590_v60, %v3132_v61 }
 0x2a8   : > { %v2678_v40 = vadd.f32 %v2662_v15, %v2646_v22  ;;  %v2679_v48 = vadd.f32 %v2663_v10, %v2647_v58  ;;  %v3155_v15 = vmul.f32 %v7590_v60, %v3131_v62 }
 0x2a9   : > { %4580 = vmatpush3.bf16.msra.mxu1 %v4752_v57 }
 0x2aa   : > { %v2687_v55 = vpack.c.bf16 %v2679_v48, %v2678_v40  ;;  %4552 = vmatpush3.bf16.msra.mxu0 %v4747_v34  ;;  %4581 = vmatprep.subr.bf16.mxu1 %v4754_v6  ;;  %v7602_v48 = vld [vmem:[%s8595_s7 + $0x5] ss:$0 sm:$0xff] }
 0x2ab   : > { %4553 = vmatprep.subr.bf16.mxu0 %v4749_v38 }
 0x2ac   : > { %4540 = vmatmul.mubr.bf16.gmra.mrb[28].mxu1 %v2687_v55 }
 0x2ad   : > { %4582 = vmatpush3.bf16.msra.mxu1 %v4754_v6 }
 0x2ae   : > { %4554 = vmatpush3.bf16.msra.mxu0 %v4749_v38  ;;  %4583 = vmatprep.subr.bf16.mxu1 %v4755_v54 }
 0x2af   : > { %4555 = vmatprep.subr.bf16.mxu0 %v4751_v39 }
 0x2b1   : > { %4584 = vmatpush3.bf16.msra.mxu1 %v4755_v54 }
 0x2b2   : > { %4556 = vmatpush3.bf16.msra.mxu0 %v4751_v39  ;;  %4585 = vmatprep.subr.bf16.mxu1 %v4756_v3  ;;  %v7611_v39 = vld [vmem:[%s8595_s7 + $0x8] ss:$0 sm:$0xff] }
 0x2b3   : > { %4557 = vmatprep.subr.bf16.mxu0 %v4753_v23 }
 0x2b5   : > { %4586 = vmatpush3.bf16.msra.mxu1 %v4756_v3 }
 0x2b6   : > { %4558 = vmatpush3.bf16.msra.mxu0 %v4753_v23  ;;  %4587 = vmatprep.subr.bf16.mxu1 %v4757_v1 }
 0x2b9   : > { %4588 = vmatpush3.bf16.msra.mxu1 %v4757_v1 }
 0x2ba   : > { %4589 = vmatprep.subr.bf16.mxu1 %v4758_v2 }
 0x2bd   : > { %4590 = vmatpush3.bf16.msra.mxu1 %v4758_v2 }
 0x30d   : > { %v4497_v27 = vpop.f32.mrb[16].mxu0 }
 0x30e   : > { %v2261_v9 = vadd.f32 %v4497_v27, %v7519_v21  ;;  %v2252_v5 = vpop.f32.mrb[17].mxu0 }
 0x30f   : > { %v2253_v31 = vadd.f32 %v7519_v21, %v2252_v5  ;;  %v4498_v44 = vpop.f32.mrb[18].mxu0 }
 0x310   : > { %v7523_v24 = vmax.f32 %v2261_v9, 0.0  ;;  %v2264_v32 = vadd.f32 %v4498_v44, %v7519_v21  ;;  %v2255_v0 = vpop.f32.mrb[19].mxu0 }
 0x311   : > { %v7526_v8 = vmax.f32 %v2253_v31, 0.0  ;;  %v2256_v4 = vadd.f32 %v7519_v21, %v2255_v0 }
 0x312   : > { %2333 = vst [vmem:[#allocation2 + $0x48] sm:$0xff] %v7523_v24  ;;  %v7530_v16 = vmax.f32 %v2264_v32, 0.0  ;;  %v3099_v40 = vmul.f32 %v7585_v45, %v7523_v24 }
 0x313   : > { %2331 = vst [vmem:[#allocation2 + $0x28] sm:$0xff] %v7526_v8  ;;  %v7533_v50 = vmax.f32 %v2256_v4, 0.0  ;;  %v3063_v17 = vmul.f32 %v7578_v46, %v7526_v8  ;;  %v3029_v62 = vmul.f32 %v7563_v33, %v7526_v8 }
 0x314   : > { %2334 = vst [vmem:[#allocation2 + $0x50] sm:$0xff] %v7530_v16  ;;  %v3100_v51 = vmul.f32 %v7585_v45, %v7530_v16  ;;  %v3066_v61 = vmul.f32 %v7578_v46, %v7530_v16 }
 0x315   : > { %2332 = vst [vmem:[#allocation2 + $0x30] sm:$0xff] %v7533_v50  ;;  %v3064_v22 = vmul.f32 %v7578_v46, %v7533_v50 }
 0x319   : > { %v7555_v43 = vld [vmem:[#allocation2 + $0x47] sm:$0xff] }
 0x31a   : > { %v7553_v12 = vld [vmem:[#allocation2 + $0x27] sm:$0xff]  ;;  %v2971_v25 = vmul.f32 %v7551_v49, %v7555_v43 }
 0x31b   : > { %v2935_v11 = vmul.f32 %v7545_v30, %v7553_v12  ;;  %v7567_v42 = vld [vmem:[#allocation2 + $0x4f] sm:$0xff] }
 0x31c   : > { %v7565_v20 = vld [vmem:[#allocation2 + $0x2f] sm:$0xff]  ;;  %v2972_v47 = vmul.f32 %v7551_v49, %v7567_v42 }
 0x31d   : > { %v2936_v35 = vmul.f32 %v7545_v30, %v7565_v20  ;;  %v2951_v26 = vadd.f32 %v2935_v11, %v2915_v28  ;;  %v3133_v55 = vld [vmem:[#allocation2 + $0x29] sm:$0xff]  ;;  %v3134_v34 = vld [vmem:[#allocation2 + $0x31] sm:$0xff] }
 0x31e   : > { %v3191_v29 = vmul.f32 %v7602_v48, %v3133_v55  ;;  %v3135_v57 = vld [vmem:[#allocation2 + $0x49] sm:$0xff]  ;;  %v3136_v23 = vld [vmem:[#allocation2 + $0x51] sm:$0xff]  ;;  %v3192_v54 = vmul.f32 %v7602_v48, %v3134_v34 }
 0x31f   : > { %v2952_v13 = vadd.f32 %v2936_v35, %v2916_v41  ;;  %v2987_v37 = vadd.f32 %v2971_v25, %v2951_v26  ;;  %v3227_v2 = vmul.f32 %v7611_v39, %v3135_v57  ;;  %v3228_v27 = vmul.f32 %v7611_v39, %v3136_v23 }
 0x321   : > { %v2988_v14 = vadd.f32 %v2972_v47, %v2952_v13  ;;  %v3043_v53 = vadd.f32 %v3027_v63, %v2987_v37  ;;  %v2937_v13 = vmul.f32 %v7545_v30, %v7555_v43  ;;  %v2918_v47 = vmul.f32 %v7540_v18, %v7565_v20 }
 0x322   : > { %v2938_v37 = vmul.f32 %v7545_v30, %v7567_v42  ;;  %v2919_v20 = vmul.f32 %v7540_v18, %v7555_v43 }
 0x323   : > { %v3044_v10 = vadd.f32 %v3027_v63, %v2988_v14  ;;  %v3079_v58 = vadd.f32 %v3063_v17, %v3043_v53  ;;  %v2917_v63 = vmul.f32 %v7540_v18, %v7553_v12  ;;  %v3065_v14 = vmul.f32 %v7578_v46, %v7523_v24 }
 0x324   : > { %v3031_v53 = vmul.f32 %v7563_v33, %v7523_v24  ;;  %v3030_v12 = vmul.f32 %v7563_v33, %v7533_v50  ;;  %v3157_v50 = vmul.f32 %v7590_v60, %v3133_v55  ;;  %v3160_v55 = vmul.f32 %v7590_v60, %v3136_v23 }
 0x325   : > { %v3080_v7 = vadd.f32 %v3064_v22, %v3044_v10  ;;  %v3115_v59 = vadd.f32 %v3099_v40, %v3079_v58  ;;  %v2953_v8 = vadd.f32 %v2937_v13, %v2917_v63  ;;  %v3193_v22 = vmul.f32 %v7602_v48, %v3135_v57 }
 0x327   : > { %v3116_v19 = vadd.f32 %v3100_v51, %v3080_v7  ;;  %v3171_v38 = vadd.f32 %v3155_v15, %v3115_v59  ;;  %v3032_v15 = vmul.f32 %v7563_v33, %v7530_v16  ;;  %v2954_v7 = vadd.f32 %v2938_v37, %v2918_v47 }
 0x328   : > { %v3158_v51 = vmul.f32 %v7590_v60, %v3134_v34  ;;  %v3194_v59 = vmul.f32 %v7602_v48, %v3136_v23 }
 0x329   : > { %v3172_v6 = vadd.f32 %v3156_v52, %v3116_v19  ;;  %v3207_v3 = vadd.f32 %v3191_v29, %v3171_v38  ;;  %v2920_v19 = vmul.f32 %v7540_v18, %v7567_v42  ;;  %v3159_v38 = vmul.f32 %v7590_v60, %v3135_v57 }
 0x32b   : > { %v3208_v1 = vadd.f32 %v3192_v54, %v3172_v6  ;;  %v3243_v9 = vadd.f32 %v3227_v2, %v3207_v3 }
 0x32d   : > { %v3244_v5 = vadd.f32 %v3228_v27, %v3208_v1 }
 0x32f   : > { %v3259_v31 = vpack.c.bf16 %v3244_v5, %v3243_v9 }
 0x331   : > { %4559 = vmatprep.mubr.bf16.mxu0 %v3259_v31 }
 0x335   : > { %v4501_v44 = vpop.f32.mrb[20].mxu0 }
 0x336   : > { %v2277_v32 = vadd.f32 %v4501_v44, %v7519_v21  ;;  %v2268_v0 = vpop.f32.mrb[21].mxu0 }
 0x337   : > { %v2269_v4 = vadd.f32 %v7519_v21, %v2268_v0  ;;  %v4502_v36 = vpop.f32.mrb[22].mxu0 }
 0x338   : > { %v2321_v56 = vmax.f32 %v2277_v32, 0.0  ;;  %v2280_v28 = vadd.f32 %v4502_v36, %v7519_v21  ;;  %v2271_v41 = vpop.f32.mrb[23].mxu0 }
 0x339   : > { %v2319_v11 = vmax.f32 %v2269_v4, 0.0  ;;  %v2272_v35 = vadd.f32 %v7519_v21, %v2271_v41 }
 0x33a   : > { %2337 = vst [vmem:[#allocation2 + $0x88] sm:$0xff] %v2321_v56  ;;  %v2322_v26 = vmax.f32 %v2280_v28, 0.0  ;;  %v3103_v1 = vmul.f32 %v7585_v45, %v2321_v56  ;;  %v7662_v2 = vmul.f32 %v7578_v46, %v2321_v56  ;;  %v7667_v57 = vmul.f32 %v7563_v33, %v2321_v56 }
 0x33b   : > { %2335 = vst [vmem:[#allocation2 + $0x68] sm:$0xff] %v2319_v11  ;;  %v7620_v25 = vmax.f32 %v2272_v35, 0.0  ;;  %v3101_v44 = vmul.f32 %v7585_v45, %v2319_v11  ;;  %v3067_v23 = vmul.f32 %v7578_v46, %v2319_v11  ;;  %v7673_v36 = vmul.f32 %v7563_v33, %v2319_v11 }
 0x33c   : > { %2338 = vst [vmem:[#allocation2 + $0x90] sm:$0xff] %v2322_v26  ;;  %v3104_v4 = vmul.f32 %v7585_v45, %v2322_v26  ;;  %v7678_v56 = vmul.f32 %v7578_v46, %v2322_v26 }
 0x33d   : > { %2336 = vst [vmem:[#allocation2 + $0x70] sm:$0xff] %v7620_v25  ;;  %v3102_v41 = vmul.f32 %v7585_v45, %v7620_v25  ;;  %v3068_v13 = vmul.f32 %v7578_v46, %v7620_v25 }
 0x341   : > { %v2899_v58 = vld [vmem:[#allocation2 + $0x87] sm:$0xff] }
 0x342   : > { %v2897_v17 = vld [vmem:[#allocation2 + $0x67] sm:$0xff]  ;;  %v2975_v54 = vmul.f32 %v7551_v49, %v2899_v58 }
 0x343   : > { %v2973_v10 = vmul.f32 %v7551_v49, %v2897_v17  ;;  %v2939_v24 = vmul.f32 %v7545_v30, %v2897_v17  ;;  %v7652_v16 = vld [vmem:[#allocation2 + $0x8f] sm:$0xff] }
 0x344   : > { %v2898_v40 = vld [vmem:[#allocation2 + $0x6f] sm:$0xff]  ;;  %v2976_v42 = vmul.f32 %v7551_v49, %v7652_v16 }
 0x345   : > { %v2974_v43 = vmul.f32 %v7551_v49, %v2898_v40  ;;  %v2989_v52 = vadd.f32 %v2973_v10, %v2953_v8  ;;  %v2940_v29 = vmul.f32 %v7545_v30, %v2898_v40  ;;  %v2955_v6 = vadd.f32 %v2939_v24, %v2919_v20  ;;  %v7682_v37 = vld [vmem:[#allocation2 + $0x89] sm:$0xff]  ;;  %v3138_v20 = vld [vmem:[#allocation2 + $0x71] sm:$0xff] }
 0x346   : > { %v7692_v10 = vld [vmem:[#allocation2 + $0x91] sm:$0xff]  ;;  %v2921_v24 = vmul.f32 %v7540_v18, %v2897_v17 }
 0x347   : > { %v2990_v34 = vadd.f32 %v2974_v43, %v2954_v7  ;;  %v3045_v3 = vadd.f32 %v3029_v62, %v2989_v52  ;;  %v2956_v27 = vadd.f32 %v2940_v29, %v2920_v19  ;;  %v2991_v9 = vadd.f32 %v2975_v54, %v2955_v6 }
 0x348   : > { %v7685_v62 = vmul.f32 %v7563_v33, %v2322_v26  ;;  %v7696_v7 = vmul.f32 %v7540_v18, %v2899_v58  ;;  %v2942_v52 = vmul.f32 %v7545_v30, %v7652_v16  ;;  %v2922_v6 = vmul.f32 %v7540_v18, %v2898_v40 }
 0x349   : > { %v3046_v5 = vadd.f32 %v3030_v12, %v2990_v34  ;;  %v3081_v31 = vadd.f32 %v3065_v14, %v3045_v3  ;;  %v2992_v32 = vadd.f32 %v2976_v42, %v2956_v27  ;;  %v3047_v0 = vadd.f32 %v3031_v53, %v2991_v9  ;;  %v3137_v53 = vld [vmem:[#allocation2 + $0x69] sm:$0xff] }
 0x34a   : > { %v2941_v12 = vmul.f32 %v7545_v30, %v2899_v58  ;;  %v3195_v29 = vmul.f32 %v7602_v48, %v3137_v53  ;;  %v3229_v17 = vmul.f32 %v7611_v39, %v3137_v53  ;;  %v3230_v58 = vmul.f32 %v7611_v39, %v3138_v20 }
 0x34b   : > { %v3082_v28 = vadd.f32 %v3066_v61, %v3046_v5  ;;  %v3117_v35 = vadd.f32 %v3101_v44, %v3081_v31  ;;  %v3048_v63 = vadd.f32 %v3032_v15, %v2992_v32  ;;  %v3083_v47 = vadd.f32 %v3067_v23, %v3047_v0 }
 0x34c   : > { %v7690_v61 = vmul.f32 %v7563_v33, %v7620_v25  ;;  %v3196_v34 = vmul.f32 %v7602_v48, %v3138_v20  ;;  %v7712_v9 = vmul.f32 %v7590_v60, %v3137_v53  ;;  %v7715_v40 = vmul.f32 %v7590_v60, %v3138_v20 }
 0x34d   : > { %v3118_v11 = vadd.f32 %v3102_v41, %v3082_v28  ;;  %v3173_v14 = vadd.f32 %v3157_v50, %v3117_v35  ;;  %v3084_v15 = vadd.f32 %v3068_v13, %v3048_v63  ;;  %v3119_v8 = vadd.f32 %v3103_v1, %v3083_v47 }
 0x34e   : > { %v3231_v50 = vmul.f32 %v7611_v39, %v7682_v37  ;;  %v7709_v1 = vadd.f32 %v2941_v12, %v2921_v24  ;;  %v7718_v44 = vadd.f32 %v2942_v52, %v2922_v6  ;;  %v7727_v41 = vmul.f32 %v7602_v48, %v7692_v10 }
 0x34f   : > { %v3174_v26 = vadd.f32 %v3158_v51, %v3118_v11  ;;  %v3209_v43 = vadd.f32 %v3193_v22, %v3173_v14  ;;  %v3120_v25 = vadd.f32 %v3104_v4, %v3084_v15  ;;  %v3175_v19 = vadd.f32 %v3159_v38, %v3119_v8 }
 0x350   : > { %v3232_v22 = vmul.f32 %v7611_v39, %v7692_v10  ;;  %v7737_v8 = vmul.f32 %v7540_v18, %v7652_v16  ;;  %v7748_v6 = vmul.f32 %v7590_v60, %v7682_v37 }
 0x351   : > { %v3210_v54 = vadd.f32 %v3194_v59, %v3174_v26  ;;  %v3176_v51 = vadd.f32 %v3160_v55, %v3120_v25  ;;  %v3211_v3 = vadd.f32 %v3195_v29, %v3175_v19  ;;  %v3245_v38 = vadd.f32 %v3229_v17, %v3209_v43 }
 0x352   : > { %v7722_v55 = vmul.f32 %v7602_v48, %v7682_v37 }
 0x353   : > { %v3246_v42 = vadd.f32 %v3230_v58, %v3210_v54  ;;  %v3212_v31 = vadd.f32 %v3196_v34, %v3176_v51  ;;  %v3247_v28 = vadd.f32 %v3231_v50, %v3211_v3  ;;  %v7762_v58 = vmul.f32 %v7590_v60, %v7692_v10 }
 0x355   : > { %v4505_v27 = vpop.f32.mrb[24].mxu0  ;;  %v3260_v4 = vpack.c.bf16 %v3246_v42, %v3245_v38  ;;  %v3248_v14 = vadd.f32 %v3232_v22, %v3212_v31 }
 0x356   : > { %v2293_v59 = vadd.f32 %v4505_v27, %v7519_v21  ;;  %v2284_v5 = vpop.f32.mrb[25].mxu0 }
 0x357   : > { %v2285_v23 = vadd.f32 %v7519_v21, %v2284_v5  ;;  %v4506_v32 = vpop.f32.mrb[26].mxu0  ;;  %4560 = vmatmul.mubr.bf16.vlgmr.msra.gmra.mrb[32].mxu0 %v3260_v4  ;;  %v3261_v52 = vpack.c.bf16 %v3248_v14, %v3247_v28 }
 0x358   : > { %v7729_v35 = vmax.f32 %v2293_v59, 0.0  ;;  %v2296_v63 = vadd.f32 %v4506_v32, %v7519_v21  ;;  %v2287_v47 = vpop.f32.mrb[27].mxu0 }
 0x359   : > { %v2323_v53 = vmax.f32 %v2285_v23, 0.0  ;;  %v2288_v12 = vadd.f32 %v7519_v21, %v2287_v47  ;;  %4563 = vmatprep.mubr.bf16.mxu0 %v3261_v52 }
 0x35a   : > { %v4529_v0 = vpop.f32.mrb[16].mxu1  ;;  %8899 = vst [vmem:[#allocation35_spill] sm:$0xff] %v7729_v35  ;;  %2341 = vst [vmem:[#allocation2 + $0xc8] sm:$0xff] %v7729_v35  ;;  %v7740_v24 = vmax.f32 %v2296_v63, 0.0  ;;  %v7769_v51 = vmul.f32 %v7585_v45, %v7729_v35  ;;  %v7787_v38 = vmul.f32 %v7578_v46, %v7729_v35 }
 0x35b   : > { %v2795_v13 = vadd.f32 %v4529_v0, %v7519_v21  ;;  %v2786_v11 = vpop.f32.mrb[17].mxu1  ;;  %2339 = vst [vmem:[#allocation2 + $0xa8] sm:$0xff] %v2323_v53  ;;  %v2324_v25 = vmax.f32 %v2288_v12, 0.0  ;;  %v7755_v54 = vmul.f32 %v7585_v45, %v2323_v53  ;;  %v7758_v17 = vmul.f32 %v7578_v46, %v2323_v53 }
 0x35c   : > { %v2787_v20 = vadd.f32 %v7519_v21, %v2786_v11  ;;  %v4530_v15 = vpop.f32.mrb[18].mxu1  ;;  %8900 = vst [vmem:[#allocation36_spill] sm:$0xff] %v7740_v24  ;;  %2342 = vst [vmem:[#allocation2 + $0xd0] sm:$0xff] %v7740_v24  ;;  %v7773_v34 = vmul.f32 %v7585_v45, %v7740_v24  ;;  %v7780_v10 = vmul.f32 %v7563_v33, %v2323_v53 }
 0x35d   : > { %v7742_v26 = vmax.f32 %v2795_v13, 0.0  ;;  %v2798_v43 = vadd.f32 %v4530_v15, %v7519_v21  ;;  %v2789_v50 = vpop.f32.mrb[19].mxu1  ;;  %2340 = vst [vmem:[#allocation2 + $0xb0] sm:$0xff] %v2324_v25  ;;  %v7765_v22 = vmul.f32 %v7585_v45, %v2324_v25  ;;  %v7777_v3 = vmul.f32 %v7578_v46, %v2324_v25 }
 0x35e   : > { %v2849_v19 = vmax.f32 %v2787_v20, 0.0  ;;  %v2790_v29 = vadd.f32 %v7519_v21, %v2789_v50  ;;  %v7783_v27 = vmul.f32 %v7563_v33, %v2324_v25  ;;  %v7791_v59 = vmul.f32 %v7578_v46, %v7740_v24 }
 0x35f   : > { %8901 = vst [vmem:[#allocation63_spill] sm:$0xff] %v7742_v26  ;;  %2867 = vst [vmem:[#allocation2 + $0x148] sm:$0xff] %v7742_v26  ;;  %v7752_v16 = vmax.f32 %v2798_v43, 0.0  ;;  %v7808_v63 = vmul.f32 %v7578_v46, %v7742_v26  ;;  %v7820_v20 = vmul.f32 %v7585_v45, %v7742_v26 }
 0x360   : > { %2865 = vst [vmem:[#allocation2 + $0x128] sm:$0xff] %v2849_v19  ;;  %v2850_v37 = vmax.f32 %v2790_v29, 0.0  ;;  %v7794_v5 = vmul.f32 %v7563_v33, %v2849_v19  ;;  %v7800_v23 = vmul.f32 %v7578_v46, %v2849_v19  ;;  %v4509_v32 = vpop.f32.mrb[28].mxu0 }
 0x361   : > { %8902 = vst [vmem:[#allocation64_spill] sm:$0xff] %v7752_v16  ;;  %2868 = vst [vmem:[#allocation2 + $0x150] sm:$0xff] %v7752_v16  ;;  %v7812_v13 = vmul.f32 %v7578_v46, %v7752_v16  ;;  %v2309_v47 = vadd.f32 %v4509_v32, %v7519_v21  ;;  %v2300_v11 = vpop.f32.mrb[29].mxu0  ;;  %v7816_v12 = vld [vmem:[#allocation2 + $0xc7] sm:$0xff]  ;;  %v7824_v15 = vmul.f32 %v7585_v45, %v7752_v16 }
 0x362   : > { %2866 = vst [vmem:[#allocation2 + $0x130] sm:$0xff] %v2850_v37  ;;  %v4533_v42 = vpop.f32.mrb[20].mxu1  ;;  %8903 = vst [vmem:[#allocation58_spill] sm:$0xff] %v7794_v5  ;;  %v7797_v31 = vmul.f32 %v7563_v33, %v2850_v37  ;;  %v7804_v28 = vmul.f32 %v7578_v46, %v2850_v37  ;;  %v2301_v43 = vadd.f32 %v7519_v21, %v2300_v11  ;;  %v4510_v50 = vpop.f32.mrb[30].mxu0  ;;  %v2901_v29 = vld [vmem:[#allocation2 + $0xa7] sm:$0xff] }
 0x363   : > { %8905 = vst [vmem:[#allocation59_spill] sm:$0xff] %v7800_v23  ;;  %v2811_v0 = vadd.f32 %v4533_v42, %v7519_v21  ;;  %v2802_v4 = vpop.f32.mrb[21].mxu1  ;;  %8907 = vst [vmem:[#allocation21_spill] sm:$0xff] %v7808_v63  ;;  %v2979_v37 = vmul.f32 %v7551_v49, %v7816_v12  ;;  %v7830_v42 = vmax.f32 %v2309_v47, 0.0  ;;  %v2312_v32 = vadd.f32 %v4510_v50, %v7519_v21  ;;  %v7836_v46 = vld [vmem:[#allocation2 + $0xcf] sm:$0xff] }
 0x364   : > { %8904 = vst [vmem:[#allocation65_spill] sm:$0xff] %v7797_v31  ;;  %8906 = vst [vmem:[#allocation30_spill] sm:$0xff] %v7804_v28  ;;  %v2803_v14 = vadd.f32 %v7519_v21, %v2802_v4  ;;  %v4534_v53 = vpop.f32.mrb[22].mxu1  ;;  %v2303_v4 = vpop.f32.mrb[31].mxu0  ;;  %v7838_v11 = vmax.f32 %v2301_v43, 0.0  ;;  %v2902_v24 = vld [vmem:[#allocation2 + $0xaf] sm:$0xff]  ;;  %v2977_v47 = vmul.f32 %v7551_v49, %v2901_v29  ;;  %v2925_v5 = vmul.f32 %v7540_v18, %v2901_v29 }
 0x365   : > { %8908 = vst [vmem:[#allocation33_spill] sm:$0xff] %v7812_v13  ;;  %8909 = vst [vmem:[#allocation26_spill] sm:$0xff] %v7820_v20  ;;  %v2855_v52 = vmax.f32 %v2811_v0, 0.0  ;;  %v2814_v25 = vadd.f32 %v4534_v53, %v7519_v21  ;;  %v2805_v19 = vpop.f32.mrb[23].mxu1  ;;  %v2304_v0 = vadd.f32 %v7519_v21, %v2303_v4  ;;  %v3141_v35 = vld [vmem:[#allocation2 + $0xa9] sm:$0xff]  ;;  %v2978_v43 = vmul.f32 %v7551_v49, %v2902_v24  ;;  %v7865_v20 = vld [vmem:[#allocation2 + $0xd1] sm:$0xff] }
 0x366   : > { %8910 = vst [vmem:[#allocation22_spill] sm:$0xff] %v7824_v15  ;;  %v7833_v26 = vmax.f32 %v2803_v14, 0.0  ;;  %v2806_v16 = vadd.f32 %v7519_v21, %v2805_v19  ;;  %v3142_v15 = vld [vmem:[#allocation2 + $0xb1] sm:$0xff]  ;;  %2345 = vst [vmem:[#allocation2 + $0x108] sm:$0xff] %v7830_v42  ;;  %v7845_v14 = vmax.f32 %v2312_v32, 0.0  ;;  %v2993_v32 = vadd.f32 %v2977_v47, %v7709_v1 }
 0x367   : > { %2871 = vst [vmem:[#allocation2 + $0x188] sm:$0xff] %v2855_v52  ;;  %v7841_v53 = vmax.f32 %v2814_v25, 0.0  ;;  %v7852_v52 = vmul.f32 %v7611_v39, %v3141_v35  ;;  %v7854_v25 = vld [vmem:[#allocation2 + $0xc9] sm:$0xff]  ;;  %2343 = vst [vmem:[#allocation2 + $0xe8] sm:$0xff] %v7838_v11  ;;  %v7857_v19 = vmax.f32 %v2304_v0, 0.0  ;;  %v7862_v4 = vmul.f32 %v7611_v39, %v3142_v15 }
 0x368   : > { %8911 = vst [vmem:[#allocation44_spill] sm:$0xff] %v7833_v26  ;;  %2869 = vst [vmem:[#allocation2 + $0x168] sm:$0xff] %v7833_v26  ;;  %v7848_v50 = vmax.f32 %v2806_v16, 0.0  ;;  %v2943_v16 = vmul.f32 %v7545_v30, %v2901_v29  ;;  %v2994_v13 = vadd.f32 %v2978_v43, %v7718_v44  ;;  %v2944_v0 = vmul.f32 %v7545_v30, %v2902_v24 }
 0x369   : > { %8912 = vst [vmem:[#allocation23_spill] sm:$0xff] %v7841_v53  ;;  %2872 = vst [vmem:[#allocation2 + $0x190] sm:$0xff] %v7841_v53  ;;  %v2980_v53 = vmul.f32 %v7551_v49, %v7836_v46  ;;  %v3199_v1 = vmul.f32 %v7602_v48, %v3141_v35  ;;  %v3049_v47 = vadd.f32 %v7673_v36, %v2993_v32 }
 0x36a   : > { %8913 = vst [vmem:[#allocation32_spill] sm:$0xff] %v7848_v50  ;;  %2346 = vst [vmem:[#allocation2 + $0x110] sm:$0xff] %v7845_v14  ;;  %v2959_v63 = vadd.f32 %v2943_v16, %v7696_v7  ;;  %v7878_v28 = vmul.f32 %v7602_v48, %v3142_v15  ;;  %v7882_v23 = vmul.f32 %v7611_v39, %v7854_v25 }
 0x36b   : > { %2870 = vst [vmem:[#allocation2 + $0x170] sm:$0xff] %v7848_v50  ;;  %2344 = vst [vmem:[#allocation2 + $0xf0] sm:$0xff] %v7857_v19  ;;  %v3050_v44 = vadd.f32 %v7690_v61, %v2994_v13  ;;  %v2960_v43 = vadd.f32 %v2944_v0, %v7737_v8  ;;  %v7888_v31 = vmul.f32 %v7611_v39, %v7865_v20 }
 0x36c   : > { %v3085_v36 = vadd.f32 %v7662_v2, %v3049_v47  ;;  %v2995_v7 = vadd.f32 %v2979_v37, %v2959_v63  ;;  %v2926_v32 = vmul.f32 %v7540_v18, %v2902_v24  ;;  %v2945_v16 = vmul.f32 %v7545_v30, %v7816_v12 }
 0x36d   : > { %v3086_v50 = vadd.f32 %v7678_v56, %v3050_v44  ;;  %v2996_v26 = vadd.f32 %v2980_v53, %v2960_v43  ;;  %v2946_v61 = vmul.f32 %v7545_v30, %v7836_v46  ;;  %v7900_v8 = vmul.f32 %v7585_v45, %v7838_v11 }
 0x36e   : > { %v3121_v13 = vadd.f32 %v7755_v54, %v3085_v36  ;;  %v3051_v2 = vadd.f32 %v7667_v57, %v2995_v7  ;;  %v2961_v63 = vadd.f32 %v2945_v16, %v2925_v5  ;;  %v7906_v24 = vmul.f32 %v7585_v45, %v7857_v19  ;;  %v7910_v37 = vld [vmem:[#allocation2 + $0xe7] sm:$0xff] }
 0x36f   : > { %v3122_v29 = vadd.f32 %v7765_v22, %v3086_v50  ;;  %v3052_v56 = vadd.f32 %v7685_v62, %v2996_v26  ;;  %v2962_v53 = vadd.f32 %v2946_v61, %v2926_v32  ;;  %v7913_v0 = vmul.f32 %v7590_v60, %v3141_v35  ;;  %v4537_v44 = vpop.f32.mrb[24].mxu1 }
 0x370   : > { %v3177_v47 = vadd.f32 %v7712_v9, %v3121_v13  ;;  %v3087_v54 = vadd.f32 %v7758_v17, %v3051_v2  ;;  %v2981_v57 = vmul.f32 %v7551_v49, %v7910_v37  ;;  %v7920_v5 = vmul.f32 %v7590_v60, %v3142_v15  ;;  %v2818_v50 = vpop.f32.mrb[25].mxu1 }
 0x371   : > { %v3178_v22 = vadd.f32 %v7715_v40, %v3122_v29  ;;  %v3088_v62 = vadd.f32 %v7777_v3, %v3052_v56  ;;  %v7928_v35 = vmul.f32 %v7602_v48, %v7854_v25  ;;  %v7932_v9 = vmul.f32 %v7602_v48, %v7865_v20  ;;  %v4538_v36 = vpop.f32.mrb[26].mxu1 }
 0x372   : > { %v7924_v26 = vld [vmem:[#allocation2 + $0xef] sm:$0xff]  ;;  %v2827_v17 = vadd.f32 %v4537_v44, %v7519_v21  ;;  %v3213_v15 = vadd.f32 %v7722_v55, %v3177_v47  ;;  %v3123_v43 = vadd.f32 %v7769_v51, %v3087_v54  ;;  %v2819_v3 = vadd.f32 %v7519_v21, %v2818_v50  ;;  %v2821_v2 = vpop.f32.mrb[27].mxu1 }
 0x373   : > { %v2982_v40 = vmul.f32 %v7551_v49, %v7924_v26  ;;  %v3214_v7 = vadd.f32 %v7727_v41, %v3178_v22  ;;  %v3124_v32 = vadd.f32 %v7773_v34, %v3088_v62  ;;  %v2997_v16 = vadd.f32 %v2981_v57, %v2961_v63  ;;  %v7945_v51 = vld [vmem:[#allocation2 + $0xe9] sm:$0xff]  ;;  %v7950_v44 = vld [vmem:[#allocation2 + $0xf1] sm:$0xff] }
 0x374   : > { %v2859_v61 = vmax.f32 %v2827_v17, 0.0  ;;  %v2830_v13 = vadd.f32 %v4538_v36, %v7519_v21  ;;  %v3249_v29 = vadd.f32 %v7852_v52, %v3213_v15  ;;  %v3179_v55 = vadd.f32 %v7748_v6, %v3123_v43  ;;  %v7953_v52 = vld [vmem:[#allocation2 + $0x107] sm:$0xff]  ;;  %v7955_v6 = vld [vmem:[#allocation2 + $0x10f] sm:$0xff] }
 0x375   : > { %v2857_v56 = vmax.f32 %v2819_v3, 0.0  ;;  %v2822_v47 = vadd.f32 %v7519_v21, %v2821_v2  ;;  %v3250_v54 = vadd.f32 %v7862_v4, %v3214_v7  ;;  %v3180_v41 = vadd.f32 %v7762_v58, %v3124_v32  ;;  %v7957_v62 = vld [vmem:[#allocation2 + $0x127] sm:$0xff]  ;;  %v7964_v15 = vld [vmem:[#allocation2 + $0x12f] sm:$0xff] }
 0x376   : > { %2875 = vst [vmem:[#allocation2 + $0x1c8] sm:$0xff] %v2859_v61  ;;  %v2860_v34 = vmax.f32 %v2830_v13, 0.0  ;;  %v3215_v63 = vadd.f32 %v3199_v1, %v3179_v55  ;;  %v2998_v57 = vadd.f32 %v2982_v40, %v2962_v53  ;;  %v3053_v22 = vadd.f32 %v7780_v10, %v2997_v16  ;;  %v7971_v40 = vld [vmem:[#allocation2 + $0x147] sm:$0xff]  ;;  %v7973_v3 = vld [vmem:[#allocation2 + $0x14f] sm:$0xff] }
 0x377   : > { %2873 = vst [vmem:[#allocation2 + $0x1a8] sm:$0xff] %v2857_v56  ;;  %v7959_v17 = vmax.f32 %v2822_v47, 0.0  ;;  %v3262_v4 = vpack.c.bf16 %v3250_v54, %v3249_v29  ;;  %v3216_v58 = vadd.f32 %v7878_v28, %v3180_v41  ;;  %v3237_v50 = vmul.f32 %v7611_v39, %v7945_v51  ;;  %v7989_v61 = vld [vmem:[#allocation2 + $0x167] sm:$0xff]  ;;  %v7991_v13 = vld [vmem:[#allocation2 + $0x16f] sm:$0xff] }
 0x378   : > { %2876 = vst [vmem:[#allocation2 + $0x1d0] sm:$0xff] %v2860_v34  ;;  %v3251_v10 = vadd.f32 %v7882_v23, %v3215_v63  ;;  %v3054_v1 = vadd.f32 %v7783_v27, %v2998_v57  ;;  %v3089_v53 = vadd.f32 %v7787_v38, %v3053_v22  ;;  %v3238_v43 = vmul.f32 %v7611_v39, %v7950_v44 }
 0x379   : > { %2874 = vst [vmem:[#allocation2 + $0x1b0] sm:$0xff] %v7959_v17  ;;  %4564 = vmatmul.mubr.bf16.gmra.mrb[36].mxu0 %v3262_v4  ;;  %v3252_v28 = vadd.f32 %v7888_v31, %v3216_v58  ;;  %v3502_v36 = vmul.f32 %v7540_v18, %v7953_v52  ;;  %v3503_v27 = vmul.f32 %v7540_v18, %v7955_v6 }
 0x37a   : > { %v3504_v38 = vmul.f32 %v7540_v18, %v7957_v62  ;;  %v3090_v23 = vadd.f32 %v7791_v59, %v3054_v1  ;;  %v3125_v7 = vadd.f32 %v7900_v8, %v3089_v53  ;;  %v3505_v32 = vmul.f32 %v7540_v18, %v7964_v15  ;;  %v8015_v53 = vld [vmem:[#allocation2 + $0x109] sm:$0xff] }
 0x37b   : > { %v3518_v16 = vmul.f32 %v7545_v30, %v7957_v62  ;;  %v3263_v31 = vpack.c.bf16 %v3252_v28, %v3251_v10  ;;  %v3519_v2 = vmul.f32 %v7545_v30, %v7964_v15  ;;  %v3520_v29 = vmul.f32 %v7545_v30, %v7971_v40 }
 0x37c   : > { %v3521_v59 = vmul.f32 %v7545_v30, %v7973_v3  ;;  %v3126_v8 = vadd.f32 %v7906_v24, %v3090_v23  ;;  %v3181_v55 = vadd.f32 %v7913_v0, %v3125_v7  ;;  %v3550_v47 = vmul.f32 %v7551_v49, %v7971_v40  ;;  %v8914_v7 = vld [vmem:[#allocation44_spill] sm:$0xff] }
 0x37d   : > { %v3534_v56 = vadd.f32 %v3518_v16, %v3502_v36  ;;  %4567 = vmatprep.mubr.bf16.mxu0 %v3263_v31  ;;  %v3535_v54 = vadd.f32 %v3519_v2, %v3503_v27  ;;  %v3536_v41 = vadd.f32 %v3520_v29, %v3504_v38  ;;  %v3551_v63 = vmul.f32 %v7551_v49, %v7973_v3  ;;  %v8018_v27 = vld [vmem:[#allocation2 + $0x111] sm:$0xff] }
 0x37e   : > { %v3537_v34 = vadd.f32 %v3521_v59, %v3505_v32  ;;  %v3182_v57 = vadd.f32 %v7920_v5, %v3126_v8  ;;  %v3217_v22 = vadd.f32 %v7928_v35, %v3181_v55  ;;  %v3552_v24 = vmul.f32 %v7551_v49, %v7989_v61  ;;  %v8915_v16 = vld [vmem:[#allocation32_spill] sm:$0xff]  ;;  %v8916_v59 = vld [vmem:[#allocation58_spill] sm:$0xff]  ;;  %v8917_v55 = vld [vmem:[#allocation65_spill] sm:$0xff] }
 0x37f   : > { %v3553_v0 = vmul.f32 %v7551_v49, %v7991_v13  ;;  %v3566_v4 = vadd.f32 %v3550_v47, %v3534_v56  ;;  %v3567_v58 = vadd.f32 %v3551_v63, %v3535_v54  ;;  %v3602_v10 = vmul.f32 %v7563_v33, %v7830_v42  ;;  %v4541_v2 = vpop.f32.mrb[28].mxu1  ;;  %v8918_v54 = vld [vmem:[#allocation59_spill] sm:$0xff] }
 0x380   : > { %v3603_v1 = vmul.f32 %v7563_v33, %v7845_v14  ;;  %v3218_v5 = vadd.f32 %v7932_v9, %v3182_v57  ;;  %v3253_v28 = vadd.f32 %v3237_v50, %v3217_v22  ;;  %v3568_v35 = vadd.f32 %v3552_v24, %v3536_v41  ;;  %v2834_v47 = vpop.f32.mrb[29].mxu1 }
 0x381   : > { %v3569_v36 = vadd.f32 %v3553_v0, %v3537_v34  ;;  %v3618_v38 = vadd.f32 %v3602_v10, %v3566_v4  ;;  %v3668_v32 = vmul.f32 %v7585_v45, %v8914_v7  ;;  %v3669_v31 = vmul.f32 %v7585_v45, %v8915_v16  ;;  %v8919_v34 = vld [vmem:[#allocation30_spill] sm:$0xff]  ;;  %v8920_v0 = vld [vmem:[#allocation21_spill] sm:$0xff] }
 0x382   : > { %v3619_v23 = vadd.f32 %v3603_v1, %v3567_v58  ;;  %v3254_v29 = vadd.f32 %v3238_v43, %v3218_v5  ;;  %v3620_v8 = vadd.f32 %v8916_v59, %v3568_v35  ;;  %v3718_v9 = vmul.f32 %v7590_v60, %v8015_v53  ;;  %v4542_v43 = vpop.f32.mrb[30].mxu1  ;;  %v8921_v58 = vld [vmem:[#allocation33_spill] sm:$0xff] }
 0x383   : > { %v3621_v56 = vadd.f32 %v8917_v55, %v3569_v36  ;;  %v2843_v50 = vadd.f32 %v4541_v2, %v7519_v21  ;;  %v3650_v41 = vadd.f32 %v8918_v54, %v3618_v38  ;;  %v3719_v57 = vmul.f32 %v7590_v60, %v8018_v27  ;;  %v2837_v35 = vpop.f32.mrb[31].mxu1  ;;  %v8922_v36 = vld [vmem:[#allocation26_spill] sm:$0xff]  ;;  %v8041_v55 = vld [vmem:[#allocation2 + $0x131] sm:$0xff] }
 0x384   : > { %v3651_v63 = vadd.f32 %v8919_v34, %v3619_v23  ;;  %v2835_v22 = vadd.f32 %v7519_v21, %v2834_v47  ;;  %v3264_v24 = vpack.c.bf16 %v3254_v29, %v3253_v28  ;;  %v3652_v4 = vadd.f32 %v8920_v0, %v3620_v8  ;;  %v8923_v38 = vld [vmem:[#allocation22_spill] sm:$0xff]  ;;  %v8046_v34 = vld [vmem:[#allocation2 + $0x151] sm:$0xff] }
 0x385   : > { %v3653_v10 = vadd.f32 %v8921_v58, %v3621_v56  ;;  %v2863_v1 = vmax.f32 %v2843_v50, 0.0  ;;  %v2846_v5 = vadd.f32 %v4542_v43, %v7519_v21  ;;  %v3682_v2 = vadd.f32 %v8922_v36, %v3650_v41  ;;  %v8039_v23 = vld [vmem:[#allocation2 + $0x129] sm:$0xff] }
 0x386   : > { %v3683_v59 = vadd.f32 %v8923_v38, %v3651_v63  ;;  %v2861_v54 = vmax.f32 %v2835_v22, 0.0  ;;  %v2838_v47 = vadd.f32 %v7519_v21, %v2837_v35  ;;  %4568 = vmatmul.mubr.bf16.gmra.mrb[40].mxu0 %v3264_v24  ;;  %v3684_v28 = vadd.f32 %v3668_v32, %v3652_v4  ;;  %v3500_v8 = vld [vmem:[#allocation2 + $0x227] sm:$0xff]  ;;  %v8924_v24 = vld [vmem:[#allocation35_spill] sm:$0xff] }
 0x387   : > { %v3685_v29 = vadd.f32 %v3669_v31, %v3653_v10  ;;  %2879 = vst [vmem:[#allocation2 + $0x208] sm:$0xff] %v2863_v1  ;;  %v2864_v56 = vmax.f32 %v2846_v5, 0.0  ;;  %v8044_v50 = vld [vmem:[#allocation2 + $0x149] sm:$0xff]  ;;  %v3734_v41 = vadd.f32 %v3718_v9, %v3682_v2  ;;  %v3750_v22 = vmul.f32 %v7602_v48, %v8039_v23 }
 0x388   : > { %2877 = vst [vmem:[#allocation2 + $0x1e8] sm:$0xff] %v2861_v54  ;;  %v8048_v63 = vmax.f32 %v2838_v47, 0.0  ;;  %v3735_v43 = vadd.f32 %v3719_v57, %v3683_v59  ;;  %v3751_v21 = vmul.f32 %v7602_v48, %v8041_v55  ;;  %v3720_v32 = vmul.f32 %v7590_v60, %v8039_v23 }
 0x389   : > { %2880 = vst [vmem:[#allocation2 + $0x210] sm:$0xff] %v2864_v56  ;;  %v3721_v31 = vmul.f32 %v7590_v60, %v8041_v55  ;;  %v3039_v9 = vmul.f32 %v7563_v33, %v8924_v24  ;;  %v8061_v0 = vmul.f32 %v7551_v49, %v3500_v8  ;;  %v3766_v57 = vadd.f32 %v3750_v22, %v3734_v41  ;;  %v8086_v22 = vld [vmem:[#allocation2 + $0x169] sm:$0xff] }
 0x38a   : > { %2878 = vst [vmem:[#allocation2 + $0x1f0] sm:$0xff] %v8048_v63  ;;  %v3767_v4 = vadd.f32 %v3751_v21, %v3735_v43  ;;  %v3782_v58 = vmul.f32 %v7611_v39, %v8044_v50  ;;  %v3783_v10 = vmul.f32 %v7611_v39, %v8046_v34  ;;  %v3736_v1 = vadd.f32 %v3720_v32, %v3684_v28  ;;  %v8088_v21 = vld [vmem:[#allocation2 + $0x171] sm:$0xff]  ;;  %v8926_v24 = vld [vmem:[#allocation62_spill] sm:$0xff] }
 0x38b   : > { %v3737_v5 = vadd.f32 %v3721_v31, %v3685_v29  ;;  %v2927_v35 = vmul.f32 %v7540_v18, %v7816_v12  ;;  %v2928_v36 = vmul.f32 %v7540_v18, %v7836_v46  ;;  %v2947_v59 = vmul.f32 %v7545_v30, %v7910_v37  ;;  %v8925_v29 = vld [vmem:[#allocation36_spill] sm:$0xff] }
 0x38c   : > { %v3798_v2 = vadd.f32 %v3782_v58, %v3766_v57  ;;  %v3799_v38 = vadd.f32 %v3783_v10, %v3767_v4  ;;  %v2948_v54 = vmul.f32 %v7545_v30, %v7924_v26  ;;  %v3752_v47 = vmul.f32 %v7602_v48, %v8044_v50 }
 0x38d   : > { %v3753_v28 = vmul.f32 %v7602_v48, %v8046_v34  ;;  %v2983_v12 = vmul.f32 %v7551_v49, %v7953_v52  ;;  %v3040_v46 = vmul.f32 %v7563_v33, %v8925_v29  ;;  %v2963_v56 = vadd.f32 %v2947_v59, %v2927_v35  ;;  %v8106_v59 = vld [vmem:[#allocation2 + $0x187] sm:$0xff] }
 0x38e   : > { %v3814_v8 = vpack.c.bf16 %v3799_v38, %v3798_v2  ;;  %v2964_v41 = vadd.f32 %v2948_v54, %v2928_v36  ;;  %v2984_v43 = vmul.f32 %v7551_v49, %v7955_v6  ;;  %v3768_v32 = vadd.f32 %v3752_v47, %v3736_v1 }
 0x38f   : > { %v3769_v31 = vadd.f32 %v3753_v28, %v3737_v5  ;;  %v3075_v57 = vmul.f32 %v8926_v24, %v7838_v11  ;;  %v3076_v4 = vmul.f32 %v8926_v24, %v7857_v19  ;;  %v2999_v58 = vadd.f32 %v2983_v12, %v2963_v56  ;;  %v8108_v28 = vld [vmem:[#allocation2 + $0x18f] sm:$0xff] }
 0x390   : > { %4591 = vmatprep.mubr.bf16.mxu1 %v3814_v8  ;;  %v3000_v10 = vadd.f32 %v2984_v43, %v2964_v41  ;;  %v3111_v35 = vmul.f32 %v7585_v45, %v7830_v42  ;;  %v3112_v36 = vmul.f32 %v7585_v45, %v7845_v14  ;;  %v3167_v2 = vmul.f32 %v7590_v60, %v7854_v25 }
 0x391   : > { %v3168_v1 = vmul.f32 %v7590_v60, %v7865_v20  ;;  %v3784_v5 = vmul.f32 %v7611_v39, %v8086_v22  ;;  %v3785_v38 = vmul.f32 %v7611_v39, %v8088_v21  ;;  %v3055_v54 = vadd.f32 %v3039_v9, %v2999_v58 }
 0x392   : > { %v3056_v47 = vadd.f32 %v3040_v46, %v3000_v10  ;;  %v3506_v12 = vmul.f32 %v7540_v18, %v7971_v40  ;;  %v3522_v25 = vmul.f32 %v7545_v30, %v7989_v61  ;;  %v3507_v8 = vmul.f32 %v7540_v18, %v7973_v3  ;;  %v8124_v3 = vld [vmem:[#allocation2 + $0x188] sm:$0xff] }
 0x393   : > { %v3800_v29 = vadd.f32 %v3784_v5, %v3768_v32  ;;  %v3801_v20 = vadd.f32 %v3785_v38, %v3769_v31  ;;  %v3523_v56 = vmul.f32 %v7545_v30, %v7991_v13  ;;  %v3091_v41 = vadd.f32 %v3075_v57, %v3055_v54  ;;  %v8927_v30 = vld [vmem:[#allocation63_spill] sm:$0xff] }
 0x394   : > { %v3092_v43 = vadd.f32 %v3076_v4, %v3056_v47  ;;  %v3538_v9 = vadd.f32 %v3522_v25, %v3506_v12  ;;  %v3554_v46 = vmul.f32 %v7551_v49, %v8106_v59  ;;  %v3203_v40 = vmul.f32 %v7602_v48, %v7945_v51  ;;  %v8928_v47 = vld [vmem:[#allocation64_spill] sm:$0xff] }
 0x395   : > { %v3815_v58 = vpack.c.bf16 %v3801_v20, %v3800_v29  ;;  %v3539_v10 = vadd.f32 %v3523_v56, %v3507_v8  ;;  %v3555_v32 = vmul.f32 %v7551_v49, %v8108_v28  ;;  %v3127_v31 = vadd.f32 %v3111_v35, %v3091_v41 }
 0x396   : > { %v3128_v5 = vadd.f32 %v3112_v36, %v3092_v43  ;;  %v3570_v18 = vadd.f32 %v3554_v46, %v3538_v9  ;;  %v3606_v57 = vmul.f32 %v7563_v33, %v8927_v30  ;;  %v3204_v4 = vmul.f32 %v7602_v48, %v7950_v44 }
 0x397   : > { %v3239_v38 = vmul.f32 %v7611_v39, %v8015_v53  ;;  %4592 = vmatmul.mubr.bf16.vlgmr.msra.gmra.mrb[32].mxu1 %v3815_v58  ;;  %v3571_v54 = vadd.f32 %v3555_v32, %v3539_v10  ;;  %v3607_v12 = vmul.f32 %v7563_v33, %v8928_v47  ;;  %v3183_v49 = vadd.f32 %v3167_v2, %v3127_v31  ;;  %v8929_v33 = vld [vmem:[#allocation23_spill] sm:$0xff]  ;;  %v8149_v58 = vld [vmem:[%s8595_s7] ss:$0 sm:$0xff] }
 0x398   : > { %v3184_v35 = vadd.f32 %v3168_v1, %v3128_v5  ;;  %v3622_v36 = vadd.f32 %v3606_v57, %v3570_v18  ;;  %v3638_v25 = vmul.f32 %v8926_v24, %v8914_v7  ;;  %v3240_v29 = vmul.f32 %v7611_v39, %v8018_v27  ;;  %v8162_v18 = vld [vmem:[#allocation2 + $0x189] sm:$0xff] }
 0x399   : > { %v3623_v20 = vadd.f32 %v3607_v12, %v3571_v54  ;;  %v3639_v8 = vmul.f32 %v8926_v24, %v8915_v16  ;;  %v3670_v56 = vmul.f32 %v7585_v45, %v8124_v3  ;;  %v3219_v41 = vadd.f32 %v3203_v40, %v3183_v49  ;;  %v3021_v49 = vld [vmem:[#allocation2 + $0x128] sm:$0xff] }
 0x39a   : > { %v3220_v43 = vadd.f32 %v3204_v4, %v3184_v35  ;;  %v3654_v9 = vadd.f32 %v3638_v25, %v3622_v36  ;;  %v3671_v2 = vmul.f32 %v7585_v45, %v8929_v33  ;;  %v3722_v46 = vmul.f32 %v7590_v60, %v8044_v50  ;;  %v8158_v45 = vld [vmem:[%s8595_s7 + $0x3] ss:$0 sm:$0xff]  ;;  %v8170_v4 = vld [vmem:[#allocation2 + $0x191] sm:$0xff] }
 0x39b   : > { %v3655_v1 = vadd.f32 %v3639_v8, %v3623_v20  ;;  %v2929_v24 = vmul.f32 %v8149_v58, %v7910_v37  ;;  %v2930_v40 = vmul.f32 %v8149_v58, %v7924_v26  ;;  %v3255_v10 = vadd.f32 %v3239_v38, %v3219_v41 }
 0x39c   : > { %v3256_v32 = vadd.f32 %v3240_v29, %v3220_v43  ;;  %v3686_v31 = vadd.f32 %v3670_v56, %v3654_v9  ;;  %v2949_v50 = vmul.f32 %v8158_v45, %v7953_v52  ;;  %v3723_v37 = vmul.f32 %v7590_v60, %v8046_v34  ;;  %v8175_v52 = vld [vmem:[%s8595_s7 + $0x6] ss:$0 sm:$0xff]  ;;  %v3022_v29 = vld [vmem:[#allocation2 + $0x130] sm:$0xff]  ;;  %v8199_v43 = vld [vmem:[%s8595_s7 + $0x4] ss:$0 sm:$0xff] }
 0x39d   : > { %v3687_v5 = vadd.f32 %v3671_v2, %v3655_v1  ;;  %v3754_v26 = vmul.f32 %v7602_v48, %v8086_v22  ;;  %v2950_v30 = vmul.f32 %v8158_v45, %v7955_v6  ;;  %v2985_v47 = vmul.f32 %v8175_v52, %v7957_v62  ;;  %v8188_v62 = vld [vmem:[%s8595_s7 + $0x1] ss:$0 sm:$0xff] }
 0x39e   : > { %v3265_v57 = vpack.c.bf16 %v3256_v32, %v3255_v10  ;;  %v3738_v38 = vadd.f32 %v3722_v46, %v3686_v31  ;;  %v2965_v54 = vadd.f32 %v2949_v50, %v2929_v24  ;;  %v3755_v34 = vmul.f32 %v7602_v48, %v8088_v21  ;;  %v8214_v10 = vld [vmem:[#allocation2 + $0x1af] sm:$0xff] }
 0x39f   : > { %v3739_v60 = vadd.f32 %v3723_v37, %v3687_v5  ;;  %v2966_v12 = vadd.f32 %v2950_v30, %v2930_v40  ;;  %v2986_v6 = vmul.f32 %v8175_v52, %v7964_v15  ;;  %v3786_v36 = vmul.f32 %v7611_v39, %v8162_v18  ;;  %v8212_v40 = vld [vmem:[#allocation2 + $0x1a7] sm:$0xff] }
 0x3a0   : > { %4571 = vmatprep.mubr.bf16.mxu0 %v3265_v57  ;;  %v3770_v35 = vadd.f32 %v3754_v26, %v3738_v38  ;;  %v3001_v25 = vadd.f32 %v2985_v47, %v2965_v54  ;;  %v3041_v48 = vmul.f32 %v8188_v62, %v7838_v11  ;;  %v3787_v15 = vmul.f32 %v7611_v39, %v8170_v4  ;;  %v8208_v39 = vld [vmem:[%s8595_s7 + $0x7] ss:$0 sm:$0xff]  ;;  %v8240_v54 = vld [vmem:[%s8595_s7 + $0x5] ss:$0 sm:$0xff] }
 0x3a1   : > { %v3771_v20 = vadd.f32 %v3755_v34, %v3739_v60  ;;  %v3002_v8 = vadd.f32 %v2986_v6, %v2966_v12  ;;  %v3042_v56 = vmul.f32 %v8188_v62, %v7857_v19  ;;  %v3077_v9 = vmul.f32 %v8199_v43, %v7830_v42  ;;  %v8249_v6 = vld [vmem:[%s8595_s7 + $0x8] ss:$0 sm:$0xff] }
 0x3a2   : > { %v3057_v41 = vadd.f32 %v3041_v48, %v3001_v25  ;;  %v3078_v11 = vmul.f32 %v8199_v43, %v7845_v14  ;;  %v3113_v2 = vmul.f32 %v8208_v39, %v3021_v49  ;;  %v3802_v19 = vadd.f32 %v3786_v36, %v3770_v35  ;;  %v8219_v14 = vld [vmem:[%s8595_s7 + $0x2] ss:$0 sm:$0xff]  ;;  %v8253_v35 = vld [vmem:[#allocation2 + $0x1a8] sm:$0xff] }
 0x3a3   : > { %v3803_v1 = vadd.f32 %v3787_v15, %v3771_v20  ;;  %v3058_v46 = vadd.f32 %v3042_v56, %v3002_v8  ;;  %v3114_v24 = vmul.f32 %v8208_v39, %v3022_v29  ;;  %v3169_v32 = vmul.f32 %v8219_v14, %v7945_v51 }
 0x3a4   : > { %v3093_v42 = vadd.f32 %v3077_v9, %v3057_v41  ;;  %v3508_v31 = vmul.f32 %v8149_v58, %v7989_v61  ;;  %v3509_v50 = vmul.f32 %v8149_v58, %v7991_v13  ;;  %v3524_v26 = vmul.f32 %v8158_v45, %v8106_v59 }
 0x3a5   : > { %v3816_v5 = vpack.c.bf16 %v3803_v1, %v3802_v19  ;;  %v3094_v37 = vadd.f32 %v3078_v11, %v3058_v46  ;;  %v3525_v30 = vmul.f32 %v8158_v45, %v8108_v28  ;;  %v3170_v38 = vmul.f32 %v8219_v14, %v7950_v44 }
 0x3a6   : > { %v3129_v57 = vadd.f32 %v3113_v2, %v3093_v42  ;;  %v3556_v51 = vmul.f32 %v8175_v52, %v8212_v40  ;;  %v3557_v61 = vmul.f32 %v8175_v52, %v8214_v10  ;;  %v3205_v47 = vmul.f32 %v8240_v54, %v8015_v53  ;;  %v8277_v42 = vld [vmem:[#allocation2 + $0x1cf] sm:$0xff] }
 0x3a7   : > { %4595 = vmatprep.mubr.bf16.mxu1 %v3816_v5  ;;  %v3130_v13 = vadd.f32 %v3114_v24, %v3094_v37  ;;  %v3540_v60 = vadd.f32 %v3524_v26, %v3508_v31  ;;  %v3541_v34 = vadd.f32 %v3525_v30, %v3509_v50  ;;  %v3206_v44 = vmul.f32 %v8240_v54, %v8018_v27  ;;  %v8275_v24 = vld [vmem:[#allocation2 + $0x1c7] sm:$0xff]  ;;  %v8281_v31 = vld [vmem:[#allocation2 + $0x1b1] sm:$0xff] }
 0x3a8   : > { %v3185_v12 = vadd.f32 %v3169_v32, %v3129_v57  ;;  %v3241_v49 = vmul.f32 %v8249_v6, %v8039_v23  ;;  %v3608_v36 = vmul.f32 %v8188_v62, %v8914_v7  ;;  %v3609_v48 = vmul.f32 %v8188_v62, %v8915_v16  ;;  %v8279_v32 = vld [vmem:[#allocation2 + $0x1a9] sm:$0xff] }
 0x3a9   : > { %v3186_v53 = vadd.f32 %v3170_v38, %v3130_v13  ;;  %v3572_v25 = vadd.f32 %v3556_v51, %v3540_v60  ;;  %v3573_v29 = vadd.f32 %v3557_v61, %v3541_v34  ;;  %v3242_v20 = vmul.f32 %v8249_v6, %v8041_v55  ;;  %v8301_v34 = vld [vmem:[#allocation2 + $0x1c8] sm:$0xff] }
 0x3aa   : > { %v3221_v27 = vadd.f32 %v3205_v47, %v3185_v12  ;;  %v3640_v15 = vmul.f32 %v8199_v43, %v8124_v3  ;;  %v3641_v23 = vmul.f32 %v8199_v43, %v8929_v33  ;;  %v3672_v7 = vmul.f32 %v8208_v39, %v8253_v35  ;;  %v8303_v12 = vld [vmem:[#allocation2 + $0x1d0] sm:$0xff] }
 0x3ab   : > { %v3222_v8 = vadd.f32 %v3206_v44, %v3186_v53  ;;  %v3624_v56 = vadd.f32 %v3608_v36, %v3572_v25  ;;  %v3625_v41 = vadd.f32 %v3609_v48, %v3573_v29  ;;  %v3673_v9 = vmul.f32 %v8208_v39, %v7959_v17 }
 0x3ac   : > { %v3724_v16 = vmul.f32 %v8219_v14, %v8086_v22  ;;  %v3725_v55 = vmul.f32 %v8219_v14, %v8088_v21  ;;  %v3756_v11 = vmul.f32 %v8240_v54, %v8162_v18  ;;  %v3257_v2 = vadd.f32 %v3241_v49, %v3221_v27 }
 0x3ad   : > { %v3258_v19 = vadd.f32 %v3242_v20, %v3222_v8  ;;  %v3656_v1 = vadd.f32 %v3640_v15, %v3624_v56  ;;  %v3657_v46 = vadd.f32 %v3641_v23, %v3625_v41  ;;  %v3510_v22 = vmul.f32 %v8149_v58, %v8106_v59  ;;  %v8319_v56 = vld [vmem:[#allocation2 + $0x1ef] sm:$0xff] }
 0x3ae   : > { %v3511_v21 = vmul.f32 %v8149_v58, %v8108_v28  ;;  %v3526_v50 = vmul.f32 %v8158_v45, %v8212_v40  ;;  %v3527_v5 = vmul.f32 %v8158_v45, %v8214_v10  ;;  %v3757_v57 = vmul.f32 %v8240_v54, %v8170_v4 }
 0x3af   : > { %v3266_v37 = vpack.c.bf16 %v3258_v19, %v3257_v2  ;;  %v3688_v26 = vadd.f32 %v3672_v7, %v3656_v1  ;;  %v3689_v30 = vadd.f32 %v3673_v9, %v3657_v46  ;;  %v3558_v59 = vmul.f32 %v8175_v52, %v8275_v24 }
 0x3b0   : > { %v3542_v38 = vadd.f32 %v3526_v50, %v3510_v22  ;;  %v3543_v51 = vadd.f32 %v3527_v5, %v3511_v21  ;;  %v3559_v28 = vmul.f32 %v8175_v52, %v8277_v42  ;;  %v3788_v47 = vmul.f32 %v8249_v6, %v8279_v32  ;;  %v8337_v50 = vld [vmem:[#allocation2 + $0x1d1] sm:$0xff] }
 0x3b1   : > { %4572 = vmatmul.mubr.bf16.gmra.mrb[44].mxu0 %v3266_v37  ;;  %v3740_v61 = vadd.f32 %v3724_v16, %v3688_v26  ;;  %v3741_v13 = vadd.f32 %v3725_v55, %v3689_v30  ;;  %v3789_v60 = vmul.f32 %v8249_v6, %v8281_v31  ;;  %v3610_v36 = vmul.f32 %v8188_v62, %v8124_v3  ;;  %v8317_v3 = vld [vmem:[#allocation2 + $0x1e7] sm:$0xff] }
 0x3b2   : > { %v3574_v44 = vadd.f32 %v3558_v59, %v3542_v38  ;;  %v3575_v49 = vadd.f32 %v3559_v28, %v3543_v51  ;;  %v3611_v53 = vmul.f32 %v8188_v62, %v8929_v33  ;;  %v3642_v48 = vmul.f32 %v8199_v43, %v8253_v35  ;;  %v8347_v28 = vld [vmem:[#allocation2 + $0x1e8] sm:$0xff] }
 0x3b3   : > { %v3772_v25 = vadd.f32 %v3756_v11, %v3740_v61  ;;  %v3773_v29 = vadd.f32 %v3757_v57, %v3741_v13  ;;  %v3643_v27 = vmul.f32 %v8199_v43, %v7959_v17  ;;  %v3674_v23 = vmul.f32 %v8208_v39, %v8301_v34  ;;  %v8325_v11 = vld [vmem:[#allocation2 + $0x1c9] sm:$0xff] }
 0x3b4   : > { %v3626_v20 = vadd.f32 %v3610_v36, %v3574_v44  ;;  %v3627_v15 = vadd.f32 %v3611_v53, %v3575_v49  ;;  %v3675_v8 = vmul.f32 %v8208_v39, %v8303_v12  ;;  %v3726_v7 = vmul.f32 %v8219_v14, %v8162_v18 }
 0x3b5   : > { %v3804_v33 = vadd.f32 %v3788_v47, %v3772_v25  ;;  %v3805_v41 = vadd.f32 %v3789_v60, %v3773_v29  ;;  %v3512_v9 = vmul.f32 %v8149_v58, %v8212_v40  ;;  %v3513_v2 = vmul.f32 %v8149_v58, %v8214_v10 }
 0x3b6   : > { %v3658_v16 = vadd.f32 %v3642_v48, %v3626_v20  ;;  %v3659_v55 = vadd.f32 %v3643_v27, %v3627_v15  ;;  %v3528_v19 = vmul.f32 %v8158_v45, %v8275_v24  ;;  %v3529_v46 = vmul.f32 %v8158_v45, %v8277_v42 }
 0x3b7   : > { %v3817_v1 = vpack.c.bf16 %v3805_v41, %v3804_v33  ;;  %v3560_v18 = vmul.f32 %v8175_v52, %v8317_v3  ;;  %v3561_v40 = vmul.f32 %v8175_v52, %v8319_v56  ;;  %v3727_v10 = vmul.f32 %v8219_v14, %v8170_v4 }
 0x3b8   : > { %v3690_v22 = vadd.f32 %v3674_v23, %v3658_v16  ;;  %v3691_v21 = vadd.f32 %v3675_v8, %v3659_v55  ;;  %v3544_v5 = vadd.f32 %v3528_v19, %v3512_v9  ;;  %v3758_v37 = vmul.f32 %v8240_v54, %v8279_v32  ;;  %v3499_v23 = vld [vmem:[#allocation2 + $0x20f] sm:$0xff] }
 0x3b9   : > { %4596 = vmatmul.mubr.bf16.gmra.mrb[36].mxu1 %v3817_v1  ;;  %v3759_v26 = vmul.f32 %v8240_v54, %v8281_v31  ;;  %v3790_v30 = vmul.f32 %v8249_v6, %v8325_v11  ;;  %v3545_v57 = vadd.f32 %v3529_v46, %v3513_v2  ;;  %v3612_v4 = vmul.f32 %v8188_v62, %v8253_v35  ;;  %v8376_v1 = vld [vmem:[#allocation2 + $0x1e9] sm:$0xff] }
 0x3ba   : > { %v3742_v38 = vadd.f32 %v3726_v7, %v3690_v22  ;;  %v3743_v51 = vadd.f32 %v3727_v10, %v3691_v21  ;;  %v3576_v59 = vadd.f32 %v3560_v18, %v3544_v5  ;;  %v3791_v61 = vmul.f32 %v8249_v6, %v8337_v50 }
 0x3bb   : > { %v3577_v13 = vadd.f32 %v3561_v40, %v3545_v57  ;;  %v3613_v47 = vmul.f32 %v8188_v62, %v7959_v17  ;;  %v3644_v60 = vmul.f32 %v8199_v43, %v8301_v34  ;;  %v3645_v53 = vmul.f32 %v8199_v43, %v8303_v12  ;;  %v3498_v17 = vld [vmem:[#allocation2 + $0x207] sm:$0xff] }
 0x3bc   : > { %v3774_v44 = vadd.f32 %v3758_v37, %v3742_v38  ;;  %v3775_v49 = vadd.f32 %v3759_v26, %v3743_v51  ;;  %v3628_v36 = vadd.f32 %v3612_v4, %v3576_v59  ;;  %v3676_v35 = vmul.f32 %v8208_v39, %v8347_v28  ;;  %v3598_v26 = vld [vmem:[#allocation2 + $0x208] sm:$0xff] }
 0x3bd   : > { %v3629_v25 = vadd.f32 %v3613_v47, %v3577_v13  ;;  %v3677_v29 = vmul.f32 %v8208_v39, %v8048_v63  ;;  %v3728_v48 = vmul.f32 %v8219_v14, %v8279_v32  ;;  %v3514_v8 = vmul.f32 %v8149_v58, %v8275_v24  ;;  %v8378_v24 = vld [vmem:[#allocation2 + $0x1f1] sm:$0xff] }
 0x3be   : > { %v3806_v27 = vadd.f32 %v3790_v30, %v3774_v44  ;;  %v3807_v20 = vadd.f32 %v3791_v61, %v3775_v49  ;;  %v3660_v15 = vadd.f32 %v3644_v60, %v3628_v36  ;;  %v3515_v41 = vmul.f32 %v8149_v58, %v8277_v42  ;;  %v3599_v30 = vld [vmem:[#allocation2 + $0x210] sm:$0xff] }
 0x3bf   : > { %v3661_v33 = vadd.f32 %v3645_v53, %v3629_v25  ;;  %v3530_v7 = vmul.f32 %v8158_v45, %v8317_v3  ;;  %v3531_v9 = vmul.f32 %v8158_v45, %v8319_v56  ;;  %v3729_v55 = vmul.f32 %v8219_v14, %v8281_v31  ;;  %v3501_v38 = vld [vmem:[#allocation2 + $0x22f] sm:$0xff] }
 0x3c0   : > { %v3818_v16 = vpack.c.bf16 %v3807_v20, %v3806_v27  ;;  %v3692_v32 = vadd.f32 %v3676_v35, %v3660_v15  ;;  %v3562_v2 = vmul.f32 %v8175_v52, %v3498_v17  ;;  %v3563_v18 = vmul.f32 %v8175_v52, %v3499_v23 }
 0x3c1   : > { %v3693_v19 = vadd.f32 %v3677_v29, %v3661_v33  ;;  %v3546_v46 = vadd.f32 %v3530_v7, %v3514_v8  ;;  %v3547_v42 = vadd.f32 %v3531_v9, %v3515_v41  ;;  %v3760_v22 = vmul.f32 %v8240_v54, %v8325_v11  ;;  %v3714_v7 = vld [vmem:[#allocation2 + $0x209] sm:$0xff]  ;;  %v3715_v9 = vld [vmem:[#allocation2 + $0x211] sm:$0xff] }
 0x3c2   : > { %4599 = vmatprep.mubr.bf16.mxu1 %v3818_v16  ;;  %v3744_v40 = vadd.f32 %v3728_v48, %v3692_v32  ;;  %v3761_v21 = vmul.f32 %v8240_v54, %v8337_v50  ;;  %v3614_v31 = vmul.f32 %v8188_v62, %v8301_v34  ;;  %v3615_v57 = vmul.f32 %v8188_v62, %v8303_v12  ;;  %v4789_v32 = vld [vmem:[#allocation2 + $0x8] sm:$0xff] }
 0x3c3   : > { %v3745_v10 = vadd.f32 %v3729_v55, %v3693_v19  ;;  %v3578_v5 = vadd.f32 %v3562_v2, %v3546_v46  ;;  %v3579_v37 = vadd.f32 %v3563_v18, %v3547_v42  ;;  %v3792_v59 = vmul.f32 %v8249_v6, %v8376_v1 }
 0x3c4   : > { %v3776_v51 = vadd.f32 %v3760_v22, %v3744_v40  ;;  %v3793_v4 = vmul.f32 %v8249_v6, %v8378_v24  ;;  %v3646_v61 = vmul.f32 %v8199_v43, %v8347_v28  ;;  %v3647_v60 = vmul.f32 %v8199_v43, %v8048_v63 }
 0x3c5   : > { %v3777_v34 = vadd.f32 %v3761_v21, %v3745_v10  ;;  %v3630_v13 = vadd.f32 %v3614_v31, %v3578_v5  ;;  %v3631_v47 = vadd.f32 %v3615_v57, %v3579_v37  ;;  %v3678_v12 = vmul.f32 %v8208_v39, %v3598_v26  ;;  %v3717_v37 = vld [vmem:[#allocation2 + $0x231] sm:$0xff] }
 0x3c6   : > { %v3808_v44 = vadd.f32 %v3792_v59, %v3776_v51  ;;  %v3679_v49 = vmul.f32 %v8208_v39, %v3599_v30  ;;  %v3565_v36 = vmul.f32 %v8175_v52, %v3501_v38  ;;  %v3516_v29 = vmul.f32 %v8149_v58, %v8317_v3 }
 0x3c7   : > { %v3809_v53 = vadd.f32 %v3793_v4, %v3777_v34  ;;  %v3662_v25 = vadd.f32 %v3646_v61, %v3630_v13  ;;  %v3663_v35 = vadd.f32 %v3647_v60, %v3631_v47  ;;  %v3730_v48 = vmul.f32 %v8219_v14, %v8325_v11  ;;  %v3436_v60 = vld [vmem:[%s5364_s29 + $0x10] sm:$0xff] }
 0x3c8   : > { %v3517_v27 = vmul.f32 %v8149_v58, %v8319_v56  ;;  %v3532_v20 = vmul.f32 %v8158_v45, %v3498_v17  ;;  %v3533_v15 = vmul.f32 %v8158_v45, %v3499_v23  ;;  %v3731_v52 = vmul.f32 %v8219_v14, %v8337_v50 }
 0x3c9   : > { %v3819_v8 = vpack.c.bf16 %v3809_v53, %v3808_v44  ;;  %v3694_v33 = vadd.f32 %v3678_v12, %v3662_v25  ;;  %v3695_v41 = vadd.f32 %v3679_v49, %v3663_v35  ;;  %v3680_v11 = vmul.f32 %v4789_v32, %v8208_v39  ;;  %v3434_v49 = vld [vmem:[%s5364_s29] sm:$0xff]  ;;  %v3437_v53 = vld [vmem:[%s5364_s29 + $0x18] sm:$0xff] }
 0x3ca   : > { %v3548_v16 = vadd.f32 %v3532_v20, %v3516_v29  ;;  %v3549_v3 = vadd.f32 %v3533_v15, %v3517_v27  ;;  %v3762_v56 = vmul.f32 %v8240_v54, %v8376_v1  ;;  %v3763_v45 = vmul.f32 %v8240_v54, %v8378_v24  ;;  %v3441_v32 = vld [vmem:[%s5364_s29 + $0x38] sm:$0xff] }
 0x3cb   : > { %4600 = vmatmul.mubr.bf16.gmra.mrb[40].mxu1 %v3819_v8  ;;  %v3746_v55 = vadd.f32 %v3730_v48, %v3694_v33  ;;  %v3747_v58 = vadd.f32 %v3731_v52, %v3695_v41  ;;  %v3616_v50 = vmul.f32 %v8188_v62, %v8347_v28  ;;  %v3617_v2 = vmul.f32 %v8188_v62, %v8048_v63  ;;  %v3716_v28 = vld [vmem:[#allocation2 + $0x229] sm:$0xff] }
 0x3cc   : > { %v3580_v17 = vadd.f32 %v8061_v0, %v3548_v16  ;;  %v3581_v23 = vadd.f32 %v3565_v36, %v3549_v3  ;;  %v3794_v46 = vmul.f32 %v8249_v6, %v3714_v7  ;;  %v3795_v42 = vmul.f32 %v8249_v6, %v3715_v9  ;;  %v3435_v48 = vld [vmem:[%s5364_s29 + $0x8] sm:$0xff]  ;;  %v3440_v41 = vld [vmem:[%s5364_s29 + $0x30] sm:$0xff] }
 0x3cd   : > { %v3778_v19 = vadd.f32 %v3762_v56, %v3746_v55  ;;  %v3779_v39 = vadd.f32 %v3763_v45, %v3747_v58  ;;  %v3648_v22 = vmul.f32 %v8199_v43, %v3598_v26  ;;  %v3649_v21 = vmul.f32 %v8199_v43, %v3599_v30  ;;  %v3439_v56 = vld [vmem:[%s5364_s29 + $0x28] sm:$0xff] }
 0x3ce   : > { %v3632_v18 = vadd.f32 %v3616_v50, %v3580_v17  ;;  %v3633_v40 = vadd.f32 %v3617_v2, %v3581_v23  ;;  %v3732_v38 = vmul.f32 %v8219_v14, %v8376_v1  ;;  %v3733_v51 = vmul.f32 %v8219_v14, %v8378_v24 }
 0x3cf   : > { %v3810_v0 = vadd.f32 %v3794_v46, %v3778_v19  ;;  %v3811_v31 = vadd.f32 %v3795_v42, %v3779_v39  ;;  %v3796_v26 = vmul.f32 %v8249_v6, %v3716_v28  ;;  %v3797_v43 = vmul.f32 %v8249_v6, %v3717_v37  ;;  %v8435_v6 = vld [vmem:[%s8930_s25] ss:$0 sm:$0xff]  ;;  %v3444_v19 = vld [vmem:[%s5364_s29 + $0x50] sm:$0xff] }
 0x3d0   : > { %v3664_v10 = vadd.f32 %v3648_v22, %v3632_v18  ;;  %v3665_v5 = vadd.f32 %v3649_v21, %v3633_v40  ;;  %v3764_v4 = vmul.f32 %v8240_v54, %v3714_v7  ;;  %v3765_v61 = vmul.f32 %v8240_v54, %v3715_v9  ;;  %v3438_v9 = vld [vmem:[%s5364_s29 + $0x20] sm:$0xff]  ;;  %v3445_v22 = vld [vmem:[%s5364_s29 + $0x58] sm:$0xff] }
 0x3d1   : > { %v3820_v57 = vpack.c.bf16 %v3811_v31, %v3810_v0  ;;  %v3442_v42 = vld [vmem:[%s5364_s29 + $0x40] sm:$0xff] }
 0x3d2   : > { %v3696_v63 = vadd.f32 %v3680_v11, %v3664_v10  ;;  %v3697_v62 = vadd.f32 %v3680_v11, %v3665_v5  ;;  %v3443_v10 = vld [vmem:[%s5364_s29 + $0x48] sm:$0xff] }
 0x3d3   : > { %4603 = vmatprep.mubr.bf16.mxu1 %v3820_v57 }
 0x3d4   : > { %v3748_v30 = vadd.f32 %v3732_v38, %v3696_v63  ;;  %v3749_v59 = vadd.f32 %v3733_v51, %v3697_v62  ;;  %v4282_v62 = vld [vmem:[%s5364_s29 + $0x90] sm:$0xff] }
 0x3d6   : > { %v3780_v34 = vadd.f32 %v3764_v4, %v3748_v30  ;;  %v3781_v13 = vadd.f32 %v3765_v61, %v3749_v59  ;;  %v4283_v59 = vld [vmem:[%s5364_s29 + $0x98] sm:$0xff] }
 0x3d8   : > { %v3812_v1 = vadd.f32 %v3796_v26, %v3780_v34  ;;  %v3813_v47 = vadd.f32 %v3797_v43, %v3781_v13  ;;  %v4280_v26 = vld [vmem:[%s5364_s29 + $0x80] sm:$0xff]  ;;  %v4281_v13 = vld [vmem:[%s5364_s29 + $0x88] sm:$0xff] }
 0x3da   : > { %v3821_v14 = vpack.c.bf16 %v3813_v47, %v3812_v1 }
 0x3dc   : > { %4604 = vmatmul.mubr.bf16.gmra.mrb[44].mxu1 %v3821_v14 }
 0x42a   : > { %v4561_v24 = vpop.f32.mrb[32].mxu0 }
 0x42b   : > { %v3380_v44 = vadd.f32 %v4561_v24, %v8435_v6  ;;  %v3371_v12 = vpop.f32.mrb[33].mxu0 }
 0x42c   : > { %v3372_v54 = vadd.f32 %v8435_v6, %v3371_v12  ;;  %v4562_v36 = vpop.f32.mrb[34].mxu0 }
 0x42d   : > { %v3452_v25 = vadd.f32 %v3436_v60, %v3380_v44  ;;  %v3383_v35 = vadd.f32 %v4562_v36, %v8435_v6  ;;  %v3374_v29 = vpop.f32.mrb[35].mxu0  ;;  %v3448_v44 = vld [vmem:[%s5364_s29 + $0x70] sm:$0xff] }
 0x42e   : > { %v3450_v27 = vadd.f32 %v3434_v49, %v3372_v54  ;;  %v3375_v20 = vadd.f32 %v8435_v6, %v3374_v29  ;;  %v3446_v54 = vld [vmem:[%s5364_s29 + $0x60] sm:$0xff] }
 0x42f   : > { %3468 = vst [vmem:[%s8447_s23 + $0x10] sm:$0xff] %v3452_v25  ;;  %v3453_v15 = vadd.f32 %v3437_v53, %v3383_v35  ;;  %v3449_v25 = vld [vmem:[%s5364_s29 + $0x78] sm:$0xff] }
 0x430   : > { %3466 = vst [vmem:[%s8447_s23] sm:$0xff] %v3450_v27  ;;  %v3451_v8 = vadd.f32 %v3435_v48, %v3375_v20  ;;  %v3447_v27 = vld [vmem:[%s5364_s29 + $0x68] sm:$0xff] }
 0x431   : > { %3469 = vst [vmem:[%s8447_s23 + $0x18] sm:$0xff] %v3453_v15 }
 0x432   : > { %3467 = vst [vmem:[%s8447_s23 + $0x8] sm:$0xff] %v3451_v8 }
 0x44c   : > { %v4565_v33 = vpop.f32.mrb[36].mxu0 }
 0x44d   : > { %v3396_v52 = vadd.f32 %v4565_v33, %v8435_v6  ;;  %v3387_v7 = vpop.f32.mrb[37].mxu0 }
 0x44e   : > { %v3388_v16 = vadd.f32 %v8435_v6, %v3387_v7  ;;  %v4566_v3 = vpop.f32.mrb[38].mxu0 }
 0x44f   : > { %v3456_v11 = vadd.f32 %v3440_v41, %v3396_v52  ;;  %v3399_v55 = vadd.f32 %v4566_v3, %v8435_v6  ;;  %v3390_v58 = vpop.f32.mrb[39].mxu0  ;;  %v4286_v52 = vld [vmem:[%s5364_s29 + $0xb0] sm:$0xff] }
 0x450   : > { %v3454_v45 = vadd.f32 %v3438_v9, %v3388_v16  ;;  %v3391_v17 = vadd.f32 %v8435_v6, %v3390_v58  ;;  %v4284_v16 = vld [vmem:[%s5364_s29 + $0xa0] sm:$0xff] }
 0x451   : > { %3472 = vst [vmem:[%s8447_s23 + $0x30] sm:$0xff] %v3456_v11  ;;  %v3457_v23 = vadd.f32 %v3441_v32, %v3399_v55  ;;  %v4287_v11 = vld [vmem:[%s5364_s29 + $0xb8] sm:$0xff] }
 0x452   : > { %3470 = vst [vmem:[%s8447_s23 + $0x20] sm:$0xff] %v3454_v45  ;;  %v3455_v50 = vadd.f32 %v3439_v56, %v3391_v17  ;;  %v4285_v45 = vld [vmem:[%s5364_s29 + $0xa8] sm:$0xff] }
 0x453   : > { %3473 = vst [vmem:[%s8447_s23 + $0x38] sm:$0xff] %v3457_v23 }
 0x454   : > { %3471 = vst [vmem:[%s8447_s23 + $0x28] sm:$0xff] %v3455_v50 }
 0x459   : > { %v4569_v2 = vpop.f32.mrb[40].mxu0 }
 0x45a   : > { %v3412_v39 = vadd.f32 %v4569_v2, %v8435_v6  ;;  %v3403_v46 = vpop.f32.mrb[41].mxu0 }
 0x45b   : > { %v3404_v18 = vadd.f32 %v8435_v6, %v3403_v46  ;;  %v4570_v40 = vpop.f32.mrb[42].mxu0 }
 0x45c   : > { %v3460_v21 = vadd.f32 %v3444_v19, %v3412_v39  ;;  %v3415_v0 = vadd.f32 %v4570_v40, %v8435_v6  ;;  %v3406_v31 = vpop.f32.mrb[43].mxu0  ;;  %v4290_v39 = vld [vmem:[%s5364_s29 + $0xd0] sm:$0xff] }
 0x45d   : > { %v3458_v5 = vadd.f32 %v3442_v42, %v3404_v18  ;;  %v3407_v28 = vadd.f32 %v8435_v6, %v3406_v31  ;;  %v4288_v18 = vld [vmem:[%s5364_s29 + $0xc0] sm:$0xff] }
 0x45e   : > { %3476 = vst [vmem:[%s8447_s23 + $0x50] sm:$0xff] %v3460_v21  ;;  %v3461_v37 = vadd.f32 %v3445_v22, %v3415_v0  ;;  %v4291_v21 = vld [vmem:[%s5364_s29 + $0xd8] sm:$0xff] }
 0x45f   : > { %3474 = vst [vmem:[%s8447_s23 + $0x40] sm:$0xff] %v3458_v5  ;;  %v3459_v57 = vadd.f32 %v3443_v10, %v3407_v28  ;;  %v4289_v5 = vld [vmem:[%s5364_s29 + $0xc8] sm:$0xff] }
 0x460   : > { %3477 = vst [vmem:[%s8447_s23 + $0x58] sm:$0xff] %v3461_v37 }
 0x461   : > { %3475 = vst [vmem:[%s8447_s23 + $0x48] sm:$0xff] %v3459_v57 }
 0x46a   : > { %v4593_v63 = vpop.f32.mrb[32].mxu1 }
 0x46b   : > { %v3929_v38 = vadd.f32 %v4593_v63, %v8435_v6  ;;  %v3920_v51 = vpop.f32.mrb[33].mxu1 }
 0x46c   : > { %v3921_v43 = vadd.f32 %v8435_v6, %v3920_v51  ;;  %v4594_v30 = vpop.f32.mrb[34].mxu1 }
 0x46d   : > { %v4001_v4 = vadd.f32 %v4282_v62, %v3929_v38  ;;  %v3932_v61 = vadd.f32 %v4594_v30, %v8435_v6  ;;  %v3923_v34 = vpop.f32.mrb[35].mxu1  ;;  %v4294_v38 = vld [vmem:[%s5364_s29 + $0xf0] sm:$0xff] }
 0x46e   : > { %v3999_v1 = vadd.f32 %v4280_v26, %v3921_v43  ;;  %v3924_v47 = vadd.f32 %v8435_v6, %v3923_v34  ;;  %v4292_v43 = vld [vmem:[%s5364_s29 + $0xe0] sm:$0xff] }
 0x46f   : > { %4298 = vst [vmem:[%s8447_s23 + $0x90] sm:$0xff] %v4001_v4  ;;  %v4002_v14 = vadd.f32 %v4283_v59, %v3932_v61  ;;  %v4295_v4 = vld [vmem:[%s5364_s29 + $0xf8] sm:$0xff] }
 0x470   : > { %4296 = vst [vmem:[%s8447_s23 + $0x80] sm:$0xff] %v3999_v1  ;;  %v4000_v24 = vadd.f32 %v4281_v13, %v3924_v47  ;;  %v4293_v1 = vld [vmem:[%s5364_s29 + $0xe8] sm:$0xff]  ;;  %s4960_s29 = scalar_lea.vmem %s8541_s1, 4096 }
 0x471   : > { %4299 = vst [vmem:[%s8447_s23 + $0x98] sm:$0xff] %v4002_v14  ;;  %p4961_p7 = scmp.ne.s32.totalorder %s8541_s1, %s4960_s29  ;;  %p4968_p0 = scmp.lt.s32.totalorder %s4966_s9, %s4960_s29 }
 0x472   : > { %4297 = vst [vmem:[%s8447_s23 + $0x88] sm:$0xff] %v4000_v24 }
 0x473   : > { %p4962_p12 = pnand %p4961_p7, %p8932_p4  ;;  %p4969_p2 = por %p4968_p0, %p4967_p13 }
 0x475   : > { %p4963_p1 = pneg %p4962_p12 }
 0x477   : > { %p4970_p8 = pnand %p4969_p2, %p4963_p1 }
 0x484   : > { %v4573_v60 = vpop.f32.mrb[44].mxu0 }
 0x485   : > { %v3428_v12 = vadd.f32 %v4573_v60, %v8435_v6  ;;  %v3419_v49 = vpop.f32.mrb[45].mxu0 }
 0x486   : > { %v3420_v36 = vadd.f32 %v8435_v6, %v3419_v49  ;;  %v4574_v53 = vpop.f32.mrb[46].mxu0 }
 0x487   : > { %v3464_v35 = vadd.f32 %v3448_v44, %v3428_v12  ;;  %v3431_v29 = vadd.f32 %v4574_v53, %v8435_v6  ;;  %v3422_v48 = vpop.f32.mrb[47].mxu0 }
 0x488   : > { %v3462_v20 = vadd.f32 %v3446_v54, %v3420_v36  ;;  %v3423_v15 = vadd.f32 %v8435_v6, %v3422_v48 }
 0x489   : > { %3480 = vst [vmem:[%s8447_s23 + $0x70] sm:$0xff] %v3464_v35  ;;  %v3465_v8 = vadd.f32 %v3449_v25, %v3431_v29 }
 0x48a   : > { %3478 = vst [vmem:[%s8447_s23 + $0x60] sm:$0xff] %v3462_v20  ;;  %v3463_v33 = vadd.f32 %v3447_v27, %v3423_v15 }
 0x48b   : > { %3481 = vst [vmem:[%s8447_s23 + $0x78] sm:$0xff] %v3465_v8 }
 0x48c   : > { %v4597_v41 = vpop.f32.mrb[36].mxu1  ;;  %3479 = vst [vmem:[%s8447_s23 + $0x68] sm:$0xff] %v3463_v33 }
 0x48d   : > { %v3945_v7 = vadd.f32 %v4597_v41, %v8435_v6  ;;  %v3936_v9 = vpop.f32.mrb[37].mxu1 }
 0x48e   : > { %v3937_v3 = vadd.f32 %v8435_v6, %v3936_v9  ;;  %v4598_v32 = vpop.f32.mrb[38].mxu1 }
 0x48f   : > { %v4005_v55 = vadd.f32 %v4286_v52, %v3945_v7  ;;  %v3948_v58 = vadd.f32 %v4598_v32, %v8435_v6  ;;  %v3939_v56 = vpop.f32.mrb[39].mxu1 }
 0x490   : > { %v4003_v17 = vadd.f32 %v4284_v16, %v3937_v3  ;;  %v3940_v23 = vadd.f32 %v8435_v6, %v3939_v56 }
 0x491   : > { %4302 = vst [vmem:[%s8447_s23 + $0xb0] sm:$0xff] %v4005_v55  ;;  %v4006_v50 = vadd.f32 %v4287_v11, %v3948_v58 }
 0x492   : > { %4300 = vst [vmem:[%s8447_s23 + $0xa0] sm:$0xff] %v4003_v17  ;;  %v4004_v2 = vadd.f32 %v4285_v45, %v3940_v23 }
 0x493   : > { %4303 = vst [vmem:[%s8447_s23 + $0xb8] sm:$0xff] %v4006_v50 }
 0x494   : > { %4301 = vst [vmem:[%s8447_s23 + $0xa8] sm:$0xff] %v4004_v2 }
 0x49e   : > { %v4601_v19 = vpop.f32.mrb[40].mxu1 }
 0x49f   : > { %v3961_v46 = vadd.f32 %v4601_v19, %v8435_v6  ;;  %v3952_v42 = vpop.f32.mrb[41].mxu1 }
 0x4a0   : > { %v3953_v40 = vadd.f32 %v8435_v6, %v3952_v42  ;;  %v4602_v22 = vpop.f32.mrb[42].mxu1 }
 0x4a1   : > { %v4009_v0 = vadd.f32 %v4290_v39, %v3961_v46  ;;  %v3964_v31 = vadd.f32 %v4602_v22, %v8435_v6  ;;  %v3955_v10 = vpop.f32.mrb[43].mxu1 }
 0x4a2   : > { %v4007_v28 = vadd.f32 %v4288_v18, %v3953_v40  ;;  %v3956_v37 = vadd.f32 %v8435_v6, %v3955_v10 }
 0x4a3   : > { %4306 = vst [vmem:[%s8447_s23 + $0xd0] sm:$0xff] %v4009_v0  ;;  %v4010_v57 = vadd.f32 %v4291_v21, %v3964_v31 }
 0x4a4   : > { %4304 = vst [vmem:[%s8447_s23 + $0xc0] sm:$0xff] %v4007_v28  ;;  %v4008_v63 = vadd.f32 %v4289_v5, %v3956_v37 }
 0x4a5   : > { %4307 = vst [vmem:[%s8447_s23 + $0xd8] sm:$0xff] %v4010_v57 }
 0x4a6   : > { %4305 = vst [vmem:[%s8447_s23 + $0xc8] sm:$0xff] %v4008_v63 }
 0x4af   : > { %v4605_v62 = vpop.f32.mrb[44].mxu1 }
 0x4b0   : > { %v3977_v51 = vadd.f32 %v4605_v62, %v8435_v6  ;;  %v3968_v26 = vpop.f32.mrb[45].mxu1 }
 0x4b1   : > { %v3969_v30 = vadd.f32 %v8435_v6, %v3968_v26  ;;  %v4606_v59 = vpop.f32.mrb[46].mxu1 }
 0x4b2   : > { %v4013_v61 = vadd.f32 %v4294_v38, %v3977_v51  ;;  %v3980_v34 = vadd.f32 %v4606_v59, %v8435_v6  ;;  %v3971_v13 = vpop.f32.mrb[47].mxu1 }
 0x4b3   : > { %v4011_v47 = vadd.f32 %v4292_v43, %v3969_v30  ;;  %v3972_v14 = vadd.f32 %v8435_v6, %v3971_v13 }
 0x4b4   : > { %4310 = vst [vmem:[%s8447_s23 + $0xf0] sm:$0xff] %v4013_v61  ;;  %v4014_v24 = vadd.f32 %v4295_v4, %v3980_v34 }
 0x4b5   : > { %4308 = vst [vmem:[%s8447_s23 + $0xe0] sm:$0xff] %v4011_v47  ;;  %v4012_v60 = vadd.f32 %v4293_v1, %v3972_v14 }
 0x4b6   : > { %4311 = vst [vmem:[%s8447_s23 + $0xf8] sm:$0xff] %v4014_v24 }
 0x4b7   : > { %4309 = vst [vmem:[%s8447_s23 + $0xe8] sm:$0xff] %v4012_v60 }
 0x4b8   : > { %4973 = shalt.err (!%p4970_p8)
}
 0x4b9   : > { %s4974_s28 = scalar_lea.hbm %s8539_s30, 4096  ;;  %s4978_s23 = scalar_lea.hbm %s8931_s24, 8192 }
 0x4ba   : > { %p4975_p6 = scmp.ne.s32.totalorder %s8539_s30, %s4974_s28  ;;  %p4979_p3 = scmp.lt.u32.totalorder %s8539_s30, %s8931_s24 }
 0x4bb   : > { %p4980_p5 = scmp.lt.u32.totalorder %s4978_s23, %s4974_s28  ;;  %p4982_p7 = scmp.lt.u32.totalorder %s4974_s28, %s8539_s30 }
 0x4bc   : > { %p4976_p10 = pnand %p4975_p6, %p8932_p4 }
 0x4bd   : > { %p4981_p9 = por %p4980_p5, %p4979_p3 }
 0x4be   : > { %p4977_p11 = pneg %p4976_p10 }
 0x4bf   : > { %p4983_p12 = por %p4982_p7, %p4981_p9 }
 0x4c1   : > { %p4984_p1 = pnand %p4983_p12, %p4977_p11 }
 0x4c3   : > { %4987 = shalt.err (!%p4984_p1)
}
 0x4c4   : > { %s5052_s20 = smov 128   ;;  %s5053_s29 = smov 8  }
 0x4c5   : > { %4629 = dma.vmem_to_hbm [thread:$0]  (%p8932_p4), %s8541_s1, 4096, %s8539_s30, %s4033_s19, %s5052_s20, %s5052_s20, %s5053_s29  }
 0x4c6 PF: > { %s4061_s21 = sand.u32 1, %s5026_s13   ;;  %p8933_p13 = scmp.ne.s32.totalorder %s8690_s12, 0 }
 0x4c7   : > { %p8934_p0 = scmp.ge.s32.totalorder %s5038_s16, 2  ;;  %s4062_s22 = scalar_lea.sflag [#allocation6], %s4061_s21 }
 0x4c9   : > { %p4652_p2 = pnand %p8934_p0, %p8933_p13 }
 0x4cb   : > { %5021 = dma.done.wait (!%p4652_p2), %s4062_s22, 4096  }
 0x4cc   : > { %5023 = vsyncadd (!%p4652_p2), %s4062_s22, 4294963200  ;;  %p26_p8 = scmp.ge.s32.totalorder %s5282_s11, 4   ;;  %s8935_s13 = smov %s5030_s14 }
 0x4cd   : > { %s8936_s14 = smov %s5034_s15  ;;  %s8937_s15 = smov %s5294_s4 }
 0x4ce   : > { %s8938_s16 = smov %s5282_s11  ;;  %28 = sbr.rel (!%p26_p8) target bundleno = 13 (0xd), region = 135 }
 0x4d5   :  { %4067 = vsyncpa [#allocation5], 1 }
 0x4d6   :  { %4069 = vsyncpa [#allocation5 + $0x1], 1 }
 0x4d7   :  { %4070 = vsyncpa [#allocation8], 1 }
 0x4d8   :  { %4071 = vsyncpa [#allocation11], 1 }
 0x4d9   :  { %4072 = vsyncpa [#allocation14], 1 }
 0x4da   :  { %4073 = vsyncpa [#allocation6], 1 }
 0x4db   :  { %4075 = vsyncpa [#allocation6 + $0x1], 1 }

</bundles_post_ra>
